<compile_context>
chip_gen: v6e
topology: v6e:2x2x1
jax: 0.10.0
libtpu: 0.0.40
codegen_flags: <defaults>
</compile_context>

<pallas_src>
import numpy as np
import jax
import jax.numpy as jnp
from jax import lax
from jax.experimental import pallas as pl
from jax.experimental.pallas import tpu as pltpu


# ----------------------------------------------------------------------------
# Fused Pallas kernel: all LSTM layers + last-valid-step gather + L2 normalize
# ----------------------------------------------------------------------------
def make_text_kernel(num_layers, T, BB, H, TC):
    """Builds the fused kernel for one batch block of BB rows.

    Ref layout (positional):
      refs[0]            : len (BB, 1) int32       sequence lengths (padded rows = 1)
      refs[1]            : x   (T*BB, D) bf16      embedded input, time-major slab
      refs[2 : 2+3L]     : per layer  w_ih^T (D_l,4H) bf16, w_hh^T (H,4H) bf16, bias (1,4H) f32
      refs[2+3L]         : out (BB, H) f32         L2-normalized last hidden state
      refs[3+3L:]        : scratch  gates (2*TC*BB, 4H) f32,  seq (T*BB, H) bf16

    Gate-column order is (i, f, o, g): sigmoid on [:, :3H], tanh only on [:, 3H:4H].
    """
    nch = (T + TC - 1) // TC  # number of time chunks (static)

    def kernel(*refs):
        len_ref = refs[0]
        x_ref = refs[1]
        wrefs = refs[2:2 + 3 * num_layers]
        out_ref = refs[2 + 3 * num_layers]
        gates_scr, seq_scr = refs[3 + 3 * num_layers:]

        len_col = len_ref[...]                       # (BB, 1) int32
        out_cap = jnp.zeros((BB, H), jnp.float32)    # last-layer capture, carried in vregs

        for layer in range(num_layers):
            wih_ref = wrefs[3 * layer + 0]           # (D_l, 4H) bf16
            whh_ref = wrefs[3 * layer + 1]           # (H,   4H) bf16
            b_ref = wrefs[3 * layer + 2]             # (1,   4H) f32
            is_first = layer == 0
            is_last = layer == num_layers - 1
            src_ref = x_ref if is_first else seq_scr

            # Hoisted per-chunk input projection: one (tc*BB, D_l) x (D_l, 4H) bf16 MXU
            # matmul per time chunk (bias folded in once).  Two slots so projecting
            # chunk ci+1 has no hazard with the serial recurrence over chunk ci and can
            # be scheduled underneath it.
            def project(ci, src_ref=src_ref, wih_ref=wih_ref, b_ref=b_ref):
                slot = ci % 2
                t0 = ci * TC
                tc = min(TC, T - t0)
                src = src_ref[t0 * BB:(t0 + tc) * BB, :]          # static slice, bf16
                gates_scr[slot * TC * BB: slot * TC * BB + tc * BB, :] = (
                    jnp.dot(src, wih_ref[...], preferred_element_type=jnp.float32)
                    + b_ref[...]
                )

            project(0)

            h = jnp.zeros((BB, H), jnp.float32)
            cst = jnp.zeros((BB, H), jnp.float32)

            for ci in range(nch):
                if ci + 1 < nch:
                    project(ci + 1)                  # project-ahead into the other slot
                slot_base = (ci % 2) * TC * BB
                t0 = ci * TC
                tc = min(TC, T - t0)

                def step(s, carry, slot_base=slot_base, t0=t0,
                         whh_ref=whh_ref, is_last=is_last):
                    h, cst, out_cap = carry
                    grow = pl.multiple_of(slot_base + s * BB, BB)
                    # Only the small recurrent matmul stays on the critical path
                    # (bf16 operands, f32 accumulation).
                    # TODO(synk): hold W_hh in MXU weight regs across the time loop
                    # (pltpu.matmul_push_rhs / matmul_acc_lhs) to drop the per-step fill.
                    gates = gates_scr[pl.ds(grow, BB), :] + jnp.dot(
                        h.astype(jnp.bfloat16), whh_ref[...],
                        preferred_element_type=jnp.float32)       # (BB, 4H) f32
                    sig = jax.nn.sigmoid(gates[:, :3 * H])        # i | f | o contiguous
                    i_g = sig[:, 0:H]
                    f_g = sig[:, H:2 * H]
                    o_g = sig[:, 2 * H:3 * H]
                    g_g = jnp.tanh(gates[:, 3 * H:4 * H])
                    c_new = f_g * cst + i_g * g_g
                    h_new = o_g * jnp.tanh(c_new)
                    if is_last:
                        # Fused gather: capture h at t == length-1 per batch row, so the
                        # last layer's (T, BB, H) sequence never leaves vregs.
                        take = len_col == (t0 + s + 1)            # (BB, 1) bool
                        out_cap = jnp.where(take, h_new, out_cap)
                    else:
                        srow = pl.multiple_of(t0 * BB + s * BB, BB)
                        seq_scr[pl.ds(srow, BB), :] = h_new.astype(seq_scr.dtype)
                    return h_new, c_new, out_cap

                h, cst, out_cap = lax.fori_loop(
                    0, tc, step, (h, cst, out_cap), unroll=min(tc, 8))

        # Fused L2-normalize epilogue (rsqrt runs on the EUP slot); clamp the sum of
        # squares so padded / degenerate rows cannot emit inf/NaN.
        ss = jnp.sum(out_cap * out_cap, axis=1, keepdims=True)
        out_ref[...] = out_cap * lax.rsqrt(jnp.maximum(ss, 1e-12))

    return kernel


def _vmem_buf_bytes(shape, dtype):
    """Rough padded-VMEM footprint of one buffer (last two dims rounded to tiles)."""
    shape = tuple(int(s) for s in shape)
    if len(shape) == 1:
        shape = (1,) + shape
    itemsize = np.dtype(dtype).itemsize
    sub_mult = 8 * max(1, 4 // itemsize)       # 8 for f32, 16 for bf16, 32 for int8
    lead = int(np.prod(shape[:-2])) if len(shape) > 2 else 1
    sub = -(-shape[-2] // sub_mult) * sub_mult
    lane = -(-shape[-1] // 128) * 128
    return lead * sub * lane * itemsize


def text_forward(params, x_ids, lengths):
    """Embedding lookup (XLA glue) + fused Pallas LSTM / gather / L2-norm kernel."""
    B, T = x_ids.shape
    emb_tbl = params["embedding"]
    D = emb_tbl.shape[1]
    H = params["lstm"][0]["w_hh_t"].shape[0]
    num_layers = len(params["lstm"])

    BB = 8                               # sublane-aligned batch block = one grid step
    nb = -(-B // BB)
    Bp = nb * BB
    TC = min(T, 32)                      # time-chunk length bounding the gates scratch

    # Glue: gather the embedding directly in time-major order (transposes the tiny id
    # matrix, not the embedded slab) and cast the MXU operand to bf16.
    # TODO(synk): fuse the embedding gather into the kernel (scalar-prefetched ids +
    # manual DMA from an HBM-resident table) to avoid materializing (T,B,D) in HBM.
    ids_tb = jnp.transpose(x_ids).astype(jnp.int32)                    # (T, B)
    x_tbd = jnp.take(emb_tbl, ids_tb, axis=0).astype(jnp.bfloat16)     # (T, B, D)
    x_tbd = jnp.pad(x_tbd, ((0, 0), (0, Bp - B), (0, 0)))              # (T, Bp, D)
    # (T, Bp, D) -> (nb*T*BB, D): one contiguous time-major slab per batch block, so the
    # batch grid axis maps to plain row blocks of the flattened input.
    x_blk = jnp.transpose(x_tbd.reshape(T, nb, BB, D),
                          (1, 0, 2, 3)).reshape(nb * T * BB, D)

    lens = jnp.clip(lengths.astype(jnp.int32), 1, T)                   # guard 0 / >T
    len_col = jnp.pad(lens, (0, Bp - B), constant_values=1).reshape(Bp, 1)

    args = [len_col, x_blk]
    in_specs = [
        pl.BlockSpec((BB, 1), lambda i: (i, 0)),
        pl.BlockSpec((T * BB, D), lambda i: (i, 0)),
    ]
    for layer in params["lstm"]:
        wih = layer["w_ih_t"].astype(jnp.bfloat16)        # (D_l, 4H)
        whh = layer["w_hh_t"].astype(jnp.bfloat16)        # (H,   4H)
        bias = layer["bias"]                              # (1,   4H) f32
        args += [wih, whh, bias]
        in_specs += [
            pl.BlockSpec(wih.shape, lambda i: (0, 0)),    # weights stay VMEM-resident
            pl.BlockSpec(whh.shape, lambda i: (0, 0)),
            pl.BlockSpec(bias.shape, lambda i: (0, 0)),
        ]

    scratch = [
        pltpu.VMEM((2 * TC * BB, 4 * H), jnp.float32),    # double-buffered gate chunks
        pltpu.VMEM((T * BB, H), jnp.bfloat16),            # inter-layer ping-pong sequence
    ]
    # TODO(synk): for very large T, stream x / the inter-layer sequence from HBM with
    # pltpu.emit_pipeline instead of keeping the full (T*BB, .) slabs VMEM-resident.
    # TODO(synk): production H should be a multiple of 128 lanes for dense vst /
    # full-width VPU gate math; H=32 here to match the module's out_size.

    # Scoped-VMEM limit sized from the actual blocks (double-buffered) + scratch, with
    # 2x headroom and a 16 MiB floor.
    block_bytes = (
        _vmem_buf_bytes((BB, 1), jnp.int32)
        + _vmem_buf_bytes((T * BB, D), jnp.bfloat16)
        + sum(_vmem_buf_bytes(a.shape, a.dtype) for a in args[2:])
        + _vmem_buf_bytes((BB, H), jnp.float32)
    )
    scratch_bytes = (_vmem_buf_bytes((2 * TC * BB, 4 * H), jnp.float32)
                     + _vmem_buf_bytes((T * BB, H), jnp.bfloat16))
    vmem_limit = int(max(16 * 2 ** 20, 2 * (2 * block_bytes + scratch_bytes)))

    kernel = make_text_kernel(num_layers, T, BB, H, TC)
    out_pad = pl.pallas_call(
        kernel,
        out_shape=jax.ShapeDtypeStruct((Bp, H), jnp.float32),
        grid=(nb,),
        in_specs=in_specs,
        out_specs=pl.BlockSpec((BB, H), lambda i: (i, 0)),
        scratch_shapes=scratch,
        compiler_params=pltpu.CompilerParams(
            dimension_semantics=("parallel",),     # batch blocks shard across TCs (v7x)
            vmem_limit_bytes=vmem_limit,
        ),
    )(*args)
    return out_pad[:B]


# ----------------------------------------------------------------------------
# Parameter init (weights pre-transposed, biases pre-summed, gate order (i, f, o, g))
# ----------------------------------------------------------------------------
def init_params(key, n_word, word_dim, out_size, num_layers):
    """The (i, f, o, g) column order is an init-time relabeling of PyTorch's
    (i, f, g, o) blocks (identical distribution / forward semantics); it keeps the
    three sigmoid gates contiguous so the kernel runs sigmoid on [:, :3H] and tanh
    only on [:, 3H:4H]."""
    keys = jax.random.split(key, 1 + 4 * num_layers)
    H = out_size
    params = {
        "embedding": jax.random.uniform(
            keys[0], (n_word, word_dim), jnp.float32, -0.1, 0.1
        ),
        "lstm": [],
    }
    k = 1.0 / np.sqrt(out_size)  # PyTorch LSTM default init range
    for l in range(num_layers):
        in_dim = word_dim if l == 0 else out_size
        kw = keys[1 + 4 * l: 1 + 4 * (l + 1)]
        w_ih = jax.random.uniform(kw[0], (4 * H, in_dim), jnp.float32, -k, k)
        w_hh = jax.random.uniform(kw[1], (4 * H, H), jnp.float32, -k, k)
        b = (jax.random.uniform(kw[2], (4 * H,), jnp.float32, -k, k)
             + jax.random.uniform(kw[3], (4 * H,), jnp.float32, -k, k))
        params["lstm"].append(
            {
                "w_ih_t": jnp.transpose(w_ih),            # (in_dim, 4H)
                "w_hh_t": jnp.transpose(w_hh),            # (H, 4H)
                "bias": b.reshape(1, 4 * H),              # (1, 4H)
            }
        )
    return params


# ----------------------------------------------------------------------------
# Pure-JAX f32 reference (for correctness check) — same (i, f, o, g) gate order
# ----------------------------------------------------------------------------
def text_forward_ref(params, x_ids, lengths):
    emb = jnp.take(params["embedding"], x_ids, axis=0).astype(jnp.float32)  # (B, T, D)
    B, T, _ = emb.shape
    H = params["lstm"][0]["w_hh_t"].shape[0]
    seq = emb
    for layer in params["lstm"]:
        w_ih_t, w_hh_t, bias = layer["w_ih_t"], layer["w_hh_t"], layer["bias"]

        def step(carry, x_t):
            h, c = carry
            gates = x_t @ w_ih_t + h @ w_hh_t + bias
            i = jax.nn.sigmoid(gates[:, 0:H])
            f = jax.nn.sigmoid(gates[:, H:2 * H])
            o = jax.nn.sigmoid(gates[:, 2 * H:3 * H])
            g = jnp.tanh(gates[:, 3 * H:4 * H])
            c = f * c + i * g
            h = o * jnp.tanh(c)
            return (h, c), h

        h0 = jnp.zeros((B, H), jnp.float32)
        (_, _), outs = lax.scan(step, (h0, h0), jnp.transpose(seq, (1, 0, 2)))
        seq = jnp.transpose(outs, (1, 0, 2))
    lens = jnp.clip(lengths.astype(jnp.int32), 1, T)
    last = seq[jnp.arange(B), lens - 1]                     # (B, H)
    return last / jnp.sqrt(jnp.sum(last * last, axis=1, keepdims=True))


if __name__ == "__main__":
    n_word, word_dim, out_size, num_layers = 50, 32, 32, 3
    B, T = 2, 8

    key = jax.random.PRNGKey(0)
    pkey, xkey = jax.random.split(key)
    params = init_params(pkey, n_word, word_dim, out_size, num_layers)

    x_ids = jax.random.randint(xkey, (B, T), 0, n_word, dtype=jnp.int32)
    lengths = jnp.array([8, 5], dtype=jnp.int32)  # sorted descending (pack_padded req.)

    out = jax.block_until_ready(text_forward(params, x_ids, lengths))
    ref = jax.block_until_ready(text_forward_ref(params, x_ids, lengths))

    assert out.shape == (B, out_size)
    # Tolerance accounts for bf16 MXU operands in the kernel vs. the f32 reference.
    np.testing.assert_allclose(np.asarray(out), np.asarray(ref), rtol=2e-2, atol=2e-2)

    print("KERNEL_OK")
</pallas_src>

<mosaic_0001>
module attributes {stable_mosaic.version = 11 : i64} {
  func.func @kernel(%arg0: i32, %arg1: memref<8x1xi32, #tpu.memory_space<vmem>>, %arg2: memref<64x32xbf16, #tpu.memory_space<vmem>>, %arg3: memref<32x128xbf16, #tpu.memory_space<vmem>>, %arg4: memref<32x128xbf16, #tpu.memory_space<vmem>>, %arg5: memref<1x128xf32, #tpu.memory_space<vmem>>, %arg6: memref<32x128xbf16, #tpu.memory_space<vmem>>, %arg7: memref<32x128xbf16, #tpu.memory_space<vmem>>, %arg8: memref<1x128xf32, #tpu.memory_space<vmem>>, %arg9: memref<32x128xbf16, #tpu.memory_space<vmem>>, %arg10: memref<32x128xbf16, #tpu.memory_space<vmem>>, %arg11: memref<1x128xf32, #tpu.memory_space<vmem>>, %arg12: memref<8x32xf32, #tpu.memory_space<vmem>>, %arg13: memref<128x128xf32, #tpu.memory_space<vmem>>, %arg14: memref<64x32xbf16, #tpu.memory_space<vmem>>) attributes {dimension_semantics = [#tpu.dimension_semantics<parallel>], iteration_bounds = array<i64: 1>, scalar_prefetch = 0 : i64, scratch_operands = 2 : i64, tpu.core_type = #tpu.core_type<tc>, window_params = [{transform_indices = @transform_0, window_bounds = array<i64: 8, 1>}, {transform_indices = @transform_1, window_bounds = array<i64: 64, 32>}, {pipeline_mode = #tpu.pipeline_mode<synchronous>, transform_indices = @transform_2, window_bounds = array<i64: 32, 128>}, {pipeline_mode = #tpu.pipeline_mode<synchronous>, transform_indices = @transform_3, window_bounds = array<i64: 32, 128>}, {pipeline_mode = #tpu.pipeline_mode<synchronous>, transform_indices = @transform_4, window_bounds = array<i64: 1, 128>}, {pipeline_mode = #tpu.pipeline_mode<synchronous>, transform_indices = @transform_5, window_bounds = array<i64: 32, 128>}, {pipeline_mode = #tpu.pipeline_mode<synchronous>, transform_indices = @transform_6, window_bounds = array<i64: 32, 128>}, {pipeline_mode = #tpu.pipeline_mode<synchronous>, transform_indices = @transform_7, window_bounds = array<i64: 1, 128>}, {pipeline_mode = #tpu.pipeline_mode<synchronous>, transform_indices = @transform_8, window_bounds = array<i64: 32, 128>}, {pipeline_mode = #tpu.pipeline_mode<synchronous>, transform_indices = @transform_9, window_bounds = array<i64: 32, 128>}, {pipeline_mode = #tpu.pipeline_mode<synchronous>, transform_indices = @transform_10, window_bounds = array<i64: 1, 128>}, {transform_indices = @transform_11, window_bounds = array<i64: 8, 32>}]} {
    %c0 = arith.constant 0 : index
    %c0_0 = arith.constant 0 : index
    %0 = vector.load %arg1[%c0, %c0_0] : memref<8x1xi32, #tpu.memory_space<vmem>>, vector<8x1xi32>
    %cst = arith.constant 0.000000e+00 : f32
    %1 = vector.broadcast %cst : f32 to vector<8x32xf32>
    %c0_1 = arith.constant 0 : index
    %c0_2 = arith.constant 0 : index
    %2 = vector.load %arg2[%c0_1, %c0_2] : memref<64x32xbf16, #tpu.memory_space<vmem>>, vector<64x32xbf16>
    %c0_3 = arith.constant 0 : index
    %c0_4 = arith.constant 0 : index
    %3 = vector.load %arg3[%c0_3, %c0_4] : memref<32x128xbf16, #tpu.memory_space<vmem>>, vector<32x128xbf16>
    %cst_5 = arith.constant dense<0.000000e+00> : vector<64x128xf32>
    %4 = tpu.matmul %2, %3, %cst_5 {dimension_numbers = #tpu.dot_dimension_numbers<[1], [0], [0], [1], [0, 0, 1, 1], [], []>} : vector<64x32xbf16>, vector<32x128xbf16>, vector<64x128xf32> -> vector<64x128xf32>
    %c0_6 = arith.constant 0 : index
    %c0_7 = arith.constant 0 : index
    %5 = vector.load %arg5[%c0_6, %c0_7] : memref<1x128xf32, #tpu.memory_space<vmem>>, vector<1x128xf32>
    %6 = vector.broadcast %5 : vector<1x128xf32> to vector<64x128xf32>
    %7 = arith.addf %4, %6 : vector<64x128xf32>
    %c0_8 = arith.constant 0 : index
    %c0_9 = arith.constant 0 : index
    %8 = vector.load %arg13[%c0_8, %c0_9] : memref<128x128xf32, #tpu.memory_space<vmem>>, vector<64x128xf32>
    tpu.vector_store %arg13[%c0_8, %c0_9], %7 {strides = array<i32>} : memref<128x128xf32, #tpu.memory_space<vmem>>, vector<64x128xf32>,
    %cst_10 = arith.constant 0.000000e+00 : f32
    %9 = vector.broadcast %cst_10 : f32 to vector<8x32xf32>
    %cst_11 = arith.constant 0.000000e+00 : f32
    %10 = vector.broadcast %cst_11 : f32 to vector<8x32xf32>
    %c0_i32 = arith.constant 0 : i32
    %c8_i32 = arith.constant 8 : i32
    %11 = arith.muli %c0_i32, %c8_i32 : i32
    %c0_i32_12 = arith.constant 0 : i32
    %12 = arith.addi %c0_i32_12, %11 : i32
    %13 = tpu.assume_multiple %12, 8 : i32
    %14 = arith.index_cast %13 : i32 to index
    %c0_13 = arith.constant 0 : index
    %15 = vector.load %arg13[%14, %c0_13] : memref<128x128xf32, #tpu.memory_space<vmem>>, vector<8x128xf32>
    %16 = arith.truncf %9 : vector<8x32xf32> to vector<8x32xbf16>
    %c0_14 = arith.constant 0 : index
    %c0_15 = arith.constant 0 : index
    %17 = vector.load %arg4[%c0_14, %c0_15] : memref<32x128xbf16, #tpu.memory_space<vmem>>, vector<32x128xbf16>
    %cst_16 = arith.constant dense<0.000000e+00> : vector<8x128xf32>
    %18 = tpu.matmul %16, %17, %cst_16 {dimension_numbers = #tpu.dot_dimension_numbers<[1], [0], [0], [1], [0, 0, 1, 1], [], []>} : vector<8x32xbf16>, vector<32x128xbf16>, vector<8x128xf32> -> vector<8x128xf32>
    %19 = arith.addf %15, %18 : vector<8x128xf32>
    %20 = vector.extract_strided_slice %19 {offsets = [0, 0], sizes = [8, 96], strides = [1, 1]} : vector<8x128xf32> to vector<8x96xf32>
    %21 = arith.negf %20 : vector<8x96xf32>
    %22 = math.exp %21 : vector<8x96xf32>
    %cst_17 = arith.constant 1.000000e+00 : f32
    %23 = vector.broadcast %cst_17 : f32 to vector<8x96xf32>
    %24 = arith.addf %23, %22 : vector<8x96xf32>
    %25 = arith.divf %23, %24 : vector<8x96xf32>
    %26 = vector.extract_strided_slice %25 {offsets = [0, 0], sizes = [8, 32], strides = [1, 1]} : vector<8x96xf32> to vector<8x32xf32>
    %27 = vector.extract_strided_slice %25 {offsets = [0, 32], sizes = [8, 32], strides = [1, 1]} : vector<8x96xf32> to vector<8x32xf32>
    %28 = vector.extract_strided_slice %25 {offsets = [0, 64], sizes = [8, 32], strides = [1, 1]} : vector<8x96xf32> to vector<8x32xf32>
    %29 = vector.extract_strided_slice %19 {offsets = [0, 96], sizes = [8, 32], strides = [1, 1]} : vector<8x128xf32> to vector<8x32xf32>
    %30 = math.tanh %29 : vector<8x32xf32>
    %31 = arith.mulf %27, %10 : vector<8x32xf32>
    %32 = arith.mulf %26, %30 : vector<8x32xf32>
    %33 = arith.addf %31, %32 : vector<8x32xf32>
    %34 = math.tanh %33 : vector<8x32xf32>
    %35 = arith.mulf %28, %34 : vector<8x32xf32>
    %c8_i32_18 = arith.constant 8 : i32
    %36 = arith.muli %c0_i32, %c8_i32_18 : i32
    %c0_i32_19 = arith.constant 0 : i32
    %37 = arith.addi %c0_i32_19, %36 : i32
    %38 = tpu.assume_multiple %37, 8 : i32
    %39 = arith.truncf %35 : vector<8x32xf32> to vector<8x32xbf16>
    %40 = arith.index_cast %38 : i32 to index
    %c0_20 = arith.constant 0 : index
    %41 = vector.load %arg14[%40, %c0_20] : memref<64x32xbf16, #tpu.memory_space<vmem>>, vector<8x32xbf16>
    tpu.vector_store %arg14[%40, %c0_20], %39 {strides = array<i32>} : memref<64x32xbf16, #tpu.memory_space<vmem>>, vector<8x32xbf16>,
    %c1_i32 = arith.constant 1 : i32
    %c8_i32_21 = arith.constant 8 : i32
    %42 = arith.muli %c1_i32, %c8_i32_21 : i32
    %c0_i32_22 = arith.constant 0 : i32
    %43 = arith.addi %c0_i32_22, %42 : i32
    %44 = tpu.assume_multiple %43, 8 : i32
    %45 = arith.index_cast %44 : i32 to index
    %c0_23 = arith.constant 0 : index
    %46 = vector.load %arg13[%45, %c0_23] : memref<128x128xf32, #tpu.memory_space<vmem>>, vector<8x128xf32>
    %47 = arith.truncf %35 : vector<8x32xf32> to vector<8x32xbf16>
    %c0_24 = arith.constant 0 : index
    %c0_25 = arith.constant 0 : index
    %48 = vector.load %arg4[%c0_24, %c0_25] : memref<32x128xbf16, #tpu.memory_space<vmem>>, vector<32x128xbf16>
    %cst_26 = arith.constant dense<0.000000e+00> : vector<8x128xf32>
    %49 = tpu.matmul %47, %48, %cst_26 {dimension_numbers = #tpu.dot_dimension_numbers<[1], [0], [0], [1], [0, 0, 1, 1], [], []>} : vector<8x32xbf16>, vector<32x128xbf16>, vector<8x128xf32> -> vector<8x128xf32>
    %50 = arith.addf %46, %49 : vector<8x128xf32>
    %51 = vector.extract_strided_slice %50 {offsets = [0, 0], sizes = [8, 96], strides = [1, 1]} : vector<8x128xf32> to vector<8x96xf32>
    %52 = arith.negf %51 : vector<8x96xf32>
    %53 = math.exp %52 : vector<8x96xf32>
    %cst_27 = arith.constant 1.000000e+00 : f32
    %54 = vector.broadcast %cst_27 : f32 to vector<8x96xf32>
    %55 = arith.addf %54, %53 : vector<8x96xf32>
    %56 = arith.divf %54, %55 : vector<8x96xf32>
    %57 = vector.extract_strided_slice %56 {offsets = [0, 0], sizes = [8, 32], strides = [1, 1]} : vector<8x96xf32> to vector<8x32xf32>
    %58 = vector.extract_strided_slice %56 {offsets = [0, 32], sizes = [8, 32], strides = [1, 1]} : vector<8x96xf32> to vector<8x32xf32>
    %59 = vector.extract_strided_slice %56 {offsets = [0, 64], sizes = [8, 32], strides = [1, 1]} : vector<8x96xf32> to vector<8x32xf32>
    %60 = vector.extract_strided_slice %50 {offsets = [0, 96], sizes = [8, 32], strides = [1, 1]} : vector<8x128xf32> to vector<8x32xf32>
    %61 = math.tanh %60 : vector<8x32xf32>
    %62 = arith.mulf %58, %33 : vector<8x32xf32>
    %63 = arith.mulf %57, %61 : vector<8x32xf32>
    %64 = arith.addf %62, %63 : vector<8x32xf32>
    %65 = math.tanh %64 : vector<8x32xf32>
    %66 = arith.mulf %59, %65 : vector<8x32xf32>
    %c8_i32_28 = arith.constant 8 : i32
    %67 = arith.muli %c1_i32, %c8_i32_28 : i32
    %c0_i32_29 = arith.constant 0 : i32
    %68 = arith.addi %c0_i32_29, %67 : i32
    %69 = tpu.assume_multiple %68, 8 : i32
    %70 = arith.truncf %66 : vector<8x32xf32> to vector<8x32xbf16>
    %71 = arith.index_cast %69 : i32 to index
    %c0_30 = arith.constant 0 : index
    %72 = vector.load %arg14[%71, %c0_30] : memref<64x32xbf16, #tpu.memory_space<vmem>>, vector<8x32xbf16>
    tpu.vector_store %arg14[%71, %c0_30], %70 {strides = array<i32>} : memref<64x32xbf16, #tpu.memory_space<vmem>>, vector<8x32xbf16>,
    %c2_i32 = arith.constant 2 : i32
    %c8_i32_31 = arith.constant 8 : i32
    %73 = arith.muli %c2_i32, %c8_i32_31 : i32
    %c0_i32_32 = arith.constant 0 : i32
    %74 = arith.addi %c0_i32_32, %73 : i32
    %75 = tpu.assume_multiple %74, 8 : i32
    %76 = arith.index_cast %75 : i32 to index
    %c0_33 = arith.constant 0 : index
    %77 = vector.load %arg13[%76, %c0_33] : memref<128x128xf32, #tpu.memory_space<vmem>>, vector<8x128xf32>
    %78 = arith.truncf %66 : vector<8x32xf32> to vector<8x32xbf16>
    %c0_34 = arith.constant 0 : index
    %c0_35 = arith.constant 0 : index
    %79 = vector.load %arg4[%c0_34, %c0_35] : memref<32x128xbf16, #tpu.memory_space<vmem>>, vector<32x128xbf16>
    %cst_36 = arith.constant dense<0.000000e+00> : vector<8x128xf32>
    %80 = tpu.matmul %78, %79, %cst_36 {dimension_numbers = #tpu.dot_dimension_numbers<[1], [0], [0], [1], [0, 0, 1, 1], [], []>} : vector<8x32xbf16>, vector<32x128xbf16>, vector<8x128xf32> -> vector<8x128xf32>
    %81 = arith.addf %77, %80 : vector<8x128xf32>
    %82 = vector.extract_strided_slice %81 {offsets = [0, 0], sizes = [8, 96], strides = [1, 1]} : vector<8x128xf32> to vector<8x96xf32>
    %83 = arith.negf %82 : vector<8x96xf32>
    %84 = math.exp %83 : vector<8x96xf32>
    %cst_37 = arith.constant 1.000000e+00 : f32
    %85 = vector.broadcast %cst_37 : f32 to vector<8x96xf32>
    %86 = arith.addf %85, %84 : vector<8x96xf32>
    %87 = arith.divf %85, %86 : vector<8x96xf32>
    %88 = vector.extract_strided_slice %87 {offsets = [0, 0], sizes = [8, 32], strides = [1, 1]} : vector<8x96xf32> to vector<8x32xf32>
    %89 = vector.extract_strided_slice %87 {offsets = [0, 32], sizes = [8, 32], strides = [1, 1]} : vector<8x96xf32> to vector<8x32xf32>
    %90 = vector.extract_strided_slice %87 {offsets = [0, 64], sizes = [8, 32], strides = [1, 1]} : vector<8x96xf32> to vector<8x32xf32>
    %91 = vector.extract_strided_slice %81 {offsets = [0, 96], sizes = [8, 32], strides = [1, 1]} : vector<8x128xf32> to vector<8x32xf32>
    %92 = math.tanh %91 : vector<8x32xf32>
    %93 = arith.mulf %89, %64 : vector<8x32xf32>
    %94 = arith.mulf %88, %92 : vector<8x32xf32>
    %95 = arith.addf %93, %94 : vector<8x32xf32>
    %96 = math.tanh %95 : vector<8x32xf32>
    %97 = arith.mulf %90, %96 : vector<8x32xf32>
    %c8_i32_38 = arith.constant 8 : i32
    %98 = arith.muli %c2_i32, %c8_i32_38 : i32
    %c0_i32_39 = arith.constant 0 : i32
    %99 = arith.addi %c0_i32_39, %98 : i32
    %100 = tpu.assume_multiple %99, 8 : i32
    %101 = arith.truncf %97 : vector<8x32xf32> to vector<8x32xbf16>
    %102 = arith.index_cast %100 : i32 to index
    %c0_40 = arith.constant 0 : index
    %103 = vector.load %arg14[%102, %c0_40] : memref<64x32xbf16, #tpu.memory_space<vmem>>, vector<8x32xbf16>
    tpu.vector_store %arg14[%102, %c0_40], %101 {strides = array<i32>} : memref<64x32xbf16, #tpu.memory_space<vmem>>, vector<8x32xbf16>,
    %c3_i32 = arith.constant 3 : i32
    %c8_i32_41 = arith.constant 8 : i32
    %104 = arith.muli %c3_i32, %c8_i32_41 : i32
    %c0_i32_42 = arith.constant 0 : i32
    %105 = arith.addi %c0_i32_42, %104 : i32
    %106 = tpu.assume_multiple %105, 8 : i32
    %107 = arith.index_cast %106 : i32 to index
    %c0_43 = arith.constant 0 : index
    %108 = vector.load %arg13[%107, %c0_43] : memref<128x128xf32, #tpu.memory_space<vmem>>, vector<8x128xf32>
    %109 = arith.truncf %97 : vector<8x32xf32> to vector<8x32xbf16>
    %c0_44 = arith.constant 0 : index
    %c0_45 = arith.constant 0 : index
    %110 = vector.load %arg4[%c0_44, %c0_45] : memref<32x128xbf16, #tpu.memory_space<vmem>>, vector<32x128xbf16>
    %cst_46 = arith.constant dense<0.000000e+00> : vector<8x128xf32>
    %111 = tpu.matmul %109, %110, %cst_46 {dimension_numbers = #tpu.dot_dimension_numbers<[1], [0], [0], [1], [0, 0, 1, 1], [], []>} : vector<8x32xbf16>, vector<32x128xbf16>, vector<8x128xf32> -> vector<8x128xf32>
    %112 = arith.addf %108, %111 : vector<8x128xf32>
    %113 = vector.extract_strided_slice %112 {offsets = [0, 0], sizes = [8, 96], strides = [1, 1]} : vector<8x128xf32> to vector<8x96xf32>
    %114 = arith.negf %113 : vector<8x96xf32>
    %115 = math.exp %114 : vector<8x96xf32>
    %cst_47 = arith.constant 1.000000e+00 : f32
    %116 = vector.broadcast %cst_47 : f32 to vector<8x96xf32>
    %117 = arith.addf %116, %115 : vector<8x96xf32>
    %118 = arith.divf %116, %117 : vector<8x96xf32>
    %119 = vector.extract_strided_slice %118 {offsets = [0, 0], sizes = [8, 32], strides = [1, 1]} : vector<8x96xf32> to vector<8x32xf32>
    %120 = vector.extract_strided_slice %118 {offsets = [0, 32], sizes = [8, 32], strides = [1, 1]} : vector<8x96xf32> to vector<8x32xf32>
    %121 = vector.extract_strided_slice %118 {offsets = [0, 64], sizes = [8, 32], strides = [1, 1]} : vector<8x96xf32> to vector<8x32xf32>
    %122 = vector.extract_strided_slice %112 {offsets = [0, 96], sizes = [8, 32], strides = [1, 1]} : vector<8x128xf32> to vector<8x32xf32>
    %123 = math.tanh %122 : vector<8x32xf32>
    %124 = arith.mulf %120, %95 : vector<8x32xf32>
    %125 = arith.mulf %119, %123 : vector<8x32xf32>
    %126 = arith.addf %124, %125 : vector<8x32xf32>
    %127 = math.tanh %126 : vector<8x32xf32>
    %128 = arith.mulf %121, %127 : vector<8x32xf32>
    %c8_i32_48 = arith.constant 8 : i32
    %129 = arith.muli %c3_i32, %c8_i32_48 : i32
    %c0_i32_49 = arith.constant 0 : i32
    %130 = arith.addi %c0_i32_49, %129 : i32
    %131 = tpu.assume_multiple %130, 8 : i32
    %132 = arith.truncf %128 : vector<8x32xf32> to vector<8x32xbf16>
    %133 = arith.index_cast %131 : i32 to index
    %c0_50 = arith.constant 0 : index
    %134 = vector.load %arg14[%133, %c0_50] : memref<64x32xbf16, #tpu.memory_space<vmem>>, vector<8x32xbf16>
    tpu.vector_store %arg14[%133, %c0_50], %132 {strides = array<i32>} : memref<64x32xbf16, #tpu.memory_space<vmem>>, vector<8x32xbf16>,
    %c4_i32 = arith.constant 4 : i32
    %c8_i32_51 = arith.constant 8 : i32
    %135 = arith.muli %c4_i32, %c8_i32_51 : i32
    %c0_i32_52 = arith.constant 0 : i32
    %136 = arith.addi %c0_i32_52, %135 : i32
    %137 = tpu.assume_multiple %136, 8 : i32
    %138 = arith.index_cast %137 : i32 to index
    %c0_53 = arith.constant 0 : index
    %139 = vector.load %arg13[%138, %c0_53] : memref<128x128xf32, #tpu.memory_space<vmem>>, vector<8x128xf32>
    %140 = arith.truncf %128 : vector<8x32xf32> to vector<8x32xbf16>
    %c0_54 = arith.constant 0 : index
    %c0_55 = arith.constant 0 : index
    %141 = vector.load %arg4[%c0_54, %c0_55] : memref<32x128xbf16, #tpu.memory_space<vmem>>, vector<32x128xbf16>
    %cst_56 = arith.constant dense<0.000000e+00> : vector<8x128xf32>
    %142 = tpu.matmul %140, %141, %cst_56 {dimension_numbers = #tpu.dot_dimension_numbers<[1], [0], [0], [1], [0, 0, 1, 1], [], []>} : vector<8x32xbf16>, vector<32x128xbf16>, vector<8x128xf32> -> vector<8x128xf32>
    %143 = arith.addf %139, %142 : vector<8x128xf32>
    %144 = vector.extract_strided_slice %143 {offsets = [0, 0], sizes = [8, 96], strides = [1, 1]} : vector<8x128xf32> to vector<8x96xf32>
    %145 = arith.negf %144 : vector<8x96xf32>
    %146 = math.exp %145 : vector<8x96xf32>
    %cst_57 = arith.constant 1.000000e+00 : f32
    %147 = vector.broadcast %cst_57 : f32 to vector<8x96xf32>
    %148 = arith.addf %147, %146 : vector<8x96xf32>
    %149 = arith.divf %147, %148 : vector<8x96xf32>
    %150 = vector.extract_strided_slice %149 {offsets = [0, 0], sizes = [8, 32], strides = [1, 1]} : vector<8x96xf32> to vector<8x32xf32>
    %151 = vector.extract_strided_slice %149 {offsets = [0, 32], sizes = [8, 32], strides = [1, 1]} : vector<8x96xf32> to vector<8x32xf32>
    %152 = vector.extract_strided_slice %149 {offsets = [0, 64], sizes = [8, 32], strides = [1, 1]} : vector<8x96xf32> to vector<8x32xf32>
    %153 = vector.extract_strided_slice %143 {offsets = [0, 96], sizes = [8, 32], strides = [1, 1]} : vector<8x128xf32> to vector<8x32xf32>
    %154 = math.tanh %153 : vector<8x32xf32>
    %155 = arith.mulf %151, %126 : vector<8x32xf32>
    %156 = arith.mulf %150, %154 : vector<8x32xf32>
    %157 = arith.addf %155, %156 : vector<8x32xf32>
    %158 = math.tanh %157 : vector<8x32xf32>
    %159 = arith.mulf %152, %158 : vector<8x32xf32>
    %c8_i32_58 = arith.constant 8 : i32
    %160 = arith.muli %c4_i32, %c8_i32_58 : i32
    %c0_i32_59 = arith.constant 0 : i32
    %161 = arith.addi %c0_i32_59, %160 : i32
    %162 = tpu.assume_multiple %161, 8 : i32
    %163 = arith.truncf %159 : vector<8x32xf32> to vector<8x32xbf16>
    %164 = arith.index_cast %162 : i32 to index
    %c0_60 = arith.constant 0 : index
    %165 = vector.load %arg14[%164, %c0_60] : memref<64x32xbf16, #tpu.memory_space<vmem>>, vector<8x32xbf16>
    tpu.vector_store %arg14[%164, %c0_60], %163 {strides = array<i32>} : memref<64x32xbf16, #tpu.memory_space<vmem>>, vector<8x32xbf16>,
    %c5_i32 = arith.constant 5 : i32
    %c8_i32_61 = arith.constant 8 : i32
    %166 = arith.muli %c5_i32, %c8_i32_61 : i32
    %c0_i32_62 = arith.constant 0 : i32
    %167 = arith.addi %c0_i32_62, %166 : i32
    %168 = tpu.assume_multiple %167, 8 : i32
    %169 = arith.index_cast %168 : i32 to index
    %c0_63 = arith.constant 0 : index
    %170 = vector.load %arg13[%169, %c0_63] : memref<128x128xf32, #tpu.memory_space<vmem>>, vector<8x128xf32>
    %171 = arith.truncf %159 : vector<8x32xf32> to vector<8x32xbf16>
    %c0_64 = arith.constant 0 : index
    %c0_65 = arith.constant 0 : index
    %172 = vector.load %arg4[%c0_64, %c0_65] : memref<32x128xbf16, #tpu.memory_space<vmem>>, vector<32x128xbf16>
    %cst_66 = arith.constant dense<0.000000e+00> : vector<8x128xf32>
    %173 = tpu.matmul %171, %172, %cst_66 {dimension_numbers = #tpu.dot_dimension_numbers<[1], [0], [0], [1], [0, 0, 1, 1], [], []>} : vector<8x32xbf16>, vector<32x128xbf16>, vector<8x128xf32> -> vector<8x128xf32>
    %174 = arith.addf %170, %173 : vector<8x128xf32>
    %175 = vector.extract_strided_slice %174 {offsets = [0, 0], sizes = [8, 96], strides = [1, 1]} : vector<8x128xf32> to vector<8x96xf32>
    %176 = arith.negf %175 : vector<8x96xf32>
    %177 = math.exp %176 : vector<8x96xf32>
    %cst_67 = arith.constant 1.000000e+00 : f32
    %178 = vector.broadcast %cst_67 : f32 to vector<8x96xf32>
    %179 = arith.addf %178, %177 : vector<8x96xf32>
    %180 = arith.divf %178, %179 : vector<8x96xf32>
    %181 = vector.extract_strided_slice %180 {offsets = [0, 0], sizes = [8, 32], strides = [1, 1]} : vector<8x96xf32> to vector<8x32xf32>
    %182 = vector.extract_strided_slice %180 {offsets = [0, 32], sizes = [8, 32], strides = [1, 1]} : vector<8x96xf32> to vector<8x32xf32>
    %183 = vector.extract_strided_slice %180 {offsets = [0, 64], sizes = [8, 32], strides = [1, 1]} : vector<8x96xf32> to vector<8x32xf32>
    %184 = vector.extract_strided_slice %174 {offsets = [0, 96], sizes = [8, 32], strides = [1, 1]} : vector<8x128xf32> to vector<8x32xf32>
    %185 = math.tanh %184 : vector<8x32xf32>
    %186 = arith.mulf %182, %157 : vector<8x32xf32>
    %187 = arith.mulf %181, %185 : vector<8x32xf32>
    %188 = arith.addf %186, %187 : vector<8x32xf32>
    %189 = math.tanh %188 : vector<8x32xf32>
    %190 = arith.mulf %183, %189 : vector<8x32xf32>
    %c8_i32_68 = arith.constant 8 : i32
    %191 = arith.muli %c5_i32, %c8_i32_68 : i32
    %c0_i32_69 = arith.constant 0 : i32
    %192 = arith.addi %c0_i32_69, %191 : i32
    %193 = tpu.assume_multiple %192, 8 : i32
    %194 = arith.truncf %190 : vector<8x32xf32> to vector<8x32xbf16>
    %195 = arith.index_cast %193 : i32 to index
    %c0_70 = arith.constant 0 : index
    %196 = vector.load %arg14[%195, %c0_70] : memref<64x32xbf16, #tpu.memory_space<vmem>>, vector<8x32xbf16>
    tpu.vector_store %arg14[%195, %c0_70], %194 {strides = array<i32>} : memref<64x32xbf16, #tpu.memory_space<vmem>>, vector<8x32xbf16>,
    %c6_i32 = arith.constant 6 : i32
    %c8_i32_71 = arith.constant 8 : i32
    %197 = arith.muli %c6_i32, %c8_i32_71 : i32
    %c0_i32_72 = arith.constant 0 : i32
    %198 = arith.addi %c0_i32_72, %197 : i32
    %199 = tpu.assume_multiple %198, 8 : i32
    %200 = arith.index_cast %199 : i32 to index
    %c0_73 = arith.constant 0 : index
    %201 = vector.load %arg13[%200, %c0_73] : memref<128x128xf32, #tpu.memory_space<vmem>>, vector<8x128xf32>
    %202 = arith.truncf %190 : vector<8x32xf32> to vector<8x32xbf16>
    %c0_74 = arith.constant 0 : index
    %c0_75 = arith.constant 0 : index
    %203 = vector.load %arg4[%c0_74, %c0_75] : memref<32x128xbf16, #tpu.memory_space<vmem>>, vector<32x128xbf16>
    %cst_76 = arith.constant dense<0.000000e+00> : vector<8x128xf32>
    %204 = tpu.matmul %202, %203, %cst_76 {dimension_numbers = #tpu.dot_dimension_numbers<[1], [0], [0], [1], [0, 0, 1, 1], [], []>} : vector<8x32xbf16>, vector<32x128xbf16>, vector<8x128xf32> -> vector<8x128xf32>
    %205 = arith.addf %201, %204 : vector<8x128xf32>
    %206 = vector.extract_strided_slice %205 {offsets = [0, 0], sizes = [8, 96], strides = [1, 1]} : vector<8x128xf32> to vector<8x96xf32>
    %207 = arith.negf %206 : vector<8x96xf32>
    %208 = math.exp %207 : vector<8x96xf32>
    %cst_77 = arith.constant 1.000000e+00 : f32
    %209 = vector.broadcast %cst_77 : f32 to vector<8x96xf32>
    %210 = arith.addf %209, %208 : vector<8x96xf32>
    %211 = arith.divf %209, %210 : vector<8x96xf32>
    %212 = vector.extract_strided_slice %211 {offsets = [0, 0], sizes = [8, 32], strides = [1, 1]} : vector<8x96xf32> to vector<8x32xf32>
    %213 = vector.extract_strided_slice %211 {offsets = [0, 32], sizes = [8, 32], strides = [1, 1]} : vector<8x96xf32> to vector<8x32xf32>
    %214 = vector.extract_strided_slice %211 {offsets = [0, 64], sizes = [8, 32], strides = [1, 1]} : vector<8x96xf32> to vector<8x32xf32>
    %215 = vector.extract_strided_slice %205 {offsets = [0, 96], sizes = [8, 32], strides = [1, 1]} : vector<8x128xf32> to vector<8x32xf32>
    %216 = math.tanh %215 : vector<8x32xf32>
    %217 = arith.mulf %213, %188 : vector<8x32xf32>
    %218 = arith.mulf %212, %216 : vector<8x32xf32>
    %219 = arith.addf %217, %218 : vector<8x32xf32>
    %220 = math.tanh %219 : vector<8x32xf32>
    %221 = arith.mulf %214, %220 : vector<8x32xf32>
    %c8_i32_78 = arith.constant 8 : i32
    %222 = arith.muli %c6_i32, %c8_i32_78 : i32
    %c0_i32_79 = arith.constant 0 : i32
    %223 = arith.addi %c0_i32_79, %222 : i32
    %224 = tpu.assume_multiple %223, 8 : i32
    %225 = arith.truncf %221 : vector<8x32xf32> to vector<8x32xbf16>
    %226 = arith.index_cast %224 : i32 to index
    %c0_80 = arith.constant 0 : index
    %227 = vector.load %arg14[%226, %c0_80] : memref<64x32xbf16, #tpu.memory_space<vmem>>, vector<8x32xbf16>
    tpu.vector_store %arg14[%226, %c0_80], %225 {strides = array<i32>} : memref<64x32xbf16, #tpu.memory_space<vmem>>, vector<8x32xbf16>,
    %c7_i32 = arith.constant 7 : i32
    %c8_i32_81 = arith.constant 8 : i32
    %228 = arith.muli %c7_i32, %c8_i32_81 : i32
    %c0_i32_82 = arith.constant 0 : i32
    %229 = arith.addi %c0_i32_82, %228 : i32
    %230 = tpu.assume_multiple %229, 8 : i32
    %231 = arith.index_cast %230 : i32 to index
    %c0_83 = arith.constant 0 : index
    %232 = vector.load %arg13[%231, %c0_83] : memref<128x128xf32, #tpu.memory_space<vmem>>, vector<8x128xf32>
    %233 = arith.truncf %221 : vector<8x32xf32> to vector<8x32xbf16>
    %c0_84 = arith.constant 0 : index
    %c0_85 = arith.constant 0 : index
    %234 = vector.load %arg4[%c0_84, %c0_85] : memref<32x128xbf16, #tpu.memory_space<vmem>>, vector<32x128xbf16>
    %cst_86 = arith.constant dense<0.000000e+00> : vector<8x128xf32>
    %235 = tpu.matmul %233, %234, %cst_86 {dimension_numbers = #tpu.dot_dimension_numbers<[1], [0], [0], [1], [0, 0, 1, 1], [], []>} : vector<8x32xbf16>, vector<32x128xbf16>, vector<8x128xf32> -> vector<8x128xf32>
    %236 = arith.addf %232, %235 : vector<8x128xf32>
    %237 = vector.extract_strided_slice %236 {offsets = [0, 0], sizes = [8, 96], strides = [1, 1]} : vector<8x128xf32> to vector<8x96xf32>
    %238 = arith.negf %237 : vector<8x96xf32>
    %239 = math.exp %238 : vector<8x96xf32>
    %cst_87 = arith.constant 1.000000e+00 : f32
    %240 = vector.broadcast %cst_87 : f32 to vector<8x96xf32>
    %241 = arith.addf %240, %239 : vector<8x96xf32>
    %242 = arith.divf %240, %241 : vector<8x96xf32>
    %243 = vector.extract_strided_slice %242 {offsets = [0, 0], sizes = [8, 32], strides = [1, 1]} : vector<8x96xf32> to vector<8x32xf32>
    %244 = vector.extract_strided_slice %242 {offsets = [0, 32], sizes = [8, 32], strides = [1, 1]} : vector<8x96xf32> to vector<8x32xf32>
    %245 = vector.extract_strided_slice %242 {offsets = [0, 64], sizes = [8, 32], strides = [1, 1]} : vector<8x96xf32> to vector<8x32xf32>
    %246 = vector.extract_strided_slice %236 {offsets = [0, 96], sizes = [8, 32], strides = [1, 1]} : vector<8x128xf32> to vector<8x32xf32>
    %247 = math.tanh %246 : vector<8x32xf32>
    %248 = arith.mulf %244, %219 : vector<8x32xf32>
    %249 = arith.mulf %243, %247 : vector<8x32xf32>
    %250 = arith.addf %248, %249 : vector<8x32xf32>
    %251 = math.tanh %250 : vector<8x32xf32>
    %252 = arith.mulf %245, %251 : vector<8x32xf32>
    %c8_i32_88 = arith.constant 8 : i32
    %253 = arith.muli %c7_i32, %c8_i32_88 : i32
    %c0_i32_89 = arith.constant 0 : i32
    %254 = arith.addi %c0_i32_89, %253 : i32
    %255 = tpu.assume_multiple %254, 8 : i32
    %256 = arith.truncf %252 : vector<8x32xf32> to vector<8x32xbf16>
    %257 = arith.index_cast %255 : i32 to index
    %c0_90 = arith.constant 0 : index
    %258 = vector.load %arg14[%257, %c0_90] : memref<64x32xbf16, #tpu.memory_space<vmem>>, vector<8x32xbf16>
    tpu.vector_store %arg14[%257, %c0_90], %256 {strides = array<i32>} : memref<64x32xbf16, #tpu.memory_space<vmem>>, vector<8x32xbf16>,
    %c8_i32_91 = arith.constant 8 : i32
    %c0_92 = arith.constant 0 : index
    %c0_93 = arith.constant 0 : index
    %259 = vector.load %arg14[%c0_92, %c0_93] : memref<64x32xbf16, #tpu.memory_space<vmem>>, vector<64x32xbf16>
    %c0_94 = arith.constant 0 : index
    %c0_95 = arith.constant 0 : index
    %260 = vector.load %arg6[%c0_94, %c0_95] : memref<32x128xbf16, #tpu.memory_space<vmem>>, vector<32x128xbf16>
    %cst_96 = arith.constant dense<0.000000e+00> : vector<64x128xf32>
    %261 = tpu.matmul %259, %260, %cst_96 {dimension_numbers = #tpu.dot_dimension_numbers<[1], [0], [0], [1], [0, 0, 1, 1], [], []>} : vector<64x32xbf16>, vector<32x128xbf16>, vector<64x128xf32> -> vector<64x128xf32>
    %c0_97 = arith.constant 0 : index
    %c0_98 = arith.constant 0 : index
    %262 = vector.load %arg8[%c0_97, %c0_98] : memref<1x128xf32, #tpu.memory_space<vmem>>, vector<1x128xf32>
    %263 = vector.broadcast %262 : vector<1x128xf32> to vector<64x128xf32>
    %264 = arith.addf %261, %263 : vector<64x128xf32>
    %c0_99 = arith.constant 0 : index
    %c0_100 = arith.constant 0 : index
    %265 = vector.load %arg13[%c0_99, %c0_100] : memref<128x128xf32, #tpu.memory_space<vmem>>, vector<64x128xf32>
    tpu.vector_store %arg13[%c0_99, %c0_100], %264 {strides = array<i32>} : memref<128x128xf32, #tpu.memory_space<vmem>>, vector<64x128xf32>,
    %cst_101 = arith.constant 0.000000e+00 : f32
    %266 = vector.broadcast %cst_101 : f32 to vector<8x32xf32>
    %cst_102 = arith.constant 0.000000e+00 : f32
    %267 = vector.broadcast %cst_102 : f32 to vector<8x32xf32>
    %c0_i32_103 = arith.constant 0 : i32
    %c8_i32_104 = arith.constant 8 : i32
    %268 = arith.muli %c0_i32_103, %c8_i32_104 : i32
    %c0_i32_105 = arith.constant 0 : i32
    %269 = arith.addi %c0_i32_105, %268 : i32
    %270 = tpu.assume_multiple %269, 8 : i32
    %271 = arith.index_cast %270 : i32 to index
    %c0_106 = arith.constant 0 : index
    %272 = vector.load %arg13[%271, %c0_106] : memref<128x128xf32, #tpu.memory_space<vmem>>, vector<8x128xf32>
    %273 = arith.truncf %266 : vector<8x32xf32> to vector<8x32xbf16>
    %c0_107 = arith.constant 0 : index
    %c0_108 = arith.constant 0 : index
    %274 = vector.load %arg7[%c0_107, %c0_108] : memref<32x128xbf16, #tpu.memory_space<vmem>>, vector<32x128xbf16>
    %cst_109 = arith.constant dense<0.000000e+00> : vector<8x128xf32>
    %275 = tpu.matmul %273, %274, %cst_109 {dimension_numbers = #tpu.dot_dimension_numbers<[1], [0], [0], [1], [0, 0, 1, 1], [], []>} : vector<8x32xbf16>, vector<32x128xbf16>, vector<8x128xf32> -> vector<8x128xf32>
    %276 = arith.addf %272, %275 : vector<8x128xf32>
    %277 = vector.extract_strided_slice %276 {offsets = [0, 0], sizes = [8, 96], strides = [1, 1]} : vector<8x128xf32> to vector<8x96xf32>
    %278 = arith.negf %277 : vector<8x96xf32>
    %279 = math.exp %278 : vector<8x96xf32>
    %cst_110 = arith.constant 1.000000e+00 : f32
    %280 = vector.broadcast %cst_110 : f32 to vector<8x96xf32>
    %281 = arith.addf %280, %279 : vector<8x96xf32>
    %282 = arith.divf %280, %281 : vector<8x96xf32>
    %283 = vector.extract_strided_slice %282 {offsets = [0, 0], sizes = [8, 32], strides = [1, 1]} : vector<8x96xf32> to vector<8x32xf32>
    %284 = vector.extract_strided_slice %282 {offsets = [0, 32], sizes = [8, 32], strides = [1, 1]} : vector<8x96xf32> to vector<8x32xf32>
    %285 = vector.extract_strided_slice %282 {offsets = [0, 64], sizes = [8, 32], strides = [1, 1]} : vector<8x96xf32> to vector<8x32xf32>
    %286 = vector.extract_strided_slice %276 {offsets = [0, 96], sizes = [8, 32], strides = [1, 1]} : vector<8x128xf32> to vector<8x32xf32>
    %287 = math.tanh %286 : vector<8x32xf32>
    %288 = arith.mulf %284, %267 : vector<8x32xf32>
    %289 = arith.mulf %283, %287 : vector<8x32xf32>
    %290 = arith.addf %288, %289 : vector<8x32xf32>
    %291 = math.tanh %290 : vector<8x32xf32>
    %292 = arith.mulf %285, %291 : vector<8x32xf32>
    %c8_i32_111 = arith.constant 8 : i32
    %293 = arith.muli %c0_i32_103, %c8_i32_111 : i32
    %c0_i32_112 = arith.constant 0 : i32
    %294 = arith.addi %c0_i32_112, %293 : i32
    %295 = tpu.assume_multiple %294, 8 : i32
    %296 = arith.truncf %292 : vector<8x32xf32> to vector<8x32xbf16>
    %297 = arith.index_cast %295 : i32 to index
    %c0_113 = arith.constant 0 : index
    %298 = vector.load %arg14[%297, %c0_113] : memref<64x32xbf16, #tpu.memory_space<vmem>>, vector<8x32xbf16>
    tpu.vector_store %arg14[%297, %c0_113], %296 {strides = array<i32>} : memref<64x32xbf16, #tpu.memory_space<vmem>>, vector<8x32xbf16>,
    %c1_i32_114 = arith.constant 1 : i32
    %c8_i32_115 = arith.constant 8 : i32
    %299 = arith.muli %c1_i32_114, %c8_i32_115 : i32
    %c0_i32_116 = arith.constant 0 : i32
    %300 = arith.addi %c0_i32_116, %299 : i32
    %301 = tpu.assume_multiple %300, 8 : i32
    %302 = arith.index_cast %301 : i32 to index
    %c0_117 = arith.constant 0 : index
    %303 = vector.load %arg13[%302, %c0_117] : memref<128x128xf32, #tpu.memory_space<vmem>>, vector<8x128xf32>
    %304 = arith.truncf %292 : vector<8x32xf32> to vector<8x32xbf16>
    %c0_118 = arith.constant 0 : index
    %c0_119 = arith.constant 0 : index
    %305 = vector.load %arg7[%c0_118, %c0_119] : memref<32x128xbf16, #tpu.memory_space<vmem>>, vector<32x128xbf16>
    %cst_120 = arith.constant dense<0.000000e+00> : vector<8x128xf32>
    %306 = tpu.matmul %304, %305, %cst_120 {dimension_numbers = #tpu.dot_dimension_numbers<[1], [0], [0], [1], [0, 0, 1, 1], [], []>} : vector<8x32xbf16>, vector<32x128xbf16>, vector<8x128xf32> -> vector<8x128xf32>
    %307 = arith.addf %303, %306 : vector<8x128xf32>
    %308 = vector.extract_strided_slice %307 {offsets = [0, 0], sizes = [8, 96], strides = [1, 1]} : vector<8x128xf32> to vector<8x96xf32>
    %309 = arith.negf %308 : vector<8x96xf32>
    %310 = math.exp %309 : vector<8x96xf32>
    %cst_121 = arith.constant 1.000000e+00 : f32
    %311 = vector.broadcast %cst_121 : f32 to vector<8x96xf32>
    %312 = arith.addf %311, %310 : vector<8x96xf32>
    %313 = arith.divf %311, %312 : vector<8x96xf32>
    %314 = vector.extract_strided_slice %313 {offsets = [0, 0], sizes = [8, 32], strides = [1, 1]} : vector<8x96xf32> to vector<8x32xf32>
    %315 = vector.extract_strided_slice %313 {offsets = [0, 32], sizes = [8, 32], strides = [1, 1]} : vector<8x96xf32> to vector<8x32xf32>
    %316 = vector.extract_strided_slice %313 {offsets = [0, 64], sizes = [8, 32], strides = [1, 1]} : vector<8x96xf32> to vector<8x32xf32>
    %317 = vector.extract_strided_slice %307 {offsets = [0, 96], sizes = [8, 32], strides = [1, 1]} : vector<8x128xf32> to vector<8x32xf32>
    %318 = math.tanh %317 : vector<8x32xf32>
    %319 = arith.mulf %315, %290 : vector<8x32xf32>
    %320 = arith.mulf %314, %318 : vector<8x32xf32>
    %321 = arith.addf %319, %320 : vector<8x32xf32>
    %322 = math.tanh %321 : vector<8x32xf32>
    %323 = arith.mulf %316, %322 : vector<8x32xf32>
    %c8_i32_122 = arith.constant 8 : i32
    %324 = arith.muli %c1_i32_114, %c8_i32_122 : i32
    %c0_i32_123 = arith.constant 0 : i32
    %325 = arith.addi %c0_i32_123, %324 : i32
    %326 = tpu.assume_multiple %325, 8 : i32
    %327 = arith.truncf %323 : vector<8x32xf32> to vector<8x32xbf16>
    %328 = arith.index_cast %326 : i32 to index
    %c0_124 = arith.constant 0 : index
    %329 = vector.load %arg14[%328, %c0_124] : memref<64x32xbf16, #tpu.memory_space<vmem>>, vector<8x32xbf16>
    tpu.vector_store %arg14[%328, %c0_124], %327 {strides = array<i32>} : memref<64x32xbf16, #tpu.memory_space<vmem>>, vector<8x32xbf16>,
    %c2_i32_125 = arith.constant 2 : i32
    %c8_i32_126 = arith.constant 8 : i32
    %330 = arith.muli %c2_i32_125, %c8_i32_126 : i32
    %c0_i32_127 = arith.constant 0 : i32
    %331 = arith.addi %c0_i32_127, %330 : i32
    %332 = tpu.assume_multiple %331, 8 : i32
    %333 = arith.index_cast %332 : i32 to index
    %c0_128 = arith.constant 0 : index
    %334 = vector.load %arg13[%333, %c0_128] : memref<128x128xf32, #tpu.memory_space<vmem>>, vector<8x128xf32>
    %335 = arith.truncf %323 : vector<8x32xf32> to vector<8x32xbf16>
    %c0_129 = arith.constant 0 : index
    %c0_130 = arith.constant 0 : index
    %336 = vector.load %arg7[%c0_129, %c0_130] : memref<32x128xbf16, #tpu.memory_space<vmem>>, vector<32x128xbf16>
    %cst_131 = arith.constant dense<0.000000e+00> : vector<8x128xf32>
    %337 = tpu.matmul %335, %336, %cst_131 {dimension_numbers = #tpu.dot_dimension_numbers<[1], [0], [0], [1], [0, 0, 1, 1], [], []>} : vector<8x32xbf16>, vector<32x128xbf16>, vector<8x128xf32> -> vector<8x128xf32>
    %338 = arith.addf %334, %337 : vector<8x128xf32>
    %339 = vector.extract_strided_slice %338 {offsets = [0, 0], sizes = [8, 96], strides = [1, 1]} : vector<8x128xf32> to vector<8x96xf32>
    %340 = arith.negf %339 : vector<8x96xf32>
    %341 = math.exp %340 : vector<8x96xf32>
    %cst_132 = arith.constant 1.000000e+00 : f32
    %342 = vector.broadcast %cst_132 : f32 to vector<8x96xf32>
    %343 = arith.addf %342, %341 : vector<8x96xf32>
    %344 = arith.divf %342, %343 : vector<8x96xf32>
    %345 = vector.extract_strided_slice %344 {offsets = [0, 0], sizes = [8, 32], strides = [1, 1]} : vector<8x96xf32> to vector<8x32xf32>
    %346 = vector.extract_strided_slice %344 {offsets = [0, 32], sizes = [8, 32], strides = [1, 1]} : vector<8x96xf32> to vector<8x32xf32>
    %347 = vector.extract_strided_slice %344 {offsets = [0, 64], sizes = [8, 32], strides = [1, 1]} : vector<8x96xf32> to vector<8x32xf32>
    %348 = vector.extract_strided_slice %338 {offsets = [0, 96], sizes = [8, 32], strides = [1, 1]} : vector<8x128xf32> to vector<8x32xf32>
    %349 = math.tanh %348 : vector<8x32xf32>
    %350 = arith.mulf %346, %321 : vector<8x32xf32>
    %351 = arith.mulf %345, %349 : vector<8x32xf32>
    %352 = arith.addf %350, %351 : vector<8x32xf32>
    %353 = math.tanh %352 : vector<8x32xf32>
    %354 = arith.mulf %347, %353 : vector<8x32xf32>
    %c8_i32_133 = arith.constant 8 : i32
    %355 = arith.muli %c2_i32_125, %c8_i32_133 : i32
    %c0_i32_134 = arith.constant 0 : i32
    %356 = arith.addi %c0_i32_134, %355 : i32
    %357 = tpu.assume_multiple %356, 8 : i32
    %358 = arith.truncf %354 : vector<8x32xf32> to vector<8x32xbf16>
    %359 = arith.index_cast %357 : i32 to index
    %c0_135 = arith.constant 0 : index
    %360 = vector.load %arg14[%359, %c0_135] : memref<64x32xbf16, #tpu.memory_space<vmem>>, vector<8x32xbf16>
    tpu.vector_store %arg14[%359, %c0_135], %358 {strides = array<i32>} : memref<64x32xbf16, #tpu.memory_space<vmem>>, vector<8x32xbf16>,
    %c3_i32_136 = arith.constant 3 : i32
    %c8_i32_137 = arith.constant 8 : i32
    %361 = arith.muli %c3_i32_136, %c8_i32_137 : i32
    %c0_i32_138 = arith.constant 0 : i32
    %362 = arith.addi %c0_i32_138, %361 : i32
    %363 = tpu.assume_multiple %362, 8 : i32
    %364 = arith.index_cast %363 : i32 to index
    %c0_139 = arith.constant 0 : index
    %365 = vector.load %arg13[%364, %c0_139] : memref<128x128xf32, #tpu.memory_space<vmem>>, vector<8x128xf32>
    %366 = arith.truncf %354 : vector<8x32xf32> to vector<8x32xbf16>
    %c0_140 = arith.constant 0 : index
    %c0_141 = arith.constant 0 : index
    %367 = vector.load %arg7[%c0_140, %c0_141] : memref<32x128xbf16, #tpu.memory_space<vmem>>, vector<32x128xbf16>
    %cst_142 = arith.constant dense<0.000000e+00> : vector<8x128xf32>
    %368 = tpu.matmul %366, %367, %cst_142 {dimension_numbers = #tpu.dot_dimension_numbers<[1], [0], [0], [1], [0, 0, 1, 1], [], []>} : vector<8x32xbf16>, vector<32x128xbf16>, vector<8x128xf32> -> vector<8x128xf32>
    %369 = arith.addf %365, %368 : vector<8x128xf32>
    %370 = vector.extract_strided_slice %369 {offsets = [0, 0], sizes = [8, 96], strides = [1, 1]} : vector<8x128xf32> to vector<8x96xf32>
    %371 = arith.negf %370 : vector<8x96xf32>
    %372 = math.exp %371 : vector<8x96xf32>
    %cst_143 = arith.constant 1.000000e+00 : f32
    %373 = vector.broadcast %cst_143 : f32 to vector<8x96xf32>
    %374 = arith.addf %373, %372 : vector<8x96xf32>
    %375 = arith.divf %373, %374 : vector<8x96xf32>
    %376 = vector.extract_strided_slice %375 {offsets = [0, 0], sizes = [8, 32], strides = [1, 1]} : vector<8x96xf32> to vector<8x32xf32>
    %377 = vector.extract_strided_slice %375 {offsets = [0, 32], sizes = [8, 32], strides = [1, 1]} : vector<8x96xf32> to vector<8x32xf32>
    %378 = vector.extract_strided_slice %375 {offsets = [0, 64], sizes = [8, 32], strides = [1, 1]} : vector<8x96xf32> to vector<8x32xf32>
    %379 = vector.extract_strided_slice %369 {offsets = [0, 96], sizes = [8, 32], strides = [1, 1]} : vector<8x128xf32> to vector<8x32xf32>
    %380 = math.tanh %379 : vector<8x32xf32>
    %381 = arith.mulf %377, %352 : vector<8x32xf32>
    %382 = arith.mulf %376, %380 : vector<8x32xf32>
    %383 = arith.addf %381, %382 : vector<8x32xf32>
    %384 = math.tanh %383 : vector<8x32xf32>
    %385 = arith.mulf %378, %384 : vector<8x32xf32>
    %c8_i32_144 = arith.constant 8 : i32
    %386 = arith.muli %c3_i32_136, %c8_i32_144 : i32
    %c0_i32_145 = arith.constant 0 : i32
    %387 = arith.addi %c0_i32_145, %386 : i32
    %388 = tpu.assume_multiple %387, 8 : i32
    %389 = arith.truncf %385 : vector<8x32xf32> to vector<8x32xbf16>
    %390 = arith.index_cast %388 : i32 to index
    %c0_146 = arith.constant 0 : index
    %391 = vector.load %arg14[%390, %c0_146] : memref<64x32xbf16, #tpu.memory_space<vmem>>, vector<8x32xbf16>
    tpu.vector_store %arg14[%390, %c0_146], %389 {strides = array<i32>} : memref<64x32xbf16, #tpu.memory_space<vmem>>, vector<8x32xbf16>,
    %c4_i32_147 = arith.constant 4 : i32
    %c8_i32_148 = arith.constant 8 : i32
    %392 = arith.muli %c4_i32_147, %c8_i32_148 : i32
    %c0_i32_149 = arith.constant 0 : i32
    %393 = arith.addi %c0_i32_149, %392 : i32
    %394 = tpu.assume_multiple %393, 8 : i32
    %395 = arith.index_cast %394 : i32 to index
    %c0_150 = arith.constant 0 : index
    %396 = vector.load %arg13[%395, %c0_150] : memref<128x128xf32, #tpu.memory_space<vmem>>, vector<8x128xf32>
    %397 = arith.truncf %385 : vector<8x32xf32> to vector<8x32xbf16>
    %c0_151 = arith.constant 0 : index
    %c0_152 = arith.constant 0 : index
    %398 = vector.load %arg7[%c0_151, %c0_152] : memref<32x128xbf16, #tpu.memory_space<vmem>>, vector<32x128xbf16>
    %cst_153 = arith.constant dense<0.000000e+00> : vector<8x128xf32>
    %399 = tpu.matmul %397, %398, %cst_153 {dimension_numbers = #tpu.dot_dimension_numbers<[1], [0], [0], [1], [0, 0, 1, 1], [], []>} : vector<8x32xbf16>, vector<32x128xbf16>, vector<8x128xf32> -> vector<8x128xf32>
    %400 = arith.addf %396, %399 : vector<8x128xf32>
    %401 = vector.extract_strided_slice %400 {offsets = [0, 0], sizes = [8, 96], strides = [1, 1]} : vector<8x128xf32> to vector<8x96xf32>
    %402 = arith.negf %401 : vector<8x96xf32>
    %403 = math.exp %402 : vector<8x96xf32>
    %cst_154 = arith.constant 1.000000e+00 : f32
    %404 = vector.broadcast %cst_154 : f32 to vector<8x96xf32>
    %405 = arith.addf %404, %403 : vector<8x96xf32>
    %406 = arith.divf %404, %405 : vector<8x96xf32>
    %407 = vector.extract_strided_slice %406 {offsets = [0, 0], sizes = [8, 32], strides = [1, 1]} : vector<8x96xf32> to vector<8x32xf32>
    %408 = vector.extract_strided_slice %406 {offsets = [0, 32], sizes = [8, 32], strides = [1, 1]} : vector<8x96xf32> to vector<8x32xf32>
    %409 = vector.extract_strided_slice %406 {offsets = [0, 64], sizes = [8, 32], strides = [1, 1]} : vector<8x96xf32> to vector<8x32xf32>
    %410 = vector.extract_strided_slice %400 {offsets = [0, 96], sizes = [8, 32], strides = [1, 1]} : vector<8x128xf32> to vector<8x32xf32>
    %411 = math.tanh %410 : vector<8x32xf32>
    %412 = arith.mulf %408, %383 : vector<8x32xf32>
    %413 = arith.mulf %407, %411 : vector<8x32xf32>
    %414 = arith.addf %412, %413 : vector<8x32xf32>
    %415 = math.tanh %414 : vector<8x32xf32>
    %416 = arith.mulf %409, %415 : vector<8x32xf32>
    %c8_i32_155 = arith.constant 8 : i32
    %417 = arith.muli %c4_i32_147, %c8_i32_155 : i32
    %c0_i32_156 = arith.constant 0 : i32
    %418 = arith.addi %c0_i32_156, %417 : i32
    %419 = tpu.assume_multiple %418, 8 : i32
    %420 = arith.truncf %416 : vector<8x32xf32> to vector<8x32xbf16>
    %421 = arith.index_cast %419 : i32 to index
    %c0_157 = arith.constant 0 : index
    %422 = vector.load %arg14[%421, %c0_157] : memref<64x32xbf16, #tpu.memory_space<vmem>>, vector<8x32xbf16>
    tpu.vector_store %arg14[%421, %c0_157], %420 {strides = array<i32>} : memref<64x32xbf16, #tpu.memory_space<vmem>>, vector<8x32xbf16>,
    %c5_i32_158 = arith.constant 5 : i32
    %c8_i32_159 = arith.constant 8 : i32
    %423 = arith.muli %c5_i32_158, %c8_i32_159 : i32
    %c0_i32_160 = arith.constant 0 : i32
    %424 = arith.addi %c0_i32_160, %423 : i32
    %425 = tpu.assume_multiple %424, 8 : i32
    %426 = arith.index_cast %425 : i32 to index
    %c0_161 = arith.constant 0 : index
    %427 = vector.load %arg13[%426, %c0_161] : memref<128x128xf32, #tpu.memory_space<vmem>>, vector<8x128xf32>
    %428 = arith.truncf %416 : vector<8x32xf32> to vector<8x32xbf16>
    %c0_162 = arith.constant 0 : index
    %c0_163 = arith.constant 0 : index
    %429 = vector.load %arg7[%c0_162, %c0_163] : memref<32x128xbf16, #tpu.memory_space<vmem>>, vector<32x128xbf16>
    %cst_164 = arith.constant dense<0.000000e+00> : vector<8x128xf32>
    %430 = tpu.matmul %428, %429, %cst_164 {dimension_numbers = #tpu.dot_dimension_numbers<[1], [0], [0], [1], [0, 0, 1, 1], [], []>} : vector<8x32xbf16>, vector<32x128xbf16>, vector<8x128xf32> -> vector<8x128xf32>
    %431 = arith.addf %427, %430 : vector<8x128xf32>
    %432 = vector.extract_strided_slice %431 {offsets = [0, 0], sizes = [8, 96], strides = [1, 1]} : vector<8x128xf32> to vector<8x96xf32>
    %433 = arith.negf %432 : vector<8x96xf32>
    %434 = math.exp %433 : vector<8x96xf32>
    %cst_165 = arith.constant 1.000000e+00 : f32
    %435 = vector.broadcast %cst_165 : f32 to vector<8x96xf32>
    %436 = arith.addf %435, %434 : vector<8x96xf32>
    %437 = arith.divf %435, %436 : vector<8x96xf32>
    %438 = vector.extract_strided_slice %437 {offsets = [0, 0], sizes = [8, 32], strides = [1, 1]} : vector<8x96xf32> to vector<8x32xf32>
    %439 = vector.extract_strided_slice %437 {offsets = [0, 32], sizes = [8, 32], strides = [1, 1]} : vector<8x96xf32> to vector<8x32xf32>
    %440 = vector.extract_strided_slice %437 {offsets = [0, 64], sizes = [8, 32], strides = [1, 1]} : vector<8x96xf32> to vector<8x32xf32>
    %441 = vector.extract_strided_slice %431 {offsets = [0, 96], sizes = [8, 32], strides = [1, 1]} : vector<8x128xf32> to vector<8x32xf32>
    %442 = math.tanh %441 : vector<8x32xf32>
    %443 = arith.mulf %439, %414 : vector<8x32xf32>
    %444 = arith.mulf %438, %442 : vector<8x32xf32>
    %445 = arith.addf %443, %444 : vector<8x32xf32>
    %446 = math.tanh %445 : vector<8x32xf32>
    %447 = arith.mulf %440, %446 : vector<8x32xf32>
    %c8_i32_166 = arith.constant 8 : i32
    %448 = arith.muli %c5_i32_158, %c8_i32_166 : i32
    %c0_i32_167 = arith.constant 0 : i32
    %449 = arith.addi %c0_i32_167, %448 : i32
    %450 = tpu.assume_multiple %449, 8 : i32
    %451 = arith.truncf %447 : vector<8x32xf32> to vector<8x32xbf16>
    %452 = arith.index_cast %450 : i32 to index
    %c0_168 = arith.constant 0 : index
    %453 = vector.load %arg14[%452, %c0_168] : memref<64x32xbf16, #tpu.memory_space<vmem>>, vector<8x32xbf16>
    tpu.vector_store %arg14[%452, %c0_168], %451 {strides = array<i32>} : memref<64x32xbf16, #tpu.memory_space<vmem>>, vector<8x32xbf16>,
    %c6_i32_169 = arith.constant 6 : i32
    %c8_i32_170 = arith.constant 8 : i32
    %454 = arith.muli %c6_i32_169, %c8_i32_170 : i32
    %c0_i32_171 = arith.constant 0 : i32
    %455 = arith.addi %c0_i32_171, %454 : i32
    %456 = tpu.assume_multiple %455, 8 : i32
    %457 = arith.index_cast %456 : i32 to index
    %c0_172 = arith.constant 0 : index
    %458 = vector.load %arg13[%457, %c0_172] : memref<128x128xf32, #tpu.memory_space<vmem>>, vector<8x128xf32>
    %459 = arith.truncf %447 : vector<8x32xf32> to vector<8x32xbf16>
    %c0_173 = arith.constant 0 : index
    %c0_174 = arith.constant 0 : index
    %460 = vector.load %arg7[%c0_173, %c0_174] : memref<32x128xbf16, #tpu.memory_space<vmem>>, vector<32x128xbf16>
    %cst_175 = arith.constant dense<0.000000e+00> : vector<8x128xf32>
    %461 = tpu.matmul %459, %460, %cst_175 {dimension_numbers = #tpu.dot_dimension_numbers<[1], [0], [0], [1], [0, 0, 1, 1], [], []>} : vector<8x32xbf16>, vector<32x128xbf16>, vector<8x128xf32> -> vector<8x128xf32>
    %462 = arith.addf %458, %461 : vector<8x128xf32>
    %463 = vector.extract_strided_slice %462 {offsets = [0, 0], sizes = [8, 96], strides = [1, 1]} : vector<8x128xf32> to vector<8x96xf32>
    %464 = arith.negf %463 : vector<8x96xf32>
    %465 = math.exp %464 : vector<8x96xf32>
    %cst_176 = arith.constant 1.000000e+00 : f32
    %466 = vector.broadcast %cst_176 : f32 to vector<8x96xf32>
    %467 = arith.addf %466, %465 : vector<8x96xf32>
    %468 = arith.divf %466, %467 : vector<8x96xf32>
    %469 = vector.extract_strided_slice %468 {offsets = [0, 0], sizes = [8, 32], strides = [1, 1]} : vector<8x96xf32> to vector<8x32xf32>
    %470 = vector.extract_strided_slice %468 {offsets = [0, 32], sizes = [8, 32], strides = [1, 1]} : vector<8x96xf32> to vector<8x32xf32>
    %471 = vector.extract_strided_slice %468 {offsets = [0, 64], sizes = [8, 32], strides = [1, 1]} : vector<8x96xf32> to vector<8x32xf32>
    %472 = vector.extract_strided_slice %462 {offsets = [0, 96], sizes = [8, 32], strides = [1, 1]} : vector<8x128xf32> to vector<8x32xf32>
    %473 = math.tanh %472 : vector<8x32xf32>
    %474 = arith.mulf %470, %445 : vector<8x32xf32>
    %475 = arith.mulf %469, %473 : vector<8x32xf32>
    %476 = arith.addf %474, %475 : vector<8x32xf32>
    %477 = math.tanh %476 : vector<8x32xf32>
    %478 = arith.mulf %471, %477 : vector<8x32xf32>
    %c8_i32_177 = arith.constant 8 : i32
    %479 = arith.muli %c6_i32_169, %c8_i32_177 : i32
    %c0_i32_178 = arith.constant 0 : i32
    %480 = arith.addi %c0_i32_178, %479 : i32
    %481 = tpu.assume_multiple %480, 8 : i32
    %482 = arith.truncf %478 : vector<8x32xf32> to vector<8x32xbf16>
    %483 = arith.index_cast %481 : i32 to index
    %c0_179 = arith.constant 0 : index
    %484 = vector.load %arg14[%483, %c0_179] : memref<64x32xbf16, #tpu.memory_space<vmem>>, vector<8x32xbf16>
    tpu.vector_store %arg14[%483, %c0_179], %482 {strides = array<i32>} : memref<64x32xbf16, #tpu.memory_space<vmem>>, vector<8x32xbf16>,
    %c7_i32_180 = arith.constant 7 : i32
    %c8_i32_181 = arith.constant 8 : i32
    %485 = arith.muli %c7_i32_180, %c8_i32_181 : i32
    %c0_i32_182 = arith.constant 0 : i32
    %486 = arith.addi %c0_i32_182, %485 : i32
    %487 = tpu.assume_multiple %486, 8 : i32
    %488 = arith.index_cast %487 : i32 to index
    %c0_183 = arith.constant 0 : index
    %489 = vector.load %arg13[%488, %c0_183] : memref<128x128xf32, #tpu.memory_space<vmem>>, vector<8x128xf32>
    %490 = arith.truncf %478 : vector<8x32xf32> to vector<8x32xbf16>
    %c0_184 = arith.constant 0 : index
    %c0_185 = arith.constant 0 : index
    %491 = vector.load %arg7[%c0_184, %c0_185] : memref<32x128xbf16, #tpu.memory_space<vmem>>, vector<32x128xbf16>
    %cst_186 = arith.constant dense<0.000000e+00> : vector<8x128xf32>
    %492 = tpu.matmul %490, %491, %cst_186 {dimension_numbers = #tpu.dot_dimension_numbers<[1], [0], [0], [1], [0, 0, 1, 1], [], []>} : vector<8x32xbf16>, vector<32x128xbf16>, vector<8x128xf32> -> vector<8x128xf32>
    %493 = arith.addf %489, %492 : vector<8x128xf32>
    %494 = vector.extract_strided_slice %493 {offsets = [0, 0], sizes = [8, 96], strides = [1, 1]} : vector<8x128xf32> to vector<8x96xf32>
    %495 = arith.negf %494 : vector<8x96xf32>
    %496 = math.exp %495 : vector<8x96xf32>
    %cst_187 = arith.constant 1.000000e+00 : f32
    %497 = vector.broadcast %cst_187 : f32 to vector<8x96xf32>
    %498 = arith.addf %497, %496 : vector<8x96xf32>
    %499 = arith.divf %497, %498 : vector<8x96xf32>
    %500 = vector.extract_strided_slice %499 {offsets = [0, 0], sizes = [8, 32], strides = [1, 1]} : vector<8x96xf32> to vector<8x32xf32>
    %501 = vector.extract_strided_slice %499 {offsets = [0, 32], sizes = [8, 32], strides = [1, 1]} : vector<8x96xf32> to vector<8x32xf32>
    %502 = vector.extract_strided_slice %499 {offsets = [0, 64], sizes = [8, 32], strides = [1, 1]} : vector<8x96xf32> to vector<8x32xf32>
    %503 = vector.extract_strided_slice %493 {offsets = [0, 96], sizes = [8, 32], strides = [1, 1]} : vector<8x128xf32> to vector<8x32xf32>
    %504 = math.tanh %503 : vector<8x32xf32>
    %505 = arith.mulf %501, %476 : vector<8x32xf32>
    %506 = arith.mulf %500, %504 : vector<8x32xf32>
    %507 = arith.addf %505, %506 : vector<8x32xf32>
    %508 = math.tanh %507 : vector<8x32xf32>
    %509 = arith.mulf %502, %508 : vector<8x32xf32>
    %c8_i32_188 = arith.constant 8 : i32
    %510 = arith.muli %c7_i32_180, %c8_i32_188 : i32
    %c0_i32_189 = arith.constant 0 : i32
    %511 = arith.addi %c0_i32_189, %510 : i32
    %512 = tpu.assume_multiple %511, 8 : i32
    %513 = arith.truncf %509 : vector<8x32xf32> to vector<8x32xbf16>
    %514 = arith.index_cast %512 : i32 to index
    %c0_190 = arith.constant 0 : index
    %515 = vector.load %arg14[%514, %c0_190] : memref<64x32xbf16, #tpu.memory_space<vmem>>, vector<8x32xbf16>
    tpu.vector_store %arg14[%514, %c0_190], %513 {strides = array<i32>} : memref<64x32xbf16, #tpu.memory_space<vmem>>, vector<8x32xbf16>,
    %c8_i32_191 = arith.constant 8 : i32
    %c0_192 = arith.constant 0 : index
    %c0_193 = arith.constant 0 : index
    %516 = vector.load %arg14[%c0_192, %c0_193] : memref<64x32xbf16, #tpu.memory_space<vmem>>, vector<64x32xbf16>
    %c0_194 = arith.constant 0 : index
    %c0_195 = arith.constant 0 : index
    %517 = vector.load %arg9[%c0_194, %c0_195] : memref<32x128xbf16, #tpu.memory_space<vmem>>, vector<32x128xbf16>
    %cst_196 = arith.constant dense<0.000000e+00> : vector<64x128xf32>
    %518 = tpu.matmul %516, %517, %cst_196 {dimension_numbers = #tpu.dot_dimension_numbers<[1], [0], [0], [1], [0, 0, 1, 1], [], []>} : vector<64x32xbf16>, vector<32x128xbf16>, vector<64x128xf32> -> vector<64x128xf32>
    %c0_197 = arith.constant 0 : index
    %c0_198 = arith.constant 0 : index
    %519 = vector.load %arg11[%c0_197, %c0_198] : memref<1x128xf32, #tpu.memory_space<vmem>>, vector<1x128xf32>
    %520 = vector.broadcast %519 : vector<1x128xf32> to vector<64x128xf32>
    %521 = arith.addf %518, %520 : vector<64x128xf32>
    %c0_199 = arith.constant 0 : index
    %c0_200 = arith.constant 0 : index
    %522 = vector.load %arg13[%c0_199, %c0_200] : memref<128x128xf32, #tpu.memory_space<vmem>>, vector<64x128xf32>
    tpu.vector_store %arg13[%c0_199, %c0_200], %521 {strides = array<i32>} : memref<128x128xf32, #tpu.memory_space<vmem>>, vector<64x128xf32>,
    %cst_201 = arith.constant 0.000000e+00 : f32
    %523 = vector.broadcast %cst_201 : f32 to vector<8x32xf32>
    %cst_202 = arith.constant 0.000000e+00 : f32
    %524 = vector.broadcast %cst_202 : f32 to vector<8x32xf32>
    %c0_i32_203 = arith.constant 0 : i32
    %c8_i32_204 = arith.constant 8 : i32
    %525 = arith.muli %c0_i32_203, %c8_i32_204 : i32
    %c0_i32_205 = arith.constant 0 : i32
    %526 = arith.addi %c0_i32_205, %525 : i32
    %527 = tpu.assume_multiple %526, 8 : i32
    %528 = arith.index_cast %527 : i32 to index
    %c0_206 = arith.constant 0 : index
    %529 = vector.load %arg13[%528, %c0_206] : memref<128x128xf32, #tpu.memory_space<vmem>>, vector<8x128xf32>
    %530 = arith.truncf %523 : vector<8x32xf32> to vector<8x32xbf16>
    %c0_207 = arith.constant 0 : index
    %c0_208 = arith.constant 0 : index
    %531 = vector.load %arg10[%c0_207, %c0_208] : memref<32x128xbf16, #tpu.memory_space<vmem>>, vector<32x128xbf16>
    %cst_209 = arith.constant dense<0.000000e+00> : vector<8x128xf32>
    %532 = tpu.matmul %530, %531, %cst_209 {dimension_numbers = #tpu.dot_dimension_numbers<[1], [0], [0], [1], [0, 0, 1, 1], [], []>} : vector<8x32xbf16>, vector<32x128xbf16>, vector<8x128xf32> -> vector<8x128xf32>
    %533 = arith.addf %529, %532 : vector<8x128xf32>
    %534 = vector.extract_strided_slice %533 {offsets = [0, 0], sizes = [8, 96], strides = [1, 1]} : vector<8x128xf32> to vector<8x96xf32>
    %535 = arith.negf %534 : vector<8x96xf32>
    %536 = math.exp %535 : vector<8x96xf32>
    %cst_210 = arith.constant 1.000000e+00 : f32
    %537 = vector.broadcast %cst_210 : f32 to vector<8x96xf32>
    %538 = arith.addf %537, %536 : vector<8x96xf32>
    %539 = arith.divf %537, %538 : vector<8x96xf32>
    %540 = vector.extract_strided_slice %539 {offsets = [0, 0], sizes = [8, 32], strides = [1, 1]} : vector<8x96xf32> to vector<8x32xf32>
    %541 = vector.extract_strided_slice %539 {offsets = [0, 32], sizes = [8, 32], strides = [1, 1]} : vector<8x96xf32> to vector<8x32xf32>
    %542 = vector.extract_strided_slice %539 {offsets = [0, 64], sizes = [8, 32], strides = [1, 1]} : vector<8x96xf32> to vector<8x32xf32>
    %543 = vector.extract_strided_slice %533 {offsets = [0, 96], sizes = [8, 32], strides = [1, 1]} : vector<8x128xf32> to vector<8x32xf32>
    %544 = math.tanh %543 : vector<8x32xf32>
    %545 = arith.mulf %541, %524 : vector<8x32xf32>
    %546 = arith.mulf %540, %544 : vector<8x32xf32>
    %547 = arith.addf %545, %546 : vector<8x32xf32>
    %548 = math.tanh %547 : vector<8x32xf32>
    %549 = arith.mulf %542, %548 : vector<8x32xf32>
    %c0_i32_211 = arith.constant 0 : i32
    %550 = arith.addi %c0_i32_211, %c0_i32_203 : i32
    %c1_i32_212 = arith.constant 1 : i32
    %551 = arith.addi %550, %c1_i32_212 : i32
    %552 = vector.broadcast %551 : i32 to vector<8x1xi32>
    %553 = arith.cmpi eq, %0, %552 : vector<8x1xi32>
    %554 = vector.shape_cast %553 : vector<8x1xi1> to vector<8x1xi1>
    %555 = vector.broadcast %554 : vector<8x1xi1> to vector<8x32xi1>
    %556 = arith.select %555, %549, %1 : vector<8x32xi1>, vector<8x32xf32>
    %c1_i32_213 = arith.constant 1 : i32
    %c8_i32_214 = arith.constant 8 : i32
    %557 = arith.muli %c1_i32_213, %c8_i32_214 : i32
    %c0_i32_215 = arith.constant 0 : i32
    %558 = arith.addi %c0_i32_215, %557 : i32
    %559 = tpu.assume_multiple %558, 8 : i32
    %560 = arith.index_cast %559 : i32 to index
    %c0_216 = arith.constant 0 : index
    %561 = vector.load %arg13[%560, %c0_216] : memref<128x128xf32, #tpu.memory_space<vmem>>, vector<8x128xf32>
    %562 = arith.truncf %549 : vector<8x32xf32> to vector<8x32xbf16>
    %c0_217 = arith.constant 0 : index
    %c0_218 = arith.constant 0 : index
    %563 = vector.load %arg10[%c0_217, %c0_218] : memref<32x128xbf16, #tpu.memory_space<vmem>>, vector<32x128xbf16>
    %cst_219 = arith.constant dense<0.000000e+00> : vector<8x128xf32>
    %564 = tpu.matmul %562, %563, %cst_219 {dimension_numbers = #tpu.dot_dimension_numbers<[1], [0], [0], [1], [0, 0, 1, 1], [], []>} : vector<8x32xbf16>, vector<32x128xbf16>, vector<8x128xf32> -> vector<8x128xf32>
    %565 = arith.addf %561, %564 : vector<8x128xf32>
    %566 = vector.extract_strided_slice %565 {offsets = [0, 0], sizes = [8, 96], strides = [1, 1]} : vector<8x128xf32> to vector<8x96xf32>
    %567 = arith.negf %566 : vector<8x96xf32>
    %568 = math.exp %567 : vector<8x96xf32>
    %cst_220 = arith.constant 1.000000e+00 : f32
    %569 = vector.broadcast %cst_220 : f32 to vector<8x96xf32>
    %570 = arith.addf %569, %568 : vector<8x96xf32>
    %571 = arith.divf %569, %570 : vector<8x96xf32>
    %572 = vector.extract_strided_slice %571 {offsets = [0, 0], sizes = [8, 32], strides = [1, 1]} : vector<8x96xf32> to vector<8x32xf32>
    %573 = vector.extract_strided_slice %571 {offsets = [0, 32], sizes = [8, 32], strides = [1, 1]} : vector<8x96xf32> to vector<8x32xf32>
    %574 = vector.extract_strided_slice %571 {offsets = [0, 64], sizes = [8, 32], strides = [1, 1]} : vector<8x96xf32> to vector<8x32xf32>
    %575 = vector.extract_strided_slice %565 {offsets = [0, 96], sizes = [8, 32], strides = [1, 1]} : vector<8x128xf32> to vector<8x32xf32>
    %576 = math.tanh %575 : vector<8x32xf32>
    %577 = arith.mulf %573, %547 : vector<8x32xf32>
    %578 = arith.mulf %572, %576 : vector<8x32xf32>
    %579 = arith.addf %577, %578 : vector<8x32xf32>
    %580 = math.tanh %579 : vector<8x32xf32>
    %581 = arith.mulf %574, %580 : vector<8x32xf32>
    %c0_i32_221 = arith.constant 0 : i32
    %582 = arith.addi %c0_i32_221, %c1_i32_213 : i32
    %c1_i32_222 = arith.constant 1 : i32
    %583 = arith.addi %582, %c1_i32_222 : i32
    %584 = vector.broadcast %583 : i32 to vector<8x1xi32>
    %585 = arith.cmpi eq, %0, %584 : vector<8x1xi32>
    %586 = vector.shape_cast %585 : vector<8x1xi1> to vector<8x1xi1>
    %587 = vector.broadcast %586 : vector<8x1xi1> to vector<8x32xi1>
    %588 = arith.select %587, %581, %556 : vector<8x32xi1>, vector<8x32xf32>
    %c2_i32_223 = arith.constant 2 : i32
    %c8_i32_224 = arith.constant 8 : i32
    %589 = arith.muli %c2_i32_223, %c8_i32_224 : i32
    %c0_i32_225 = arith.constant 0 : i32
    %590 = arith.addi %c0_i32_225, %589 : i32
    %591 = tpu.assume_multiple %590, 8 : i32
    %592 = arith.index_cast %591 : i32 to index
    %c0_226 = arith.constant 0 : index
    %593 = vector.load %arg13[%592, %c0_226] : memref<128x128xf32, #tpu.memory_space<vmem>>, vector<8x128xf32>
    %594 = arith.truncf %581 : vector<8x32xf32> to vector<8x32xbf16>
    %c0_227 = arith.constant 0 : index
    %c0_228 = arith.constant 0 : index
    %595 = vector.load %arg10[%c0_227, %c0_228] : memref<32x128xbf16, #tpu.memory_space<vmem>>, vector<32x128xbf16>
    %cst_229 = arith.constant dense<0.000000e+00> : vector<8x128xf32>
    %596 = tpu.matmul %594, %595, %cst_229 {dimension_numbers = #tpu.dot_dimension_numbers<[1], [0], [0], [1], [0, 0, 1, 1], [], []>} : vector<8x32xbf16>, vector<32x128xbf16>, vector<8x128xf32> -> vector<8x128xf32>
    %597 = arith.addf %593, %596 : vector<8x128xf32>
    %598 = vector.extract_strided_slice %597 {offsets = [0, 0], sizes = [8, 96], strides = [1, 1]} : vector<8x128xf32> to vector<8x96xf32>
    %599 = arith.negf %598 : vector<8x96xf32>
    %600 = math.exp %599 : vector<8x96xf32>
    %cst_230 = arith.constant 1.000000e+00 : f32
    %601 = vector.broadcast %cst_230 : f32 to vector<8x96xf32>
    %602 = arith.addf %601, %600 : vector<8x96xf32>
    %603 = arith.divf %601, %602 : vector<8x96xf32>
    %604 = vector.extract_strided_slice %603 {offsets = [0, 0], sizes = [8, 32], strides = [1, 1]} : vector<8x96xf32> to vector<8x32xf32>
    %605 = vector.extract_strided_slice %603 {offsets = [0, 32], sizes = [8, 32], strides = [1, 1]} : vector<8x96xf32> to vector<8x32xf32>
    %606 = vector.extract_strided_slice %603 {offsets = [0, 64], sizes = [8, 32], strides = [1, 1]} : vector<8x96xf32> to vector<8x32xf32>
    %607 = vector.extract_strided_slice %597 {offsets = [0, 96], sizes = [8, 32], strides = [1, 1]} : vector<8x128xf32> to vector<8x32xf32>
    %608 = math.tanh %607 : vector<8x32xf32>
    %609 = arith.mulf %605, %579 : vector<8x32xf32>
    %610 = arith.mulf %604, %608 : vector<8x32xf32>
    %611 = arith.addf %609, %610 : vector<8x32xf32>
    %612 = math.tanh %611 : vector<8x32xf32>
    %613 = arith.mulf %606, %612 : vector<8x32xf32>
    %c0_i32_231 = arith.constant 0 : i32
    %614 = arith.addi %c0_i32_231, %c2_i32_223 : i32
    %c1_i32_232 = arith.constant 1 : i32
    %615 = arith.addi %614, %c1_i32_232 : i32
    %616 = vector.broadcast %615 : i32 to vector<8x1xi32>
    %617 = arith.cmpi eq, %0, %616 : vector<8x1xi32>
    %618 = vector.shape_cast %617 : vector<8x1xi1> to vector<8x1xi1>
    %619 = vector.broadcast %618 : vector<8x1xi1> to vector<8x32xi1>
    %620 = arith.select %619, %613, %588 : vector<8x32xi1>, vector<8x32xf32>
    %c3_i32_233 = arith.constant 3 : i32
    %c8_i32_234 = arith.constant 8 : i32
    %621 = arith.muli %c3_i32_233, %c8_i32_234 : i32
    %c0_i32_235 = arith.constant 0 : i32
    %622 = arith.addi %c0_i32_235, %621 : i32
    %623 = tpu.assume_multiple %622, 8 : i32
    %624 = arith.index_cast %623 : i32 to index
    %c0_236 = arith.constant 0 : index
    %625 = vector.load %arg13[%624, %c0_236] : memref<128x128xf32, #tpu.memory_space<vmem>>, vector<8x128xf32>
    %626 = arith.truncf %613 : vector<8x32xf32> to vector<8x32xbf16>
    %c0_237 = arith.constant 0 : index
    %c0_238 = arith.constant 0 : index
    %627 = vector.load %arg10[%c0_237, %c0_238] : memref<32x128xbf16, #tpu.memory_space<vmem>>, vector<32x128xbf16>
    %cst_239 = arith.constant dense<0.000000e+00> : vector<8x128xf32>
    %628 = tpu.matmul %626, %627, %cst_239 {dimension_numbers = #tpu.dot_dimension_numbers<[1], [0], [0], [1], [0, 0, 1, 1], [], []>} : vector<8x32xbf16>, vector<32x128xbf16>, vector<8x128xf32> -> vector<8x128xf32>
    %629 = arith.addf %625, %628 : vector<8x128xf32>
    %630 = vector.extract_strided_slice %629 {offsets = [0, 0], sizes = [8, 96], strides = [1, 1]} : vector<8x128xf32> to vector<8x96xf32>
    %631 = arith.negf %630 : vector<8x96xf32>
    %632 = math.exp %631 : vector<8x96xf32>
    %cst_240 = arith.constant 1.000000e+00 : f32
    %633 = vector.broadcast %cst_240 : f32 to vector<8x96xf32>
    %634 = arith.addf %633, %632 : vector<8x96xf32>
    %635 = arith.divf %633, %634 : vector<8x96xf32>
    %636 = vector.extract_strided_slice %635 {offsets = [0, 0], sizes = [8, 32], strides = [1, 1]} : vector<8x96xf32> to vector<8x32xf32>
    %637 = vector.extract_strided_slice %635 {offsets = [0, 32], sizes = [8, 32], strides = [1, 1]} : vector<8x96xf32> to vector<8x32xf32>
    %638 = vector.extract_strided_slice %635 {offsets = [0, 64], sizes = [8, 32], strides = [1, 1]} : vector<8x96xf32> to vector<8x32xf32>
    %639 = vector.extract_strided_slice %629 {offsets = [0, 96], sizes = [8, 32], strides = [1, 1]} : vector<8x128xf32> to vector<8x32xf32>
    %640 = math.tanh %639 : vector<8x32xf32>
    %641 = arith.mulf %637, %611 : vector<8x32xf32>
    %642 = arith.mulf %636, %640 : vector<8x32xf32>
    %643 = arith.addf %641, %642 : vector<8x32xf32>
    %644 = math.tanh %643 : vector<8x32xf32>
    %645 = arith.mulf %638, %644 : vector<8x32xf32>
    %c0_i32_241 = arith.constant 0 : i32
    %646 = arith.addi %c0_i32_241, %c3_i32_233 : i32
    %c1_i32_242 = arith.constant 1 : i32
    %647 = arith.addi %646, %c1_i32_242 : i32
    %648 = vector.broadcast %647 : i32 to vector<8x1xi32>
    %649 = arith.cmpi eq, %0, %648 : vector<8x1xi32>
    %650 = vector.shape_cast %649 : vector<8x1xi1> to vector<8x1xi1>
    %651 = vector.broadcast %650 : vector<8x1xi1> to vector<8x32xi1>
    %652 = arith.select %651, %645, %620 : vector<8x32xi1>, vector<8x32xf32>
    %c4_i32_243 = arith.constant 4 : i32
    %c8_i32_244 = arith.constant 8 : i32
    %653 = arith.muli %c4_i32_243, %c8_i32_244 : i32
    %c0_i32_245 = arith.constant 0 : i32
    %654 = arith.addi %c0_i32_245, %653 : i32
    %655 = tpu.assume_multiple %654, 8 : i32
    %656 = arith.index_cast %655 : i32 to index
    %c0_246 = arith.constant 0 : index
    %657 = vector.load %arg13[%656, %c0_246] : memref<128x128xf32, #tpu.memory_space<vmem>>, vector<8x128xf32>
    %658 = arith.truncf %645 : vector<8x32xf32> to vector<8x32xbf16>
    %c0_247 = arith.constant 0 : index
    %c0_248 = arith.constant 0 : index
    %659 = vector.load %arg10[%c0_247, %c0_248] : memref<32x128xbf16, #tpu.memory_space<vmem>>, vector<32x128xbf16>
    %cst_249 = arith.constant dense<0.000000e+00> : vector<8x128xf32>
    %660 = tpu.matmul %658, %659, %cst_249 {dimension_numbers = #tpu.dot_dimension_numbers<[1], [0], [0], [1], [0, 0, 1, 1], [], []>} : vector<8x32xbf16>, vector<32x128xbf16>, vector<8x128xf32> -> vector<8x128xf32>
    %661 = arith.addf %657, %660 : vector<8x128xf32>
    %662 = vector.extract_strided_slice %661 {offsets = [0, 0], sizes = [8, 96], strides = [1, 1]} : vector<8x128xf32> to vector<8x96xf32>
    %663 = arith.negf %662 : vector<8x96xf32>
    %664 = math.exp %663 : vector<8x96xf32>
    %cst_250 = arith.constant 1.000000e+00 : f32
    %665 = vector.broadcast %cst_250 : f32 to vector<8x96xf32>
    %666 = arith.addf %665, %664 : vector<8x96xf32>
    %667 = arith.divf %665, %666 : vector<8x96xf32>
    %668 = vector.extract_strided_slice %667 {offsets = [0, 0], sizes = [8, 32], strides = [1, 1]} : vector<8x96xf32> to vector<8x32xf32>
    %669 = vector.extract_strided_slice %667 {offsets = [0, 32], sizes = [8, 32], strides = [1, 1]} : vector<8x96xf32> to vector<8x32xf32>
    %670 = vector.extract_strided_slice %667 {offsets = [0, 64], sizes = [8, 32], strides = [1, 1]} : vector<8x96xf32> to vector<8x32xf32>
    %671 = vector.extract_strided_slice %661 {offsets = [0, 96], sizes = [8, 32], strides = [1, 1]} : vector<8x128xf32> to vector<8x32xf32>
    %672 = math.tanh %671 : vector<8x32xf32>
    %673 = arith.mulf %669, %643 : vector<8x32xf32>
    %674 = arith.mulf %668, %672 : vector<8x32xf32>
    %675 = arith.addf %673, %674 : vector<8x32xf32>
    %676 = math.tanh %675 : vector<8x32xf32>
    %677 = arith.mulf %670, %676 : vector<8x32xf32>
    %c0_i32_251 = arith.constant 0 : i32
    %678 = arith.addi %c0_i32_251, %c4_i32_243 : i32
    %c1_i32_252 = arith.constant 1 : i32
    %679 = arith.addi %678, %c1_i32_252 : i32
    %680 = vector.broadcast %679 : i32 to vector<8x1xi32>
    %681 = arith.cmpi eq, %0, %680 : vector<8x1xi32>
    %682 = vector.shape_cast %681 : vector<8x1xi1> to vector<8x1xi1>
    %683 = vector.broadcast %682 : vector<8x1xi1> to vector<8x32xi1>
    %684 = arith.select %683, %677, %652 : vector<8x32xi1>, vector<8x32xf32>
    %c5_i32_253 = arith.constant 5 : i32
    %c8_i32_254 = arith.constant 8 : i32
    %685 = arith.muli %c5_i32_253, %c8_i32_254 : i32
    %c0_i32_255 = arith.constant 0 : i32
    %686 = arith.addi %c0_i32_255, %685 : i32
    %687 = tpu.assume_multiple %686, 8 : i32
    %688 = arith.index_cast %687 : i32 to index
    %c0_256 = arith.constant 0 : index
    %689 = vector.load %arg13[%688, %c0_256] : memref<128x128xf32, #tpu.memory_space<vmem>>, vector<8x128xf32>
    %690 = arith.truncf %677 : vector<8x32xf32> to vector<8x32xbf16>
    %c0_257 = arith.constant 0 : index
    %c0_258 = arith.constant 0 : index
    %691 = vector.load %arg10[%c0_257, %c0_258] : memref<32x128xbf16, #tpu.memory_space<vmem>>, vector<32x128xbf16>
    %cst_259 = arith.constant dense<0.000000e+00> : vector<8x128xf32>
    %692 = tpu.matmul %690, %691, %cst_259 {dimension_numbers = #tpu.dot_dimension_numbers<[1], [0], [0], [1], [0, 0, 1, 1], [], []>} : vector<8x32xbf16>, vector<32x128xbf16>, vector<8x128xf32> -> vector<8x128xf32>
    %693 = arith.addf %689, %692 : vector<8x128xf32>
    %694 = vector.extract_strided_slice %693 {offsets = [0, 0], sizes = [8, 96], strides = [1, 1]} : vector<8x128xf32> to vector<8x96xf32>
    %695 = arith.negf %694 : vector<8x96xf32>
    %696 = math.exp %695 : vector<8x96xf32>
    %cst_260 = arith.constant 1.000000e+00 : f32
    %697 = vector.broadcast %cst_260 : f32 to vector<8x96xf32>
    %698 = arith.addf %697, %696 : vector<8x96xf32>
    %699 = arith.divf %697, %698 : vector<8x96xf32>
    %700 = vector.extract_strided_slice %699 {offsets = [0, 0], sizes = [8, 32], strides = [1, 1]} : vector<8x96xf32> to vector<8x32xf32>
    %701 = vector.extract_strided_slice %699 {offsets = [0, 32], sizes = [8, 32], strides = [1, 1]} : vector<8x96xf32> to vector<8x32xf32>
    %702 = vector.extract_strided_slice %699 {offsets = [0, 64], sizes = [8, 32], strides = [1, 1]} : vector<8x96xf32> to vector<8x32xf32>
    %703 = vector.extract_strided_slice %693 {offsets = [0, 96], sizes = [8, 32], strides = [1, 1]} : vector<8x128xf32> to vector<8x32xf32>
    %704 = math.tanh %703 : vector<8x32xf32>
    %705 = arith.mulf %701, %675 : vector<8x32xf32>
    %706 = arith.mulf %700, %704 : vector<8x32xf32>
    %707 = arith.addf %705, %706 : vector<8x32xf32>
    %708 = math.tanh %707 : vector<8x32xf32>
    %709 = arith.mulf %702, %708 : vector<8x32xf32>
    %c0_i32_261 = arith.constant 0 : i32
    %710 = arith.addi %c0_i32_261, %c5_i32_253 : i32
    %c1_i32_262 = arith.constant 1 : i32
    %711 = arith.addi %710, %c1_i32_262 : i32
    %712 = vector.broadcast %711 : i32 to vector<8x1xi32>
    %713 = arith.cmpi eq, %0, %712 : vector<8x1xi32>
    %714 = vector.shape_cast %713 : vector<8x1xi1> to vector<8x1xi1>
    %715 = vector.broadcast %714 : vector<8x1xi1> to vector<8x32xi1>
    %716 = arith.select %715, %709, %684 : vector<8x32xi1>, vector<8x32xf32>
    %c6_i32_263 = arith.constant 6 : i32
    %c8_i32_264 = arith.constant 8 : i32
    %717 = arith.muli %c6_i32_263, %c8_i32_264 : i32
    %c0_i32_265 = arith.constant 0 : i32
    %718 = arith.addi %c0_i32_265, %717 : i32
    %719 = tpu.assume_multiple %718, 8 : i32
    %720 = arith.index_cast %719 : i32 to index
    %c0_266 = arith.constant 0 : index
    %721 = vector.load %arg13[%720, %c0_266] : memref<128x128xf32, #tpu.memory_space<vmem>>, vector<8x128xf32>
    %722 = arith.truncf %709 : vector<8x32xf32> to vector<8x32xbf16>
    %c0_267 = arith.constant 0 : index
    %c0_268 = arith.constant 0 : index
    %723 = vector.load %arg10[%c0_267, %c0_268] : memref<32x128xbf16, #tpu.memory_space<vmem>>, vector<32x128xbf16>
    %cst_269 = arith.constant dense<0.000000e+00> : vector<8x128xf32>
    %724 = tpu.matmul %722, %723, %cst_269 {dimension_numbers = #tpu.dot_dimension_numbers<[1], [0], [0], [1], [0, 0, 1, 1], [], []>} : vector<8x32xbf16>, vector<32x128xbf16>, vector<8x128xf32> -> vector<8x128xf32>
    %725 = arith.addf %721, %724 : vector<8x128xf32>
    %726 = vector.extract_strided_slice %725 {offsets = [0, 0], sizes = [8, 96], strides = [1, 1]} : vector<8x128xf32> to vector<8x96xf32>
    %727 = arith.negf %726 : vector<8x96xf32>
    %728 = math.exp %727 : vector<8x96xf32>
    %cst_270 = arith.constant 1.000000e+00 : f32
    %729 = vector.broadcast %cst_270 : f32 to vector<8x96xf32>
    %730 = arith.addf %729, %728 : vector<8x96xf32>
    %731 = arith.divf %729, %730 : vector<8x96xf32>
    %732 = vector.extract_strided_slice %731 {offsets = [0, 0], sizes = [8, 32], strides = [1, 1]} : vector<8x96xf32> to vector<8x32xf32>
    %733 = vector.extract_strided_slice %731 {offsets = [0, 32], sizes = [8, 32], strides = [1, 1]} : vector<8x96xf32> to vector<8x32xf32>
    %734 = vector.extract_strided_slice %731 {offsets = [0, 64], sizes = [8, 32], strides = [1, 1]} : vector<8x96xf32> to vector<8x32xf32>
    %735 = vector.extract_strided_slice %725 {offsets = [0, 96], sizes = [8, 32], strides = [1, 1]} : vector<8x128xf32> to vector<8x32xf32>
    %736 = math.tanh %735 : vector<8x32xf32>
    %737 = arith.mulf %733, %707 : vector<8x32xf32>
    %738 = arith.mulf %732, %736 : vector<8x32xf32>
    %739 = arith.addf %737, %738 : vector<8x32xf32>
    %740 = math.tanh %739 : vector<8x32xf32>
    %741 = arith.mulf %734, %740 : vector<8x32xf32>
    %c0_i32_271 = arith.constant 0 : i32
    %742 = arith.addi %c0_i32_271, %c6_i32_263 : i32
    %c1_i32_272 = arith.constant 1 : i32
    %743 = arith.addi %742, %c1_i32_272 : i32
    %744 = vector.broadcast %743 : i32 to vector<8x1xi32>
    %745 = arith.cmpi eq, %0, %744 : vector<8x1xi32>
    %746 = vector.shape_cast %745 : vector<8x1xi1> to vector<8x1xi1>
    %747 = vector.broadcast %746 : vector<8x1xi1> to vector<8x32xi1>
    %748 = arith.select %747, %741, %716 : vector<8x32xi1>, vector<8x32xf32>
    %c7_i32_273 = arith.constant 7 : i32
    %c8_i32_274 = arith.constant 8 : i32
    %749 = arith.muli %c7_i32_273, %c8_i32_274 : i32
    %c0_i32_275 = arith.constant 0 : i32
    %750 = arith.addi %c0_i32_275, %749 : i32
    %751 = tpu.assume_multiple %750, 8 : i32
    %752 = arith.index_cast %751 : i32 to index
    %c0_276 = arith.constant 0 : index
    %753 = vector.load %arg13[%752, %c0_276] : memref<128x128xf32, #tpu.memory_space<vmem>>, vector<8x128xf32>
    %754 = arith.truncf %741 : vector<8x32xf32> to vector<8x32xbf16>
    %c0_277 = arith.constant 0 : index
    %c0_278 = arith.constant 0 : index
    %755 = vector.load %arg10[%c0_277, %c0_278] : memref<32x128xbf16, #tpu.memory_space<vmem>>, vector<32x128xbf16>
    %cst_279 = arith.constant dense<0.000000e+00> : vector<8x128xf32>
    %756 = tpu.matmul %754, %755, %cst_279 {dimension_numbers = #tpu.dot_dimension_numbers<[1], [0], [0], [1], [0, 0, 1, 1], [], []>} : vector<8x32xbf16>, vector<32x128xbf16>, vector<8x128xf32> -> vector<8x128xf32>
    %757 = arith.addf %753, %756 : vector<8x128xf32>
    %758 = vector.extract_strided_slice %757 {offsets = [0, 0], sizes = [8, 96], strides = [1, 1]} : vector<8x128xf32> to vector<8x96xf32>
    %759 = arith.negf %758 : vector<8x96xf32>
    %760 = math.exp %759 : vector<8x96xf32>
    %cst_280 = arith.constant 1.000000e+00 : f32
    %761 = vector.broadcast %cst_280 : f32 to vector<8x96xf32>
    %762 = arith.addf %761, %760 : vector<8x96xf32>
    %763 = arith.divf %761, %762 : vector<8x96xf32>
    %764 = vector.extract_strided_slice %763 {offsets = [0, 0], sizes = [8, 32], strides = [1, 1]} : vector<8x96xf32> to vector<8x32xf32>
    %765 = vector.extract_strided_slice %763 {offsets = [0, 32], sizes = [8, 32], strides = [1, 1]} : vector<8x96xf32> to vector<8x32xf32>
    %766 = vector.extract_strided_slice %763 {offsets = [0, 64], sizes = [8, 32], strides = [1, 1]} : vector<8x96xf32> to vector<8x32xf32>
    %767 = vector.extract_strided_slice %757 {offsets = [0, 96], sizes = [8, 32], strides = [1, 1]} : vector<8x128xf32> to vector<8x32xf32>
    %768 = math.tanh %767 : vector<8x32xf32>
    %769 = arith.mulf %765, %739 : vector<8x32xf32>
    %770 = arith.mulf %764, %768 : vector<8x32xf32>
    %771 = arith.addf %769, %770 : vector<8x32xf32>
    %772 = math.tanh %771 : vector<8x32xf32>
    %773 = arith.mulf %766, %772 : vector<8x32xf32>
    %c0_i32_281 = arith.constant 0 : i32
    %774 = arith.addi %c0_i32_281, %c7_i32_273 : i32
    %c1_i32_282 = arith.constant 1 : i32
    %775 = arith.addi %774, %c1_i32_282 : i32
    %776 = vector.broadcast %775 : i32 to vector<8x1xi32>
    %777 = arith.cmpi eq, %0, %776 : vector<8x1xi32>
    %778 = vector.shape_cast %777 : vector<8x1xi1> to vector<8x1xi1>
    %779 = vector.broadcast %778 : vector<8x1xi1> to vector<8x32xi1>
    %780 = arith.select %779, %773, %748 : vector<8x32xi1>, vector<8x32xf32>
    %c8_i32_283 = arith.constant 8 : i32
    %781 = arith.mulf %780, %780 : vector<8x32xf32>
    %cst_284 = arith.constant dense<0.000000e+00> : vector<8xf32>
    %782 = vector.multi_reduction <add>, %781, %cst_284 [1] : vector<8x32xf32> to vector<8xf32>
    %783 = vector.shape_cast %782 : vector<8xf32> to vector<8x1xf32>
    %cst_285 = arith.constant 9.99999996E-13 : f32
    %784 = vector.broadcast %cst_285 : f32 to vector<8x1xf32>
    %785 = arith.maximumf %783, %784 : vector<8x1xf32>
    %786 = math.rsqrt %785 : vector<8x1xf32>
    %787 = vector.broadcast %786 : vector<8x1xf32> to vector<8x32xf32>
    %788 = arith.mulf %780, %787 : vector<8x32xf32>
    %c0_286 = arith.constant 0 : index
    %c0_287 = arith.constant 0 : index
    %789 = vector.load %arg12[%c0_286, %c0_287] : memref<8x32xf32, #tpu.memory_space<vmem>>, vector<8x32xf32>
    tpu.vector_store %arg12[%c0_286, %c0_287], %788 {strides = array<i32>} : memref<8x32xf32, #tpu.memory_space<vmem>>, vector<8x32xf32>,
    return
  }
  func.func @transform_0(%arg0: i32) -> (i32, i32) {
    %c0_i32 = arith.constant 0 : i32
    %c0_i32_0 = arith.constant 0 : i32
    return %arg0, %c0_i32 : i32, i32
  }
  func.func @transform_1(%arg0: i32) -> (i32, i32) {
    %c0_i32 = arith.constant 0 : i32
    %c0_i32_0 = arith.constant 0 : i32
    return %arg0, %c0_i32 : i32, i32
  }
  func.func @transform_2(%arg0: i32) -> (i32, i32) {
    %c0_i32 = arith.constant 0 : i32
    %c0_i32_0 = arith.constant 0 : i32
    %c0_i32_1 = arith.constant 0 : i32
    return %c0_i32, %c0_i32_0 : i32, i32
  }
  func.func @transform_3(%arg0: i32) -> (i32, i32) {
    %c0_i32 = arith.constant 0 : i32
    %c0_i32_0 = arith.constant 0 : i32
    %c0_i32_1 = arith.constant 0 : i32
    return %c0_i32, %c0_i32_0 : i32, i32
  }
  func.func @transform_4(%arg0: i32) -> (i32, i32) {
    %c0_i32 = arith.constant 0 : i32
    %c0_i32_0 = arith.constant 0 : i32
    %c0_i32_1 = arith.constant 0 : i32
    return %c0_i32, %c0_i32_0 : i32, i32
  }
  func.func @transform_5(%arg0: i32) -> (i32, i32) {
    %c0_i32 = arith.constant 0 : i32
    %c0_i32_0 = arith.constant 0 : i32
    %c0_i32_1 = arith.constant 0 : i32
    return %c0_i32, %c0_i32_0 : i32, i32
  }
  func.func @transform_6(%arg0: i32) -> (i32, i32) {
    %c0_i32 = arith.constant 0 : i32
    %c0_i32_0 = arith.constant 0 : i32
    %c0_i32_1 = arith.constant 0 : i32
    return %c0_i32, %c0_i32_0 : i32, i32
  }
  func.func @transform_7(%arg0: i32) -> (i32, i32) {
    %c0_i32 = arith.constant 0 : i32
    %c0_i32_0 = arith.constant 0 : i32
    %c0_i32_1 = arith.constant 0 : i32
    return %c0_i32, %c0_i32_0 : i32, i32
  }
  func.func @transform_8(%arg0: i32) -> (i32, i32) {
    %c0_i32 = arith.constant 0 : i32
    %c0_i32_0 = arith.constant 0 : i32
    %c0_i32_1 = arith.constant 0 : i32
    return %c0_i32, %c0_i32_0 : i32, i32
  }
  func.func @transform_9(%arg0: i32) -> (i32, i32) {
    %c0_i32 = arith.constant 0 : i32
    %c0_i32_0 = arith.constant 0 : i32
    %c0_i32_1 = arith.constant 0 : i32
    return %c0_i32, %c0_i32_0 : i32, i32
  }
  func.func @transform_10(%arg0: i32) -> (i32, i32) {
    %c0_i32 = arith.constant 0 : i32
    %c0_i32_0 = arith.constant 0 : i32
    %c0_i32_1 = arith.constant 0 : i32
    return %c0_i32, %c0_i32_0 : i32, i32
  }
  func.func @transform_11(%arg0: i32) -> (i32, i32) {
    %c0_i32 = arith.constant 0 : i32
    %c0_i32_0 = arith.constant 0 : i32
    return %arg0, %c0_i32 : i32, i32
  }
}

</mosaic_0001>

<bundles_post_ra>
// kernel: tpu_custom_call.1
= control target key start
LH: loop header
LB: loop body
LE: loop exit
PB: predicated region body
PF: predicated region fallthrough
CT: control target
= control target key end

     0   :  { %16 = vsyncpa [#allocation5], 0  ;;  %s4193_s0 = inlined_call_operand.vmem [shape: s32[8,1], index: 0, kind: input, shape index: {}]   ;;  %s4194_s1 = inlined_call_operand.vmem [shape: bf16[64,32], index: 1, kind: input, shape index: {}]   ;;  %s4195_s2 = inlined_call_operand.vmem [shape: bf16[32,128], index: 2, kind: input, shape index: {}]   ;;  %s4196_s3 = inlined_call_operand.vmem [shape: bf16[32,128], index: 3, kind: input, shape index: {}]   ;;  %s4197_s4 = inlined_call_operand.hbm [shape: f32[1,128], index: 4, kind: input, shape index: {}]   ;;  %s4198_s5 = inlined_call_operand.vmem [shape: bf16[32,128], index: 5, kind: input, shape index: {}]   ;;  %s4199_s6 = inlined_call_operand.vmem [shape: bf16[32,128], index: 6, kind: input, shape index: {}]   ;;  %s4200_s7 = inlined_call_operand.vmem [shape: f32[1,128], index: 7, kind: input, shape index: {}]   ;;  %s4201_s8 = inlined_call_operand.hbm [shape: bf16[32,128], index: 8, kind: input, shape index: {}]   ;;  %s4202_s9 = inlined_call_operand.hbm [shape: bf16[32,128], index: 9, kind: input, shape index: {}]   ;;  %s4203_s10 = inlined_call_operand.vmem [shape: f32[1,128], index: 10, kind: input, shape index: {}]   ;;  %s4204_s11 = inlined_call_operand.hbm [shape: f32[8,32], index: 11, kind: output, shape index: {}]  }
   0x1   :  { %17 = vsyncpa [#allocation8], 0 }
   0x2   :  { %18 = vsyncpa [#allocation6], 0  ;;  %s3504_s17 = smov [#allocation7]  }
   0x3   :  { %s48_s18 = sshll.u32 %s3504_s17, 4  ;;  %s49_s18 = int_to_ptr.vmem [resolvable:$true] %s48_s18 }
   0x4   :  { %s3426_s19 = scalar_lea.vmem %s49_s18, 256  ;;  %p3431_p1 = scmp.lt.s32.totalorder %s49_s18, %s49_s18 }
   0x5   :  { %p3427_p0 = scmp.ne.s32.totalorder %s49_s18, %s3426_s19  ;;  %p3432_p2 = scmp.lt.s32.totalorder %s3426_s19, %s3426_s19 }
   0x7   :  { %p3433_p3 = por %p3432_p2, %p3431_p1 }
   0x9   :  { %p3434_p4 = pnand %p3433_p3, %p3427_p0 }
   0xb   :  { %3437 = shalt.err (!%p3434_p4)
}
   0xc   :  { %s3505_s20 = smov 64   ;;  %s3506_s21 = smov 4  }
   0xd   :  { %54 = dma.hbm_to_vmem [thread:$0]  %s4201_s8, 256, %s49_s18, [#allocation8], %s3505_s20, %s3505_s20, %s3506_s21  }
   0xe   :  { %s3507_s24 = smov [#allocation4]   ;;  %s3508_s26 = smov [#allocation9]  }
   0xf   :  { %s33_s25 = sshll.u32 %s3507_s24, 4  ;;  %s60_s27 = sshll.u32 %s3508_s26, 4  ;;  %s34_s25 = int_to_ptr.vmem [resolvable:$true] %s33_s25  ;;  %s61_s27 = int_to_ptr.vmem [resolvable:$true] %s60_s27 }
  0x10   :  { %s3446_s28 = scalar_lea.vmem %s34_s25, 16  ;;  %s3450_s29 = scalar_lea.vmem %s34_s25, 32 }
  0x11   :  { %p3447_p5 = scmp.ne.s32.totalorder %s34_s25, %s3446_s28  ;;  %p3451_p6 = scmp.lt.s32.totalorder %s34_s25, %s34_s25 }
  0x12   :  { %p3452_p7 = scmp.lt.s32.totalorder %s3450_s29, %s3446_s28 }
  0x14   :  { %p3453_p8 = por %p3452_p7, %p3451_p6 }
  0x16   :  { %p3454_p9 = pnand %p3453_p8, %p3447_p5 }
  0x18   :  { %3457 = shalt.err (!%p3454_p9)
}
  0x19   :  { %36 = dma.hbm_to_vmem [thread:$0]  %s4197_s4, 16, %s34_s25, [#allocation5]  }
  0x1a   :  { %s3466_s13 = scalar_lea.vmem %s61_s27, 256  ;;  %p3471_p11 = scmp.lt.s32.totalorder %s61_s27, %s61_s27 }
  0x1b   :  { %p3467_p10 = scmp.ne.s32.totalorder %s61_s27, %s3466_s13  ;;  %p3472_p12 = scmp.lt.s32.totalorder %s3466_s13, %s3466_s13 }
  0x1d   :  { %p3473_p13 = por %p3472_p12, %p3471_p11 }
  0x1f   :  { %p3474_p0 = pnand %p3473_p13, %p3467_p10 }
  0x21   :  { %3477 = shalt.err (!%p3474_p0)
}
  0x22   :  { %66 = dma.hbm_to_vmem [thread:$0]  %s4202_s9, 256, %s61_s27, [#allocation8], %s3505_s20, %s3505_s20, %s3506_s21  }
  0x23   :  { %3498 = dma.done.wait [#allocation5], 16  }
  0x24   :  { %3499 = vsyncadd [#allocation5], 4294967280 }
  0x25   :  { %3500 = dma.done.wait [#allocation8], 512  }
  0x26   :  { %3501 = vsyncadd [#allocation8], 4294966784  ;;  %v3509_v0 = vmov 0.0   ;;  %vm3510_vm0 = vmmov 0   ;;  %v3511_v1 = vmov 0   ;;  %v3172_v2 = vld [vmem:[%s4195_s2 + $0x8] sm:$0xff]  }
  0x27   :  { %2944 = vmatprep.subr.bf16.mxu1 %v3509_v0  ;;  %2948 = vmatprep.mubr.msk.bf16.mxu1 %vm3510_vm0, %v3509_v0  ;;  %v3173_v3 = vld [vmem:[%s4196_s3 + $0x8] sm:$0xff]   ;;  %v3174_v4 = vld [vmem:[%s4195_s2] sm:$0xff]   ;;  %vm131_vm1 = vcmask 261120   ;;  %s3512_s2 = smov 32   ;;  %v3181_v53 = vld [vmem:[%s4194_s1 + $0x10] sm:$0xff]   ;;  %vm309_vm2 = vcmask 257024  }
  0x28   :  { %3170 = vset.pattern.permute.xlu0 %v3511_v1  ;;  %3171 = vset.pattern.permute.xlu1 %v3511_v1  ;;  %v3175_v5 = vld [vmem:[%s4196_s3] sm:$0xff]   ;;  %v3177_v7 = vld [vmem:[%s4194_s1 + $0x8] sm:$0xff]   ;;  %v3182_v54 = vld [vmem:[%s4194_s1 + $0x18] sm:$0xff]  }
  0x29   :  { %2932 = vmatprep.subr.bf16.mxu0 %v3172_v2  ;;  %2945 = vmatpush3.bf16.msra.mxu1 %v3173_v3  ;;  %v3176_v6 = vld [vmem:[%s4194_s1] sm:$0xff]   ;;  %v3178_v27 = vld [vmem:[%s4196_s3 + $0x8] sm:$0xff]  }
  0x2a   :  { %2933 = vmatpush3.bf16.msra.mxu0 %v3172_v2  ;;  %2946 = vmatprep.subr.bf16.mxu1 %v3509_v0  ;;  %v3620_v10 = vld [vmem:[#allocation4] ss:$0 sm:$0xff]  ;;  %v3180_v52 = vld [vmem:[%s4196_s3 + $0x8] sm:$0xff]  }
  0x2b   :  { %2934 = vmatprep.subr.bf16.mxu0 %v3174_v4  ;;  %2936 = vmatprep.mubr.msk.bf16.mxu0 %vm131_vm1, %v3176_v6  ;;  %v3179_v28 = vld [vmem:[%s4196_s3] sm:$0xff]  }
  0x2c   :  { %v3183_v55 = vld [vmem:[%s4196_s3] sm:$0xff]  }
  0x2d   :  { %2947 = vmatpush3.bf16.msra.mxu1 %v3175_v5 }
  0x2e   :  { %2935 = vmatpush3.bf16.msra.mxu0 %v3174_v4  ;;  %2952 = vmatprep.subr.bf16.mxu1 %v3509_v0 }
  0x2f   :  { %2960 = vmatprep.subr.bf16.mxu0 %v3509_v0 }
  0x30   :  { %2949 = vmatmul.mubr.bf16.vlgmr.msra.gmra.mxu1 %v3511_v1 }
  0x31   :  { %2937 = vmatmul.mubr.msk.bf16.vlgmr.msra.gmra.mxu0 %vm131_vm1, %v3177_v7  ;;  %2956 = vmatprep.mubr.msk.bf16.mxu1 %vm3510_vm0, %v3509_v0 }
  0x32   :  { %2953 = vmatpush3.bf16.msra.mxu1 %v3178_v27  ;;  %2961 = vmatpush3.bf16.msra.mxu0 %v3180_v52 }
  0x33   :  { %2954 = vmatprep.subr.bf16.mxu1 %v3509_v0  ;;  %2940 = vmatprep.mubr.msk.bf16.mxu0 %vm131_vm1, %v3181_v53 }
  0x34   :  { %2962 = vmatprep.subr.bf16.mxu0 %v3509_v0 }
  0x36   :  { %2955 = vmatpush3.bf16.msra.mxu1 %v3179_v28  ;;  %2963 = vmatpush3.bf16.msra.mxu0 %v3183_v55 }
  0x37   :  { %2968 = vmatprep.subr.bf16.mxu1 %v3509_v0  ;;  %2976 = vmatprep.subr.bf16.mxu0 %v3509_v0 }
  0x39   :  { %2941 = vmatmul.mubr.msk.bf16.gmra.mxu0 %vm131_vm1, %v3182_v54 }
  0x3a   :  { %2964 = vmatprep.mubr.msk.bf16.mxu0 %vm3510_vm0, %v3509_v0 }
  0xf0   :  { %v271_v8 = vpop.f32.mrf.mxu1 }
  0xf1   :  { %v3618_v9 = vpop.f32.mrf.mxu0 }
  0xf2   :  { %v2950_v11 = vpop.f32.mrf.mxu1  ;;  %v187_v3 = vadd.f32 %v3618_v9, %v3620_v10 }
  0xf3   :  { %v178_v12 = vpop.f32.mrf.mxu0 }
  0xf4   :  { %v179_v13 = vadd.f32 %v3620_v10, %v178_v12  ;;  %v274_v14 = vpop.f32.mrf.mxu1 }
  0xf5   :  { %v3641_v34 = vpop.f32.mrf.mxu0 }
  0xf6   :  { %v277_v15 = vadd.f32 %v271_v8, %v179_v13  ;;  %v2951_v16 = vpop.f32.mrf.mxu1  ;;  %v190_v27 = vadd.f32 %v3641_v34, %v3620_v10 }
  0xf7   :  { %v181_v35 = vpop.f32.mrf.mxu0 }
  0xf8   :  { %3224 = vtanh.f32 %v277_v15  ;;  %v2711_v18 = vmul.f32 -1.442695, %v277_v15  ;;  %v182_v36 = vadd.f32 %v3620_v10, %v181_v35 }
  0xf9   :  { %v3672_v61 = vpop.f32.mrf.mxu0 }
  0xfa   :  { %3226 = vpow2.f32 %v2711_v18 }
  0xfb   :  { %v3674_v62 = vpop.f32.mrf.mxu0 }
  0xfd   :  { %v3676_v63 = vpop.f32.mrf.mxu0 }
  0xff   :  { %v3678_v2 = vpop.f32.mrf.mxu0 }
 0x105   :  { %v3225_v17 = vpop.eup %3224 }
 0x106   :  { %287 = vrot.lane.b32.xlu0 %v3225_v17, %s3512_s2 }
 0x107   :  { %v3227_v19 = vpop.eup %3226 }
 0x108   :  { %v281_v20 = vadd.f32 1.0, %v3227_v19 }
 0x10a   :  { %3228 = vrcp.f32 %v281_v20  ;;  %v3184_v20 = vld [vmem:[%s4196_s3 + $0x8] sm:$0xff]  }
 0x117   :  { %v3229_v21 = vpop.eup %3228 }
 0x118   :  { %v285_v24 = vmul.f32 0.0, %v3229_v21 }
 0x178   :  { %v288_v22 = vpop.permute.xlu0 %287 }
 0x179   :  { %v290_v23 = vmul.f32 %v3229_v21, %v288_v22 }
 0x17b   :  { %292 = vrot.lane.b32.xlu0 %v290_v23, %s3512_s2 }
 0x1ed   :  { %v293_v25 = vpop.permute.xlu0 %292 }
 0x1ee   :  { %v295_v26 = vadd.f32 %v293_v25, %v285_v24 }
 0x1f0   :  { %3230 = vtanh.f32 %v295_v26 }
 0x1fd   :  { %v3231_v29 = vpop.eup %3230 }
 0x1fe   :  { %298 = vrot.lane.b32.xlu1 %v3231_v29, %s3512_s2 }
 0x270   :  { %v299_v30 = vpop.permute.xlu1 %298 }
 0x271   :  { %v301_v31 = vmul.f32 %v3229_v21, %v299_v30  ;;  %v3185_v21 = vld [vmem:[%s4196_s3] sm:$0xff]  }
 0x273   :  { %v3634_v32 = vpack.c.bf16 %v301_v31, %v301_v31 }
 0x275   :  { %317 = vrot.lane.b32.xlu1 %v3634_v32, %s3505_s20 }
 0x2e7   :  { %v318_v33 = vpop.permute.xlu1 %317 }
 0x2e8   :  { %2957 = vmatmul.mubr.msk.bf16.vlgmr.msra.gmra.mxu1 %vm131_vm1, %v318_v33 }
 0x2e9   :  { %2972 = vmatprep.mubr.msk.bf16.mxu1 %vm3510_vm0, %v3509_v0  ;;  %2969 = vmatpush3.bf16.msra.mxu1 %v3184_v20 }
 0x2ea   :  { %2970 = vmatprep.subr.bf16.mxu1 %v3509_v0 }
 0x2ed   :  { %2971 = vmatpush3.bf16.msra.mxu1 %v3185_v21 }
 0x2ee   :  { %2984 = vmatprep.subr.bf16.mxu1 %v3509_v0 }
 0x3a8   :  { %v368_v37 = vpop.f32.mrf.mxu1 }
 0x3a9   :  { %v374_v38 = vadd.f32 %v368_v37, %v182_v36 }
 0x3aa   :  { %v2958_v39 = vpop.f32.mrf.mxu1 }
 0x3ab   :  { %3232 = vtanh.f32 %v374_v38  ;;  %v2716_v43 = vmul.f32 -1.442695, %v374_v38 }
 0x3ac   :  { %v371_v40 = vpop.f32.mrf.mxu1 }
 0x3ad   :  { %3234 = vpow2.f32 %v2716_v43 }
 0x3ae   :  { %v2959_v41 = vpop.f32.mrf.mxu1 }
 0x3b8   :  { %v3233_v42 = vpop.eup %3232 }
 0x3b9   :  { %384 = vrot.lane.b32.xlu0 %v3233_v42, %s3512_s2 }
 0x3ba   :  { %v3235_v44 = vpop.eup %3234 }
 0x3bb   :  { %v378_v45 = vadd.f32 1.0, %v3235_v44  ;;  %v3186_v44 = vld [vmem:[%s4196_s3 + $0x8] sm:$0xff]  }
 0x3bd   :  { %3236 = vrcp.f32 %v378_v45  ;;  %v3187_v45 = vld [vmem:[%s4196_s3] sm:$0xff]  }
 0x3ca   :  { %v3237_v46 = vpop.eup %3236 }
 0x3cb   :  { %v382_v49 = vmul.f32 %v3237_v46, %v295_v26 }
 0x42b   :  { %v385_v47 = vpop.permute.xlu0 %384 }
 0x42c   :  { %v387_v48 = vmul.f32 %v3237_v46, %v385_v47 }
 0x42e   :  { %389 = vrot.lane.b32.xlu1 %v387_v48, %s3512_s2 }
 0x4a0   :  { %v390_v50 = vpop.permute.xlu1 %389 }
 0x4a1   :  { %v392_v51 = vadd.f32 %v390_v50, %v382_v49 }
 0x4a3   :  { %3238 = vtanh.f32 %v392_v51 }
 0x4b0   :  { %v3239_v56 = vpop.eup %3238 }
 0x4b1   :  { %395 = vrot.lane.b32.xlu0 %v3239_v56, %s3512_s2 }
 0x523   :  { %v396_v57 = vpop.permute.xlu0 %395 }
 0x524   :  { %v398_v58 = vmul.f32 %v3237_v46, %v396_v57 }
 0x526   :  { %v3665_v59 = vpack.c.bf16 %v398_v58, %v398_v58 }
 0x528   :  { %414 = vrot.lane.b32.xlu1 %v3665_v59, %s3505_s20 }
 0x59a   :  { %v415_v60 = vpop.permute.xlu1 %414 }
 0x59b   :  { %2965 = vmatmul.mubr.msk.bf16.vlgmr.msra.gmra.mxu0 %vm131_vm1, %v415_v60 }
 0x59c   :  { %2980 = vmatprep.mubr.msk.bf16.mxu0 %vm3510_vm0, %v3509_v0  ;;  %2977 = vmatpush3.bf16.msra.mxu0 %v3186_v44 }
 0x59d   :  { %2978 = vmatprep.subr.bf16.mxu0 %v3509_v0 }
 0x5a0   :  { %2979 = vmatpush3.bf16.msra.mxu0 %v3187_v45 }
 0x5a1   :  { %2992 = vmatprep.subr.bf16.mxu0 %v3509_v0 }
 0x65b   :  { %v465_v4 = vpop.f32.mrf.mxu0 }
 0x65c   :  { %v471_v5 = vadd.f32 %v465_v4, %v187_v3 }
 0x65d   :  { %v2966_v6 = vpop.f32.mrf.mxu0 }
 0x65e   :  { %3240 = vtanh.f32 %v471_v5  ;;  %v2721_v12 = vmul.f32 -1.442695, %v471_v5 }
 0x65f   :  { %v468_v7 = vpop.f32.mrf.mxu0 }
 0x660   :  { %3242 = vpow2.f32 %v2721_v12  ;;  %v3189_v12 = vld [vmem:[%s4196_s3] sm:$0xff]  }
 0x661   :  { %v2967_v8 = vpop.f32.mrf.mxu0 }
 0x66b   :  { %v3241_v11 = vpop.eup %3240 }
 0x66c   :  { %481 = vrot.lane.b32.xlu0 %v3241_v11, %s3512_s2  ;;  %v3188_v11 = vld [vmem:[%s4196_s3 + $0x8] sm:$0xff]  }
 0x66d   :  { %v3243_v13 = vpop.eup %3242 }
 0x66e   :  { %v475_v14 = vadd.f32 1.0, %v3243_v13 }
 0x670   :  { %3244 = vrcp.f32 %v475_v14 }
 0x67d   :  { %v3245_v15 = vpop.eup %3244 }
 0x67e   :  { %v479_v9 = vmul.f32 %v3245_v15, %v392_v51  ;;  %v195_v51 = vadd.f32 %v3620_v10, %v3674_v62 }
 0x6de   :  { %v482_v16 = vpop.permute.xlu0 %481 }
 0x6df   :  { %v484_v17 = vmul.f32 %v3245_v15, %v482_v16 }
 0x6e1   :  { %486 = vrot.lane.b32.xlu1 %v484_v17, %s3512_s2 }
 0x753   :  { %v487_v18 = vpop.permute.xlu1 %486 }
 0x754   :  { %v489_v19 = vadd.f32 %v487_v18, %v479_v9  ;;  %v198_v9 = vadd.f32 %v3620_v10, %v3678_v2 }
 0x756   :  { %3246 = vtanh.f32 %v489_v19 }
 0x763   :  { %v3247_v22 = vpop.eup %3246 }
 0x764   :  { %492 = vrot.lane.b32.xlu0 %v3247_v22, %s3512_s2 }
 0x7d6   :  { %v493_v23 = vpop.permute.xlu0 %492 }
 0x7d7   :  { %v495_v24 = vmul.f32 %v3245_v15, %v493_v23 }
 0x7d9   :  { %v3693_v25 = vpack.c.bf16 %v495_v24, %v495_v24 }
 0x7db   :  { %511 = vrot.lane.b32.xlu1 %v3693_v25, %s3505_s20 }
 0x84d   :  { %v512_v26 = vpop.permute.xlu1 %511 }
 0x84e   :  { %2973 = vmatmul.mubr.msk.bf16.vlgmr.msra.gmra.mxu1 %vm131_vm1, %v512_v26 }
 0x84f   :  { %2988 = vmatprep.mubr.msk.bf16.mxu1 %vm3510_vm0, %v3509_v0  ;;  %2985 = vmatpush3.bf16.msra.mxu1 %v3188_v11  ;;  %v3198_v11 = vld [vmem:[%s4199_s6 + $0x8] sm:$0xff]  }
 0x850   :  { %2986 = vmatprep.subr.bf16.mxu1 %v3509_v0 }
 0x853   :  { %2987 = vmatpush3.bf16.msra.mxu1 %v3189_v12 }
 0x854   :  { %3000 = vmatprep.subr.bf16.mxu1 %v3509_v0 }
 0x90e   :  { %v562_v28 = vpop.f32.mrf.mxu1 }
 0x90f   :  { %v568_v29 = vadd.f32 %v562_v28, %v190_v27 }
 0x910   :  { %v2974_v30 = vpop.f32.mrf.mxu1 }
 0x911   :  { %3248 = vtanh.f32 %v568_v29  ;;  %v2726_v36 = vmul.f32 -1.442695, %v568_v29 }
 0x912   :  { %v565_v31 = vpop.f32.mrf.mxu1 }
 0x913   :  { %3250 = vpow2.f32 %v2726_v36  ;;  %v3191_v36 = vld [vmem:[%s4196_s3] sm:$0xff]  }
 0x914   :  { %v2975_v33 = vpop.f32.mrf.mxu1 }
 0x91e   :  { %v3249_v35 = vpop.eup %3248 }
 0x91f   :  { %578 = vrot.lane.b32.xlu0 %v3249_v35, %s3512_s2  ;;  %v3190_v35 = vld [vmem:[%s4196_s3 + $0x8] sm:$0xff]  }
 0x920   :  { %v3251_v37 = vpop.eup %3250 }
 0x921   :  { %v572_v38 = vadd.f32 1.0, %v3251_v37 }
 0x923   :  { %3252 = vrcp.f32 %v572_v38 }
 0x930   :  { %v3253_v39 = vpop.eup %3252 }
 0x931   :  { %v576_v34 = vmul.f32 %v3253_v39, %v489_v19 }
 0x991   :  { %v579_v40 = vpop.permute.xlu0 %578 }
 0x992   :  { %v581_v41 = vmul.f32 %v3253_v39, %v579_v40 }
 0x994   :  { %583 = vrot.lane.b32.xlu1 %v581_v41, %s3512_s2 }
 0xa06   :  { %v584_v42 = vpop.permute.xlu1 %583 }
 0xa07   :  { %v586_v43 = vadd.f32 %v584_v42, %v576_v34  ;;  %v203_v34 = vadd.f32 %v3672_v61, %v3620_v10 }
 0xa09   :  { %3254 = vtanh.f32 %v586_v43 }
 0xa16   :  { %v3255_v46 = vpop.eup %3254 }
 0xa17   :  { %589 = vrot.lane.b32.xlu0 %v3255_v46, %s3512_s2 }
 0xa89   :  { %v590_v47 = vpop.permute.xlu0 %589 }
 0xa8a   :  { %v592_v48 = vmul.f32 %v3253_v39, %v590_v47 }
 0xa8c   :  { %v3713_v49 = vpack.c.bf16 %v592_v48, %v592_v48 }
 0xa8e   :  { %608 = vrot.lane.b32.xlu1 %v3713_v49, %s3505_s20 }
 0xb00   :  { %v609_v50 = vpop.permute.xlu1 %608 }
 0xb01   :  { %2981 = vmatmul.mubr.msk.bf16.vlgmr.msra.gmra.mxu0 %vm131_vm1, %v609_v50 }
 0xb02   :  { %2996 = vmatprep.mubr.msk.bf16.mxu0 %vm3510_vm0, %v3509_v0  ;;  %2993 = vmatpush3.bf16.msra.mxu0 %v3190_v35 }
 0xb03   :  { %2994 = vmatprep.subr.bf16.mxu0 %v3509_v0 }
 0xb06   :  { %2995 = vmatpush3.bf16.msra.mxu0 %v3191_v36 }
 0xbc1   :  { %v659_v52 = vpop.f32.mrf.mxu0 }
 0xbc2   :  { %v665_v53 = vadd.f32 %v659_v52, %v195_v51 }
 0xbc3   :  { %v2982_v54 = vpop.f32.mrf.mxu0 }
 0xbc4   :  { %3256 = vtanh.f32 %v665_v53  ;;  %v2731_v58 = vmul.f32 -1.442695, %v665_v53 }
 0xbc5   :  { %v662_v55 = vpop.f32.mrf.mxu0 }
 0xbc6   :  { %3258 = vpow2.f32 %v2731_v58 }
 0xbc7   :  { %v2983_v56 = vpop.f32.mrf.mxu0 }
 0xbd1   :  { %v3257_v57 = vpop.eup %3256 }
 0xbd2   :  { %675 = vrot.lane.b32.xlu0 %v3257_v57, %s3512_s2 }
 0xbd3   :  { %v3259_v60 = vpop.eup %3258 }
 0xbd4   :  { %v669_v3 = vadd.f32 1.0, %v3259_v60 }
 0xbd6   :  { %3260 = vrcp.f32 %v669_v3  ;;  %v3196_v3 = vld [vmem:[%s4196_s3 + $0x8] sm:$0xff]  }
 0xbe3   :  { %v3261_v4 = vpop.eup %3260 }
 0xbe4   :  { %v673_v62 = vmul.f32 %v3261_v4, %v586_v43 }
 0xc44   :  { %v676_v5 = vpop.permute.xlu0 %675 }
 0xc45   :  { %v678_v6 = vmul.f32 %v3261_v4, %v676_v5 }
 0xc47   :  { %680 = vrot.lane.b32.xlu1 %v678_v6, %s3512_s2 }
 0xcb9   :  { %v681_v7 = vpop.permute.xlu1 %680 }
 0xcba   :  { %v683_v8 = vadd.f32 %v681_v7, %v673_v62 }
 0xcbc   :  { %3262 = vtanh.f32 %v683_v8 }
 0xcc9   :  { %v3263_v13 = vpop.eup %3262 }
 0xcca   :  { %686 = vrot.lane.b32.xlu0 %v3263_v13, %s3512_s2  ;;  %v3199_v13 = vld [vmem:[%s4199_s6] sm:$0xff]  }
 0xd3c   :  { %v687_v14 = vpop.permute.xlu0 %686 }
 0xd3d   :  { %v689_v15 = vmul.f32 %v3261_v4, %v687_v14  ;;  %v3197_v4 = vld [vmem:[%s4196_s3] sm:$0xff]   ;;  %v206_v14 = vadd.f32 %v3676_v63, %v3620_v10 }
 0xd3f   :  { %v3733_v16 = vpack.c.bf16 %v689_v15, %v689_v15 }
 0xd41   :  { %705 = vrot.lane.b32.xlu1 %v3733_v16, %s3505_s20 }
 0xdb3   :  { %v706_v17 = vpop.permute.xlu1 %705 }
 0xdb4   :  { %2989 = vmatmul.mubr.msk.bf16.vlgmr.msra.gmra.mxu1 %vm131_vm1, %v706_v17 }
 0xdb5   :  { %3004 = vmatprep.mubr.msk.bf16.mxu1 %vm3510_vm0, %v3509_v0  ;;  %3001 = vmatpush3.bf16.msra.mxu1 %v3196_v3 }
 0xdb6   :  { %3002 = vmatprep.subr.bf16.mxu1 %v3509_v0 }
 0xdb9   :  { %3003 = vmatpush3.bf16.msra.mxu1 %v3197_v4 }
 0xdba   :  { %3020 = vmatprep.subr.bf16.mxu1 %v3509_v0 }
 0xe74   :  { %v756_v18 = vpop.f32.mrf.mxu1 }
 0xe75   :  { %v762_v19 = vadd.f32 %v756_v18, %v198_v9 }
 0xe76   :  { %v2990_v20 = vpop.f32.mrf.mxu1 }
 0xe77   :  { %3264 = vtanh.f32 %v762_v19  ;;  %v2736_v24 = vmul.f32 -1.442695, %v762_v19 }
 0xe78   :  { %v759_v21 = vpop.f32.mrf.mxu1 }
 0xe79   :  { %3266 = vpow2.f32 %v2736_v24  ;;  %v3819_v21 = vld [vmem:[%s4200_s7] ss:$0 sm:$0xff] }
 0xe7a   :  { %v2991_v22 = vpop.f32.mrf.mxu1 }
 0xe84   :  { %v3265_v23 = vpop.eup %3264 }
 0xe85   :  { %772 = vrot.lane.b32.xlu0 %v3265_v23, %s3512_s2 }
 0xe86   :  { %v3267_v26 = vpop.eup %3266 }
 0xe87   :  { %v766_v27 = vadd.f32 1.0, %v3267_v26 }
 0xe89   :  { %3268 = vrcp.f32 %v766_v27 }
 0xe96   :  { %v3269_v28 = vpop.eup %3268 }
 0xe97   :  { %v770_v2 = vmul.f32 %v3269_v28, %v683_v8 }
 0xef7   :  { %v773_v29 = vpop.permute.xlu0 %772 }
 0xef8   :  { %v775_v30 = vmul.f32 %v3269_v28, %v773_v29 }
 0xefa   :  { %777 = vrot.lane.b32.xlu1 %v775_v30, %s3512_s2 }
 0xf6c   :  { %v778_v31 = vpop.permute.xlu1 %777 }
 0xf6d   :  { %v780_v33 = vadd.f32 %v778_v31, %v770_v2 }
 0xf6f   :  { %3270 = vtanh.f32 %v780_v33 }
 0xf7c   :  { %v3271_v37 = vpop.eup %3270 }
 0xf7d   :  { %783 = vrot.lane.b32.xlu0 %v3271_v37, %s3512_s2 }
 0xfef   :  { %v784_v38 = vpop.permute.xlu0 %783 }
 0xff0   :  { %v786_v39 = vmul.f32 %v3269_v28, %v784_v38 }
 0xff2   :  { %v3752_v40 = vpack.c.bf16 %v786_v39, %v786_v39  ;;  %v3200_v39 = vld [vmem:[%s4199_s6 + $0x8] sm:$0xff]  }
 0xff4   :  { %802 = vrot.lane.b32.xlu1 %v3752_v40, %s3505_s20 }
0x1066   :  { %v803_v41 = vpop.permute.xlu1 %802 }
0x1067   :  { %2997 = vmatmul.mubr.msk.bf16.vlgmr.msra.gmra.mxu0 %vm131_vm1, %v803_v41  ;;  %v3201_v41 = vld [vmem:[%s4199_s6] sm:$0xff]  }
0x1127   :  { %v853_v42 = vpop.f32.mrf.mxu0 }
0x1128   :  { %v859_v43 = vadd.f32 %v853_v42, %v203_v34 }
0x1129   :  { %v2998_v44 = vpop.f32.mrf.mxu0 }
0x112a   :  { %3272 = vtanh.f32 %v859_v43  ;;  %v2741_v48 = vmul.f32 -1.442695, %v859_v43 }
0x112b   :  { %v856_v45 = vpop.f32.mrf.mxu0 }
0x112c   :  { %3274 = vpow2.f32 %v2741_v48 }
0x112d   :  { %v2999_v46 = vpop.f32.mrf.mxu0 }
0x1137   :  { %v3273_v47 = vpop.eup %3272 }
0x1138   :  { %869 = vrot.lane.b32.xlu0 %v3273_v47, %s3512_s2 }
0x1139   :  { %v3275_v50 = vpop.eup %3274 }
0x113a   :  { %v863_v51 = vadd.f32 1.0, %v3275_v50 }
0x113c   :  { %3276 = vrcp.f32 %v863_v51 }
0x1149   :  { %v3277_v52 = vpop.eup %3276 }
0x114a   :  { %v867_v61 = vmul.f32 %v3277_v52, %v780_v33 }
0x11aa   :  { %v870_v53 = vpop.permute.xlu0 %869 }
0x11ab   :  { %v872_v54 = vmul.f32 %v3277_v52, %v870_v53 }
0x11ad   :  { %874 = vrot.lane.b32.xlu1 %v872_v54, %s3512_s2 }
0x11b1   :  { %306 = vrot.lane.b32.xlu1 %v3634_v32, %s3505_s20  ;;  %v3192_v32 = vld [vmem:[%s4198_s5 + $0x8] sm:$0xff]  }
0x11b2   :  { %3008 = vmatprep.subr.bf16.mxu0 %v3192_v32 }
0x11b3   :  { %3009 = vmatpush3.bf16.msra.mxu0 %v3192_v32 }
0x11b5   :  { %500 = vrot.lane.b32.xlu1 %v3693_v25, %s3505_s20  ;;  %v3193_v25 = vld [vmem:[%s4198_s5] sm:$0xff]  }
0x11b6   :  { %3010 = vmatprep.subr.bf16.mxu0 %v3193_v25 }
0x11b7   :  { %3011 = vmatpush3.bf16.msra.mxu0 %v3193_v25 }
0x11b8   :  { %3036 = vmatprep.subr.bf16.mxu0 %v3509_v0 }
0x121f   :  { %v875_v55 = vpop.permute.xlu1 %874 }
0x1220   :  { %v3765_v56 = vadd.f32 %v875_v55, %v867_v61 }
0x1222   :  { %3278 = vtanh.f32 %v3765_v56 }
0x1223   :  { %v307_v57 = vpop.permute.xlu1 %306 }
0x1224   :  { %310 = vst.msk [vmem:[#allocation3] sm:$0xf] %vm309_vm2, %v307_v57 }
0x1227   :  { %v501_v58 = vpop.permute.xlu1 %500 }
0x1228   :  { %504 = vst.msk [vmem:[#allocation3 + $0x8] sm:$0xf] %vm309_vm2, %v501_v58 }
0x122f   :  { %v3279_v60 = vpop.eup %3278 }
0x1230   :  { %880 = vrot.lane.b32.xlu0 %v3279_v60, %s3512_s2 }
0x1234   :  { %403 = vrot.lane.b32.xlu0 %v3665_v59, %s3505_s20 }
0x1238   :  { %597 = vrot.lane.b32.xlu0 %v3713_v49, %s3505_s20 }
0x12a2   :  { %v881_v5 = vpop.permute.xlu0 %880 }
0x12a3   :  { %v883_v6 = vmul.f32 %v3277_v52, %v881_v5 }
0x12a5   :  { %v3790_v59 = vpack.c.bf16 %v883_v6, %v883_v6 }
0x12a6   :  { %v404_v62 = vpop.permute.xlu0 %403 }
0x12a7   :  { %407 = vst.msk [vmem:[#allocation3 + $0x4] sm:$0xf] %vm309_vm2, %v404_v62  ;;  %899 = vrot.lane.b32.xlu1 %v3790_v59, %s3505_s20 }
0x12aa   :  { %v598_v7 = vpop.permute.xlu0 %597 }
0x12ab   :  { %601 = vst.msk [vmem:[#allocation3 + $0xc] sm:$0xf] %vm309_vm2, %v598_v7 }
0x12ae   :  { %v3194_v8 = vld [vmem:[#allocation3] sm:$0xff]  }
0x12af   :  { %3012 = vmatprep.mubr.msk.bf16.mxu0 %vm131_vm1, %v3194_v8 }
0x12b2   :  { %v3195_v49 = vld [vmem:[#allocation3 + $0x8] sm:$0xff]  }
0x12b3   :  { %3013 = vmatmul.mubr.msk.bf16.vlgmr.msra.gmra.mxu0 %vm131_vm1, %v3195_v49 }
0x1319   :  { %v900_v12 = vpop.permute.xlu1 %899 }
0x131a   :  { %3005 = vmatmul.mubr.msk.bf16.vlgmr.msra.gmra.mxu1 %vm131_vm1, %v900_v12 }
0x131b   :  { %3021 = vmatpush3.bf16.msra.mxu1 %v3198_v11  ;;  %3024 = vmatprep.mubr.msk.bf16.mxu1 %vm3510_vm0, %v3509_v0 }
0x131c   :  { %3022 = vmatprep.subr.bf16.mxu1 %v3509_v0 }
0x131f   :  { %3023 = vmatpush3.bf16.msra.mxu1 %v3199_v13 }
0x1320   :  { %3028 = vmatprep.subr.bf16.mxu1 %v3509_v0 }
0x1322   :  { %3025 = vmatmul.mubr.bf16.vlgmr.msra.gmra.mxu1 %v3511_v1 }
0x1323   :  { %3032 = vmatprep.mubr.msk.bf16.mxu1 %vm3510_vm0, %v3509_v0  ;;  %3029 = vmatpush3.bf16.msra.mxu1 %v3200_v39 }
0x1324   :  { %3030 = vmatprep.subr.bf16.mxu1 %v3509_v0 }
0x1327   :  { %3031 = vmatpush3.bf16.msra.mxu1 %v3201_v41 }
0x1328   :  { %3044 = vmatprep.subr.bf16.mxu1 %v3509_v0 }
0x1373   :  { %v3814_v15 = vpop.f32.mrf.mxu0 }
0x1375   :  { %v1087_v19 = vpop.f32.mrf.mxu0 }
0x1376   :  { %v1088_v23 = vadd.f32 %v3819_v21, %v1087_v19 }
0x1377   :  { %v3850_v25 = vpop.f32.mrf.mxu0 }
0x1379   :  { %v1090_v60 = vpop.f32.mrf.mxu0 }
0x137a   :  { %v1091_v3 = vadd.f32 %v3819_v21, %v1090_v60 }
0x13da   :  { %v950_v17 = vpop.f32.mrf.mxu1 }
0x13db   :  { %v956_v9 = vadd.f32 %v950_v17, %v206_v14 }
0x13dc   :  { %v3006_v18 = vpop.f32.mrf.mxu1 }
0x13dd   :  { %v2746_v43 = vmul.f32 -1.442695, %v956_v9 }
0x13de   :  { %v953_v20 = vpop.f32.mrf.mxu1 }
0x13df   :  { %v3204_v20 = vld [vmem:[%s4199_s6 + $0x8] sm:$0xff]  }
0x13e0   :  { %v3007_v22 = vpop.f32.mrf.mxu1  ;;  %3037 = vmatpush3.bf16.msra.mxu0 %v3204_v20 }
0x13e1   :  { %3038 = vmatprep.subr.bf16.mxu0 %v3509_v0 }
0x13e2   :  { %v1177_v24 = vpop.f32.mrf.mxu1 }
0x13e3   :  { %v1183_v26 = vadd.f32 %v1177_v24, %v1088_v23  ;;  %v3205_v23 = vld [vmem:[%s4199_s6] sm:$0xff]  }
0x13e4   :  { %v3026_v27 = vpop.f32.mrf.mxu1  ;;  %3039 = vmatpush3.bf16.msra.mxu0 %v3205_v23 }
0x13e5   :  { %3280 = vtanh.f32 %v1183_v26  ;;  %v2761_v29 = vmul.f32 -1.442695, %v1183_v26  ;;  %3052 = vmatprep.subr.bf16.mxu0 %v3509_v0 }
0x13e6   :  { %v1180_v10 = vpop.f32.mrf.mxu1 }
0x13e7   :  { %3282 = vpow2.f32 %v2761_v29 }
0x13e8   :  { %v3027_v63 = vpop.f32.mrf.mxu1 }
0x13f2   :  { %v3281_v28 = vpop.eup %3280 }
0x13f3   :  { %1193 = vrot.lane.b32.xlu0 %v3281_v28, %s3512_s2 }
0x13f4   :  { %v3283_v30 = vpop.eup %3282 }
0x13f5   :  { %v1187_v2 = vadd.f32 1.0, %v3283_v30 }
0x13f7   :  { %3284 = vrcp.f32 %v1187_v2 }
0x1404   :  { %v3285_v31 = vpop.eup %3284 }
0x1405   :  { %v1191_v36 = vmul.f32 0.0, %v3285_v31 }
0x1465   :  { %v1194_v33 = vpop.permute.xlu0 %1193 }
0x1466   :  { %v1196_v35 = vmul.f32 %v3285_v31, %v1194_v33 }
0x1468   :  { %1198 = vrot.lane.b32.xlu1 %v1196_v35, %s3512_s2  ;;  %v1096_v35 = vadd.f32 %v3814_v15, %v3819_v21 }
0x14da   :  { %v1199_v37 = vpop.permute.xlu1 %1198 }
0x14db   :  { %v1201_v38 = vadd.f32 %v1199_v37, %v1191_v36 }
0x14dd   :  { %3286 = vtanh.f32 %v1201_v38 }
0x14de   :  { %3288 = vtanh.f32 %v956_v9 }
0x14df   :  { %3290 = vpow2.f32 %v2746_v43 }
0x14ea   :  { %v3287_v34 = vpop.eup %3286 }
0x14eb   :  { %1204 = vrot.lane.b32.xlu0 %v3287_v34, %s3512_s2  ;;  %v3289_v42 = vpop.eup %3288 }
0x14ec   :  { %v3291_v44 = vpop.eup %3290 }
0x14ed   :  { %v960_v45 = vadd.f32 1.0, %v3291_v44 }
0x14ef   :  { %966 = vrot.lane.b32.xlu0 %v3289_v42, %s3512_s2  ;;  %3292 = vrcp.f32 %v960_v45 }
0x14fc   :  { %v3293_v50 = vpop.eup %3292 }
0x14fd   :  { %v964_v54 = vmul.f32 %v3293_v50, %v3765_v56 }
0x155d   :  { %v1205_v46 = vpop.permute.xlu0 %1204 }
0x155e   :  { %v1207_v47 = vmul.f32 %v3285_v31, %v1205_v46 }
0x1560   :  { %v3834_v48 = vpack.c.bf16 %v1207_v47, %v1207_v47 }
0x1561   :  { %v967_v51 = vpop.permute.xlu0 %966 }
0x1562   :  { %v969_v52 = vmul.f32 %v3293_v50, %v967_v51  ;;  %1221 = vrot.lane.b32.xlu1 %v3834_v48, %s3505_s20 }
0x1564   :  { %971 = vrot.lane.b32.xlu0 %v969_v52, %s3512_s2  ;;  %v3206_v52 = vld [vmem:[%s4199_s6 + $0x8] sm:$0xff]  }
0x15d4   :  { %v1222_v53 = vpop.permute.xlu1 %1221 }
0x15d5   :  { %3033 = vmatmul.mubr.msk.bf16.vlgmr.msra.gmra.mxu1 %vm131_vm1, %v1222_v53  ;;  %v3207_v53 = vld [vmem:[%s4199_s6] sm:$0xff]  }
0x15d6   :  { %v972_v61 = vpop.permute.xlu0 %971  ;;  %3048 = vmatprep.mubr.msk.bf16.mxu1 %vm3510_vm0, %v3509_v0  ;;  %3045 = vmatpush3.bf16.msra.mxu1 %v3206_v52 }
0x15d7   :  { %v974_v55 = vadd.f32 %v972_v61, %v964_v54  ;;  %3046 = vmatprep.subr.bf16.mxu1 %v3509_v0 }
0x15d9   :  { %3294 = vtanh.f32 %v974_v55 }
0x15da   :  { %3047 = vmatpush3.bf16.msra.mxu1 %v3207_v53 }
0x15db   :  { %3060 = vmatprep.subr.bf16.mxu1 %v3509_v0 }
0x15e6   :  { %v3295_v57 = vpop.eup %3294 }
0x15e7   :  { %977 = vrot.lane.b32.xlu0 %v3295_v57, %s3512_s2 }
0x15eb   :  { %694 = vrot.lane.b32.xlu0 %v3733_v16, %s3505_s20 }
0x15ef   :  { %888 = vrot.lane.b32.xlu0 %v3790_v59, %s3505_s20 }
0x1659   :  { %v978_v58 = vpop.permute.xlu0 %977 }
0x165a   :  { %v980_v19 = vmul.f32 %v3293_v50, %v978_v58 }
0x165c   :  { %v2833_v22 = vpack.c.bf16 %v980_v19, %v980_v19 }
0x165d   :  { %v695_v32 = vpop.permute.xlu0 %694 }
0x165e   :  { %698 = vst.msk [vmem:[#allocation3 + $0x10] sm:$0xf] %vm309_vm2, %v695_v32  ;;  %v1099_v32 = vadd.f32 %v3850_v25, %v3819_v21 }
0x1661   :  { %v889_v56 = vpop.permute.xlu0 %888 }
0x1662   :  { %892 = vst.msk [vmem:[#allocation3 + $0x18] sm:$0xf] %vm309_vm2, %v889_v56 }
0x1695   :  { %v1272_v4 = vpop.f32.mrf.mxu1 }
0x1696   :  { %v1278_v5 = vadd.f32 %v1272_v4, %v1091_v3 }
0x1697   :  { %v3034_v6 = vpop.f32.mrf.mxu1 }
0x1698   :  { %3296 = vtanh.f32 %v1278_v5  ;;  %v2766_v59 = vmul.f32 -1.442695, %v1278_v5 }
0x1699   :  { %v1275_v16 = vpop.f32.mrf.mxu1 }
0x169a   :  { %3298 = vpow2.f32 %v2766_v59 }
0x169b   :  { %v3035_v62 = vpop.f32.mrf.mxu1 }
0x16a5   :  { %v3297_v7 = vpop.eup %3296 }
0x16a6   :  { %1288 = vrot.lane.b32.xlu1 %v3297_v7, %s3512_s2 }
0x16a7   :  { %v3299_v8 = vpop.eup %3298 }
0x16a8   :  { %v1282_v49 = vadd.f32 1.0, %v3299_v8 }
0x16aa   :  { %3300 = vrcp.f32 %v1282_v49 }
0x16b7   :  { %v3301_v11 = vpop.eup %3300 }
0x16b8   :  { %v1286_v14 = vmul.f32 %v3301_v11, %v1201_v38 }
0x1718   :  { %v1289_v12 = vpop.permute.xlu1 %1288 }
0x1719   :  { %v1291_v13 = vmul.f32 %v3301_v11, %v1289_v12 }
0x171b   :  { %1293 = vrot.lane.b32.xlu1 %v1291_v13, %s3512_s2  ;;  %v3208_v13 = vld [vmem:[%s4199_s6 + $0x8] sm:$0xff]  }
0x178d   :  { %v1294_v17 = vpop.permute.xlu1 %1293 }
0x178e   :  { %v1296_v9 = vadd.f32 %v1294_v17, %v1286_v14  ;;  %v3209_v14 = vld [vmem:[%s4199_s6] sm:$0xff]  }
0x1790   :  { %3302 = vtanh.f32 %v1296_v9 }
0x179d   :  { %v3303_v18 = vpop.eup %3302 }
0x179e   :  { %1299 = vrot.lane.b32.xlu1 %v3303_v18, %s3512_s2 }
0x17a2   :  { %791 = vrot.lane.b32.xlu1 %v3752_v40, %s3505_s20 }
0x17a6   :  { %985 = vrot.lane.b32.xlu1 %v2833_v22, %s3505_s20 }
0x1810   :  { %v1300_v24 = vpop.permute.xlu1 %1299 }
0x1811   :  { %v1302_v26 = vmul.f32 %v3301_v11, %v1300_v24 }
0x1813   :  { %v3867_v40 = vpack.c.bf16 %v1302_v26, %v1302_v26 }
0x1814   :  { %v792_v27 = vpop.permute.xlu1 %791 }
0x1815   :  { %795 = vst.msk [vmem:[#allocation3 + $0x14] sm:$0xf] %vm309_vm2, %v792_v27  ;;  %1316 = vrot.lane.b32.xlu0 %v3867_v40, %s3505_s20 }
0x1818   :  { %v986_v10 = vpop.permute.xlu1 %985 }
0x1819   :  { %989 = vst.msk [vmem:[#allocation3 + $0x1c] sm:$0xf] %vm309_vm2, %v986_v10 }
0x181c   :  { %v3202_v63 = vld [vmem:[#allocation3 + $0x10] sm:$0xff]  }
0x181d   :  { %3016 = vmatprep.mubr.msk.bf16.mxu0 %vm131_vm1, %v3202_v63 }
0x1820   :  { %v3203_v28 = vld [vmem:[#allocation3 + $0x18] sm:$0xff]  }
0x1821   :  { %3017 = vmatmul.mubr.msk.bf16.gmra.mxu0 %vm131_vm1, %v3203_v28 }
0x1822   :  { %3040 = vmatprep.mubr.msk.bf16.mxu0 %vm3510_vm0, %v3509_v0 }
0x1887   :  { %v1317_v29 = vpop.permute.xlu0 %1316 }
0x1888   :  { %3041 = vmatmul.mubr.msk.bf16.vlgmr.msra.gmra.mxu0 %vm131_vm1, %v1317_v29 }
0x1889   :  { %3056 = vmatprep.mubr.msk.bf16.mxu0 %vm3510_vm0, %v3509_v0  ;;  %3053 = vmatpush3.bf16.msra.mxu0 %v3208_v13 }
0x188a   :  { %3054 = vmatprep.subr.bf16.mxu0 %v3509_v0 }
0x188d   :  { %3055 = vmatpush3.bf16.msra.mxu0 %v3209_v14 }
0x188e   :  { %3068 = vmatprep.subr.bf16.mxu0 %v3509_v0 }
0x18e1   :  { %v3880_v30 = vpop.f32.mrf.mxu0 }
0x18e3   :  { %v3882_v2 = vpop.f32.mrf.mxu0 }
0x18e4   :  { %v1104_v22 = vadd.f32 %v3819_v21, %v3882_v2 }
0x18e5   :  { %v3884_v31 = vpop.f32.mrf.mxu0 }
0x18e7   :  { %v3886_v33 = vpop.f32.mrf.mxu0 }
0x1948   :  { %v1367_v36 = vpop.f32.mrf.mxu0 }
0x1949   :  { %v1373_v37 = vadd.f32 %v1367_v36, %v1096_v35 }
0x194a   :  { %v3042_v38 = vpop.f32.mrf.mxu0 }
0x194b   :  { %3304 = vtanh.f32 %v1373_v37  ;;  %v2771_v42 = vmul.f32 -1.442695, %v1373_v37 }
0x194c   :  { %v1370_v39 = vpop.f32.mrf.mxu0 }
0x194d   :  { %3306 = vpow2.f32 %v2771_v42  ;;  %v3211_v42 = vld [vmem:[%s4199_s6] sm:$0xff]  }
0x194e   :  { %v3043_v41 = vpop.f32.mrf.mxu0 }
0x1958   :  { %v3305_v34 = vpop.eup %3304 }
0x1959   :  { %1383 = vrot.lane.b32.xlu1 %v3305_v34, %s3512_s2  ;;  %v3210_v34 = vld [vmem:[%s4199_s6 + $0x8] sm:$0xff]  }
0x195a   :  { %v3307_v43 = vpop.eup %3306 }
0x195b   :  { %v1377_v44 = vadd.f32 1.0, %v3307_v43 }
0x195d   :  { %3308 = vrcp.f32 %v1377_v44 }
0x196a   :  { %v3309_v45 = vpop.eup %3308 }
0x196b   :  { %v1381_v15 = vmul.f32 %v3309_v45, %v1296_v9 }
0x19cb   :  { %v1384_v46 = vpop.permute.xlu1 %1383 }
0x19cc   :  { %v1386_v47 = vmul.f32 %v3309_v45, %v1384_v46 }
0x19ce   :  { %1388 = vrot.lane.b32.xlu0 %v1386_v47, %s3512_s2 }
0x1a40   :  { %v1389_v50 = vpop.permute.xlu0 %1388 }
0x1a41   :  { %v1391_v51 = vadd.f32 %v1389_v50, %v1381_v15  ;;  %v1107_v15 = vadd.f32 %v3819_v21, %v3886_v33 }
0x1a43   :  { %3310 = vtanh.f32 %v1391_v51 }
0x1a50   :  { %v3311_v54 = vpop.eup %3310 }
0x1a51   :  { %1394 = vrot.lane.b32.xlu1 %v3311_v54, %s3512_s2 }
0x1ac3   :  { %v1395_v61 = vpop.permute.xlu1 %1394 }
0x1ac4   :  { %v1397_v55 = vmul.f32 %v3309_v45, %v1395_v61 }
0x1ac6   :  { %v3901_v57 = vpack.c.bf16 %v1397_v55, %v1397_v55 }
0x1ac8   :  { %1411 = vrot.lane.b32.xlu0 %v3901_v57, %s3505_s20 }
0x1b3a   :  { %v1412_v58 = vpop.permute.xlu0 %1411 }
0x1b3b   :  { %3049 = vmatmul.mubr.msk.bf16.vlgmr.msra.gmra.mxu1 %vm131_vm1, %v1412_v58 }
0x1b3c   :  { %3064 = vmatprep.mubr.msk.bf16.mxu1 %vm3510_vm0, %v3509_v0  ;;  %3061 = vmatpush3.bf16.msra.mxu1 %v3210_v34  ;;  %v3999_v34 = vld [vmem:[#allocation9 + $0x8] sm:$0xff]  }
0x1b3d   :  { %3062 = vmatprep.subr.bf16.mxu1 %v3509_v0 }
0x1b40   :  { %3063 = vmatpush3.bf16.msra.mxu1 %v3211_v42  ;;  %v4004_v42 = vld [vmem:[#allocation9] sm:$0xff]  }
0x1b41   :  { %3076 = vmatprep.subr.bf16.mxu1 %v3509_v0 }
0x1bfb   :  { %v1462_v56 = vpop.f32.mrf.mxu1 }
0x1bfc   :  { %v1468_v60 = vadd.f32 %v1462_v56, %v1099_v32 }
0x1bfd   :  { %v3050_v3 = vpop.f32.mrf.mxu1 }
0x1bfe   :  { %3312 = vtanh.f32 %v1468_v60  ;;  %v2776_v16 = vmul.f32 -1.442695, %v1468_v60 }
0x1bff   :  { %v1465_v4 = vpop.f32.mrf.mxu1 }
0x1c00   :  { %3314 = vpow2.f32 %v2776_v16  ;;  %v3213_v16 = vld [vmem:[%s4199_s6] sm:$0xff]  }
0x1c01   :  { %v3051_v5 = vpop.f32.mrf.mxu1 }
0x1c0b   :  { %v3313_v6 = vpop.eup %3312 }
0x1c0c   :  { %1478 = vrot.lane.b32.xlu1 %v3313_v6, %s3512_s2  ;;  %v3212_v6 = vld [vmem:[%s4199_s6 + $0x8] sm:$0xff]  }
0x1c0d   :  { %v3315_v62 = vpop.eup %3314 }
0x1c0e   :  { %v1472_v7 = vadd.f32 1.0, %v3315_v62 }
0x1c10   :  { %3316 = vrcp.f32 %v1472_v7 }
0x1c1d   :  { %v3317_v59 = vpop.eup %3316 }
0x1c1e   :  { %v1476_v25 = vmul.f32 %v3317_v59, %v1391_v51 }
0x1c7e   :  { %v1479_v8 = vpop.permute.xlu1 %1478 }
0x1c7f   :  { %v1481_v49 = vmul.f32 %v3317_v59, %v1479_v8 }
0x1c81   :  { %1483 = vrot.lane.b32.xlu0 %v1481_v49, %s3512_s2 }
0x1cf3   :  { %v1484_v11 = vpop.permute.xlu0 %1483 }
0x1cf4   :  { %v1486_v12 = vadd.f32 %v1484_v11, %v1476_v25  ;;  %v1112_v25 = vadd.f32 %v3880_v30, %v3819_v21 }
0x1cf6   :  { %3318 = vtanh.f32 %v1486_v12 }
0x1d03   :  { %v3319_v17 = vpop.eup %3318 }
0x1d04   :  { %1489 = vrot.lane.b32.xlu1 %v3319_v17, %s3512_s2 }
0x1d76   :  { %v1490_v9 = vpop.permute.xlu1 %1489 }
0x1d77   :  { %v1492_v18 = vmul.f32 %v3317_v59, %v1490_v9 }
0x1d79   :  { %v3921_v19 = vpack.c.bf16 %v1492_v18, %v1492_v18 }
0x1d7b   :  { %1506 = vrot.lane.b32.xlu0 %v3921_v19, %s3505_s20 }
0x1ded   :  { %v1507_v20 = vpop.permute.xlu0 %1506 }
0x1dee   :  { %3057 = vmatmul.mubr.msk.bf16.vlgmr.msra.gmra.mxu0 %vm131_vm1, %v1507_v20 }
0x1def   :  { %3072 = vmatprep.mubr.msk.bf16.mxu0 %vm3510_vm0, %v3509_v0  ;;  %3069 = vmatpush3.bf16.msra.mxu0 %v3212_v6 }
0x1df0   :  { %3070 = vmatprep.subr.bf16.mxu0 %v3509_v0 }
0x1df3   :  { %3071 = vmatpush3.bf16.msra.mxu0 %v3213_v16 }
0x1eae   :  { %v1557_v23 = vpop.f32.mrf.mxu0 }
0x1eaf   :  { %v1563_v24 = vadd.f32 %v1557_v23, %v1104_v22 }
0x1eb0   :  { %v3058_v26 = vpop.f32.mrf.mxu0 }
0x1eb1   :  { %3320 = vtanh.f32 %v1563_v24  ;;  %v2781_v28 = vmul.f32 -1.442695, %v1563_v24 }
0x1eb2   :  { %v1560_v27 = vpop.f32.mrf.mxu0 }
0x1eb3   :  { %3322 = vpow2.f32 %v2781_v28 }
0x1eb4   :  { %v3059_v10 = vpop.f32.mrf.mxu0 }
0x1ebe   :  { %v3321_v63 = vpop.eup %3320 }
0x1ebf   :  { %1573 = vrot.lane.b32.xlu1 %v3321_v63, %s3512_s2 }
0x1ec0   :  { %v3323_v29 = vpop.eup %3322 }
0x1ec1   :  { %v1567_v35 = vadd.f32 1.0, %v3323_v29  ;;  %v3214_v29 = vld [vmem:[#allocation7 + $0x8] sm:$0xff]  }
0x1ec2   :  { %3084 = vmatprep.subr.bf16.mxu0 %v3214_v29 }
0x1ec3   :  { %3324 = vrcp.f32 %v1567_v35  ;;  %v3215_v35 = vld [vmem:[#allocation7] sm:$0xff]  }
0x1ed0   :  { %v3325_v36 = vpop.eup %3324 }
0x1ed1   :  { %v1571_v2 = vmul.f32 %v3325_v36, %v1486_v12 }
0x1f31   :  { %v1574_v37 = vpop.permute.xlu1 %1573 }
0x1f32   :  { %v1576_v38 = vmul.f32 %v3325_v36, %v1574_v37 }
0x1f34   :  { %1578 = vrot.lane.b32.xlu0 %v1576_v38, %s3512_s2 }
0x1fa6   :  { %v1579_v39 = vpop.permute.xlu0 %1578 }
0x1fa7   :  { %v1581_v41 = vadd.f32 %v1579_v39, %v1571_v2 }
0x1fa9   :  { %3326 = vtanh.f32 %v1581_v41 }
0x1fb6   :  { %v3327_v43 = vpop.eup %3326 }
0x1fb7   :  { %1584 = vrot.lane.b32.xlu1 %v3327_v43, %s3512_s2 }
0x2029   :  { %v1585_v44 = vpop.permute.xlu1 %1584 }
0x202a   :  { %v1587_v45 = vmul.f32 %v3325_v36, %v1585_v44  ;;  %v3219_v36 = vld [vmem:[%s4199_s6] sm:$0xff]   ;;  %v1115_v44 = vadd.f32 %v3884_v31, %v3819_v21 }
0x202c   :  { %v3941_v46 = vpack.c.bf16 %v1587_v45, %v1587_v45 }
0x202e   :  { %1601 = vrot.lane.b32.xlu0 %v3941_v46, %s3505_s20 }
0x20a0   :  { %v1602_v47 = vpop.permute.xlu0 %1601 }
0x20a1   :  { %3065 = vmatmul.mubr.msk.bf16.vlgmr.msra.gmra.mxu1 %vm131_vm1, %v1602_v47 }
0x20a2   :  { %3080 = vmatprep.mubr.msk.bf16.mxu1 %vm3510_vm0, %v3509_v0 }
0x2161   :  { %v1652_v50 = vpop.f32.mrf.mxu1 }
0x2162   :  { %v1658_v51 = vadd.f32 %v1652_v50, %v1107_v15 }
0x2163   :  { %v3066_v52 = vpop.f32.mrf.mxu1 }
0x2164   :  { %3328 = vtanh.f32 %v1658_v51  ;;  %v2786_v55 = vmul.f32 -1.442695, %v1658_v51 }
0x2165   :  { %v1655_v53 = vpop.f32.mrf.mxu1 }
0x2166   :  { %3330 = vpow2.f32 %v2786_v55  ;;  %v4029_v53 = vld [vmem:[%s4203_s10] ss:$0 sm:$0xff] }
0x2167   :  { %v3067_v54 = vpop.f32.mrf.mxu1 }
0x2171   :  { %v3329_v61 = vpop.eup %3328 }
0x2172   :  { %1668 = vrot.lane.b32.xlu1 %v3329_v61, %s3512_s2 }
0x2173   :  { %v3331_v58 = vpop.eup %3330 }
0x2174   :  { %v1662_v32 = vadd.f32 1.0, %v3331_v58 }
0x2176   :  { %3332 = vrcp.f32 %v1662_v32 }
0x2183   :  { %v3333_v56 = vpop.eup %3332 }
0x2184   :  { %v1666_v33 = vmul.f32 %v3333_v56, %v1581_v41 }
0x21e4   :  { %v1669_v60 = vpop.permute.xlu1 %1668 }
0x21e5   :  { %v1671_v3 = vmul.f32 %v3333_v56, %v1669_v60 }
0x21e7   :  { %1673 = vrot.lane.b32.xlu0 %v1671_v3, %s3512_s2 }
0x2259   :  { %v1674_v4 = vpop.permute.xlu0 %1673 }
0x225a   :  { %v1676_v5 = vadd.f32 %v1674_v4, %v1666_v33 }
0x225c   :  { %3334 = vtanh.f32 %v1676_v5 }
0x2269   :  { %v3335_v62 = vpop.eup %3334 }
0x226a   :  { %1679 = vrot.lane.b32.xlu1 %v3335_v62, %s3512_s2 }
0x22dc   :  { %v1680_v7 = vpop.permute.xlu1 %1679 }
0x22dd   :  { %v1682_v59 = vmul.f32 %v3333_v56, %v1680_v7 }
0x22df   :  { %v3960_v8 = vpack.c.bf16 %v1682_v59, %v1682_v59 }
0x22e1   :  { %1696 = vrot.lane.b32.xlu0 %v3960_v8, %s3505_s20 }
0x2353   :  { %v1697_v49 = vpop.permute.xlu0 %1696 }
0x2354   :  { %3073 = vmatmul.mubr.msk.bf16.vlgmr.msra.gmra.mxu0 %vm131_vm1, %v1697_v49 }
0x2355   :  { %3085 = vmatpush3.bf16.msra.mxu0 %v3214_v29 }
0x2356   :  { %3086 = vmatprep.subr.bf16.mxu0 %v3215_v35 }
0x2359   :  { %3087 = vmatpush3.bf16.msra.mxu0 %v3215_v35 }
0x235a   :  { %3112 = vmatprep.subr.bf16.mxu0 %v3509_v0 }
0x2414   :  { %v1747_v11 = vpop.f32.mrf.mxu0 }
0x2415   :  { %v1753_v12 = vadd.f32 %v1747_v11, %v1112_v25 }
0x2416   :  { %v3074_v13 = vpop.f32.mrf.mxu0 }
0x2417   :  { %3336 = vtanh.f32 %v1753_v12  ;;  %v2791_v18 = vmul.f32 -1.442695, %v1753_v12 }
0x2418   :  { %v1750_v14 = vpop.f32.mrf.mxu0 }
0x2419   :  { %3338 = vpow2.f32 %v2791_v18 }
0x241a   :  { %v3075_v17 = vpop.f32.mrf.mxu0 }
0x2424   :  { %v3337_v9 = vpop.eup %3336 }
0x2425   :  { %1763 = vrot.lane.b32.xlu1 %v3337_v9, %s3512_s2 }
0x2426   :  { %v3339_v20 = vpop.eup %3338 }
0x2427   :  { %v1757_v22 = vadd.f32 1.0, %v3339_v20 }
0x2429   :  { %3340 = vrcp.f32 %v1757_v22 }
0x2436   :  { %v3341_v23 = vpop.eup %3340 }
0x2437   :  { %v1761_v30 = vmul.f32 %v3341_v23, %v1676_v5 }
0x2497   :  { %v1764_v24 = vpop.permute.xlu1 %1763 }
0x2498   :  { %v1766_v26 = vmul.f32 %v3341_v23, %v1764_v24 }
0x249a   :  { %1768 = vrot.lane.b32.xlu0 %v1766_v26, %s3512_s2 }
0x249e   :  { %1212 = vrot.lane.b32.xlu0 %v3834_v48, %s3505_s20 }
0x24a2   :  { %1402 = vrot.lane.b32.xlu0 %v3901_v57, %s3505_s20  ;;  %v3218_v57 = vld [vmem:[%s4199_s6 + $0x8] sm:$0xff]  }
0x24a3   :  { %3077 = vmatpush3.bf16.msra.mxu1 %v3218_v57 }
0x24a4   :  { %3078 = vmatprep.subr.bf16.mxu1 %v3509_v0 }
0x24a7   :  { %3079 = vmatpush3.bf16.msra.mxu1 %v3219_v36 }
0x24a8   :  { %3096 = vmatprep.subr.bf16.mxu1 %v3509_v0 }
0x250c   :  { %v1769_v27 = vpop.permute.xlu0 %1768 }
0x250d   :  { %v3973_v10 = vadd.f32 %v1769_v27, %v1761_v30 }
0x250f   :  { %3342 = vtanh.f32 %v3973_v10 }
0x2510   :  { %v1213_v63 = vpop.permute.xlu0 %1212 }
0x2511   :  { %1215 = vst.msk [vmem:[#allocation3] sm:$0xf] %vm309_vm2, %v1213_v63 }
0x2514   :  { %v1403_v28 = vpop.permute.xlu0 %1402 }
0x2515   :  { %1405 = vst.msk [vmem:[#allocation3 + $0x8] sm:$0xf] %vm309_vm2, %v1403_v28 }
0x251c   :  { %v3343_v48 = vpop.eup %3342 }
0x251d   :  { %1774 = vrot.lane.b32.xlu1 %v3343_v48, %s3512_s2 }
0x2521   :  { %1307 = vrot.lane.b32.xlu1 %v3867_v40, %s3505_s20 }
0x2525   :  { %1497 = vrot.lane.b32.xlu1 %v3921_v19, %s3505_s20 }
0x258f   :  { %v1775_v37 = vpop.permute.xlu1 %1774 }
0x2590   :  { %v1777_v38 = vmul.f32 %v3341_v23, %v1775_v37 }
0x2592   :  { %v3992_v40 = vpack.c.bf16 %v1777_v38, %v1777_v38 }
0x2593   :  { %v1308_v2 = vpop.permute.xlu1 %1307 }
0x2594   :  { %1310 = vst.msk [vmem:[#allocation3 + $0x4] sm:$0xf] %vm309_vm2, %v1308_v2  ;;  %1791 = vrot.lane.b32.xlu0 %v3992_v40, %s3505_s20 }
0x2597   :  { %v1498_v39 = vpop.permute.xlu1 %1497 }
0x2598   :  { %1500 = vst.msk [vmem:[#allocation3 + $0xc] sm:$0xf] %vm309_vm2, %v1498_v39 }
0x259b   :  { %v3216_v41 = vld [vmem:[#allocation3] sm:$0xff]  }
0x259c   :  { %3088 = vmatprep.mubr.msk.bf16.mxu0 %vm131_vm1, %v3216_v41 }
0x259f   :  { %v3217_v19 = vld [vmem:[#allocation3 + $0x8] sm:$0xff]  }
0x25a0   :  { %3089 = vmatmul.mubr.msk.bf16.vlgmr.msra.gmra.mxu0 %vm131_vm1, %v3217_v19 }
0x25a1   :  { %3113 = vmatpush3.bf16.msra.mxu0 %v3999_v34 }
0x25a2   :  { %3114 = vmatprep.subr.bf16.mxu0 %v3509_v0 }
0x25a5   :  { %3115 = vmatpush3.bf16.msra.mxu0 %v4004_v42 }
0x25a6   :  { %3128 = vmatprep.subr.bf16.mxu0 %v3509_v0 }
0x2606   :  { %v1792_v43 = vpop.permute.xlu0 %1791 }
0x2607   :  { %3081 = vmatmul.mubr.msk.bf16.vlgmr.msra.gmra.mxu1 %vm131_vm1, %v1792_v43 }
0x2608   :  { %3097 = vmatpush3.bf16.msra.mxu1 %v3999_v34  ;;  %3100 = vmatprep.mubr.msk.bf16.mxu1 %vm3510_vm0, %v3509_v0 }
0x2609   :  { %3098 = vmatprep.subr.bf16.mxu1 %v3509_v0 }
0x260c   :  { %3099 = vmatpush3.bf16.msra.mxu1 %v4004_v42 }
0x260d   :  { %3104 = vmatprep.subr.bf16.mxu1 %v3509_v0 }
0x260f   :  { %3101 = vmatmul.mubr.bf16.vlgmr.msra.gmra.mxu1 %v3511_v1 }
0x2610   :  { %3105 = vmatpush3.bf16.msra.mxu1 %v3999_v34  ;;  %3108 = vmatprep.mubr.msk.bf16.mxu1 %vm3510_vm0, %v3509_v0 }
0x2611   :  { %3106 = vmatprep.subr.bf16.mxu1 %v3509_v0 }
0x2614   :  { %3107 = vmatpush3.bf16.msra.mxu1 %v4004_v42 }
0x2615   :  { %3120 = vmatprep.subr.bf16.mxu1 %v3509_v0 }
0x2660   :  { %v4024_v45 = vpop.f32.mrf.mxu0 }
0x2662   :  { %v1978_v51 = vpop.f32.mrf.mxu0 }
0x2663   :  { %v1979_v61 = vadd.f32 %v4029_v53, %v1978_v51 }
0x2664   :  { %v4057_v28 = vpop.f32.mrf.mxu0 }
0x2666   :  { %v1981_v29 = vpop.f32.mrf.mxu0 }
0x2667   :  { %v1982_v35 = vadd.f32 %v4029_v53, %v1981_v29 }
0x26c7   :  { %v1842_v47 = vpop.f32.mrf.mxu1 }
0x26c8   :  { %v1848_v15 = vadd.f32 %v1842_v47, %v1115_v44 }
0x26c9   :  { %v3082_v50 = vpop.f32.mrf.mxu1 }
0x26ca   :  { %v2796_v25 = vmul.f32 -1.442695, %v1848_v15 }
0x26cb   :  { %v1845_v52 = vpop.f32.mrf.mxu1 }
0x26cd   :  { %v3083_v54 = vpop.f32.mrf.mxu1 }
0x26cf   :  { %v2068_v55 = vpop.f32.mrf.mxu1 }
0x26d0   :  { %v2074_v58 = vadd.f32 %v2068_v55, %v1979_v61 }
0x26d1   :  { %v3102_v32 = vpop.f32.mrf.mxu1 }
0x26d2   :  { %3344 = vtanh.f32 %v2074_v58  ;;  %v2811_v60 = vmul.f32 -1.442695, %v2074_v58 }
0x26d3   :  { %v2071_v21 = vpop.f32.mrf.mxu1 }
0x26d4   :  { %3346 = vpow2.f32 %v2811_v60 }
0x26d5   :  { %v3103_v31 = vpop.f32.mrf.mxu1 }
0x26df   :  { %v3345_v56 = vpop.eup %3344 }
0x26e0   :  { %2084 = vrot.lane.b32.xlu1 %v3345_v56, %s3512_s2 }
0x26e1   :  { %v3347_v3 = vpop.eup %3346 }
0x26e2   :  { %v2078_v33 = vadd.f32 1.0, %v3347_v3 }
0x26e4   :  { %3348 = vrcp.f32 %v2078_v33 }
0x26f1   :  { %v3349_v4 = vpop.eup %3348 }
0x26f2   :  { %v2082_v16 = vmul.f32 0.0, %v3349_v4 }
0x2752   :  { %v2085_v5 = vpop.permute.xlu1 %2084 }
0x2753   :  { %v2087_v6 = vmul.f32 %v3349_v4, %v2085_v5 }
0x2755   :  { %2089 = vrot.lane.b32.xlu0 %v2087_v6, %s3512_s2 }
0x27c7   :  { %v2090_v62 = vpop.permute.xlu0 %2089 }
0x27c8   :  { %v2092_v7 = vadd.f32 %v2090_v62, %v2082_v16 }
0x27ca   :  { %3350 = vtanh.f32 %v2092_v7 }
0x27cb   :  { %3352 = vtanh.f32 %v1848_v15 }
0x27cc   :  { %3354 = vpow2.f32 %v2796_v25 }
0x27d7   :  { %v3351_v59 = vpop.eup %3350 }
0x27d8   :  { %2095 = vrot.lane.b32.xlu1 %v3351_v59, %s3512_s2  ;;  %v3353_v49 = vpop.eup %3352 }
0x27d9   :  { %v3355_v11 = vpop.eup %3354 }
0x27da   :  { %v1852_v12 = vadd.f32 1.0, %v3355_v11 }
0x27dc   :  { %1858 = vrot.lane.b32.xlu1 %v3353_v49, %s3512_s2  ;;  %3356 = vrcp.f32 %v1852_v12 }
0x27e9   :  { %v3357_v9 = vpop.eup %3356 }
0x27ea   :  { %v1856_v23 = vmul.f32 %v3357_v9, %v3973_v10 }
0x284a   :  { %v2096_v13 = vpop.permute.xlu1 %2095 }
0x284b   :  { %v4036_v14 = vmul.f32 %v3349_v4, %v2096_v13  ;;  %v1987_v4 = vadd.f32 %v4024_v45, %v4029_v53 }
0x284d   :  { %v2107_v17 = vpack.c.bf16 %v4036_v14, %v4036_v14 }
0x284e   :  { %v1859_v18 = vpop.permute.xlu1 %1858 }
0x284f   :  { %v1861_v20 = vmul.f32 %v3357_v9, %v1859_v18  ;;  %2109 = vrot.lane.b32.xlu0 %v2107_v17, %s3505_s20 }
0x2851   :  { %1863 = vrot.lane.b32.xlu1 %v1861_v20, %s3512_s2 }
0x28c1   :  { %v2110_v22 = vpop.permute.xlu0 %2109 }
0x28c2   :  { %3109 = vmatmul.mubr.msk.bf16.vlgmr.msra.gmra.mxu1 %vm131_vm1, %v2110_v22 }
0x28c3   :  { %v1864_v24 = vpop.permute.xlu1 %1863  ;;  %3121 = vmatpush3.bf16.msra.mxu1 %v3999_v34  ;;  %3124 = vmatprep.mubr.msk.bf16.mxu1 %vm3510_vm0, %v3509_v0 }
0x28c4   :  { %v1866_v26 = vadd.f32 %v1864_v24, %v1856_v23  ;;  %3122 = vmatprep.subr.bf16.mxu1 %v3509_v0 }
0x28c6   :  { %3358 = vtanh.f32 %v1866_v26 }
0x28c7   :  { %3123 = vmatpush3.bf16.msra.mxu1 %v4004_v42 }
0x28c8   :  { %3136 = vmatprep.subr.bf16.mxu1 %v3509_v0 }
0x28d3   :  { %v3359_v30 = vpop.eup %3358 }
0x28d4   :  { %1869 = vrot.lane.b32.xlu1 %v3359_v30, %s3512_s2  ;;  %v1990_v30 = vadd.f32 %v4057_v28, %v4029_v53 }
0x28d8   :  { %1592 = vrot.lane.b32.xlu1 %v3941_v46, %s3505_s20 }
0x28dc   :  { %1782 = vrot.lane.b32.xlu1 %v3992_v40, %s3505_s20 }
0x2946   :  { %v1870_v27 = vpop.permute.xlu1 %1869 }
0x2947   :  { %v1872_v51 = vmul.f32 %v3357_v9, %v1870_v27 }
0x2949   :  { %v2841_v52 = vpack.c.bf16 %v1872_v51, %v1872_v51 }
0x294a   :  { %v1593_v10 = vpop.permute.xlu1 %1592 }
0x294b   :  { %1595 = vst.msk [vmem:[#allocation3 + $0x10] sm:$0xf] %vm309_vm2, %v1593_v10 }
0x294e   :  { %v1783_v63 = vpop.permute.xlu1 %1782 }
0x294f   :  { %1785 = vst.msk [vmem:[#allocation3 + $0x18] sm:$0xf] %vm309_vm2, %v1783_v63 }
0x2982   :  { %v2148_v48 = vpop.f32.mrf.mxu1 }
0x2983   :  { %v2154_v57 = vadd.f32 %v2148_v48, %v1982_v35 }
0x2984   :  { %v3110_v36 = vpop.f32.mrf.mxu1 }
0x2985   :  { %3360 = vtanh.f32 %v2154_v57  ;;  %v2813_v40 = vmul.f32 -1.442695, %v2154_v57 }
0x2986   :  { %v2151_v46 = vpop.f32.mrf.mxu1 }
0x2987   :  { %3362 = vpow2.f32 %v2813_v40 }
0x2988   :  { %v3111_v37 = vpop.f32.mrf.mxu1 }
0x2992   :  { %v3361_v38 = vpop.eup %3360 }
0x2993   :  { %2164 = vrot.lane.b32.xlu0 %v3361_v38, %s3512_s2 }
0x2994   :  { %v3363_v2 = vpop.eup %3362 }
0x2995   :  { %v2158_v39 = vadd.f32 1.0, %v3363_v2 }
0x2997   :  { %3364 = vrcp.f32 %v2158_v39 }
0x29a4   :  { %v3365_v41 = vpop.eup %3364 }
0x29a5   :  { %v2162_v44 = vmul.f32 %v3365_v41, %v2092_v7 }
0x2a05   :  { %v2165_v19 = vpop.permute.xlu0 %2164 }
0x2a06   :  { %v2167_v43 = vmul.f32 %v3365_v41, %v2165_v19 }
0x2a08   :  { %2169 = vrot.lane.b32.xlu0 %v2167_v43, %s3512_s2 }
0x2a7a   :  { %v2170_v47 = vpop.permute.xlu0 %2169 }
0x2a7b   :  { %v2172_v15 = vadd.f32 %v2170_v47, %v2162_v44 }
0x2a7d   :  { %3366 = vtanh.f32 %v2172_v15 }
0x2a8a   :  { %v3367_v50 = vpop.eup %3366 }
0x2a8b   :  { %2175 = vrot.lane.b32.xlu0 %v3367_v50, %s3512_s2 }
0x2a8f   :  { %1687 = vrot.lane.b32.xlu0 %v3960_v8, %s3505_s20 }
0x2a93   :  { %1877 = vrot.lane.b32.xlu0 %v2841_v52, %s3505_s20 }
0x2afd   :  { %v2176_v54 = vpop.permute.xlu0 %2175 }
0x2afe   :  { %v4066_v61 = vmul.f32 %v3365_v41, %v2176_v54 }
0x2b00   :  { %v2187_v55 = vpack.c.bf16 %v4066_v61, %v4066_v61 }
0x2b01   :  { %v1688_v58 = vpop.permute.xlu0 %1687 }
0x2b02   :  { %1690 = vst.msk [vmem:[#allocation3 + $0x14] sm:$0xf] %vm309_vm2, %v1688_v58  ;;  %2189 = vrot.lane.b32.xlu1 %v2187_v55, %s3505_s20 }
0x2b05   :  { %v1878_v32 = vpop.permute.xlu0 %1877 }
0x2b06   :  { %1880 = vst.msk [vmem:[#allocation3 + $0x1c] sm:$0xf] %vm309_vm2, %v1878_v32 }
0x2b09   :  { %v3222_v21 = vld [vmem:[#allocation3 + $0x10] sm:$0xff]  }
0x2b0a   :  { %3092 = vmatprep.mubr.msk.bf16.mxu0 %vm131_vm1, %v3222_v21 }
0x2b0d   :  { %v3223_v8 = vld [vmem:[#allocation3 + $0x18] sm:$0xff]  }
0x2b0e   :  { %3093 = vmatmul.mubr.msk.bf16.gmra.mxu0 %vm131_vm1, %v3223_v8 }
0x2b0f   :  { %3116 = vmatprep.mubr.msk.bf16.mxu0 %vm3510_vm0, %v3509_v0 }
0x2b74   :  { %v2190_v31 = vpop.permute.xlu1 %2189 }
0x2b75   :  { %3117 = vmatmul.mubr.msk.bf16.vlgmr.msra.gmra.mxu0 %vm131_vm1, %v2190_v31 }
0x2b76   :  { %3129 = vmatpush3.bf16.msra.mxu0 %v3999_v34  ;;  %3132 = vmatprep.mubr.msk.bf16.mxu0 %vm3510_vm0, %v3509_v0 }
0x2b77   :  { %3130 = vmatprep.subr.bf16.mxu0 %v3509_v0 }
0x2b7a   :  { %3131 = vmatpush3.bf16.msra.mxu0 %v4004_v42 }
0x2b7b   :  { %3144 = vmatprep.subr.bf16.mxu0 %v3509_v0 }
0x2bce   :  { %v4084_v56 = vpop.f32.mrf.mxu0 }
0x2bd0   :  { %v4086_v60 = vpop.f32.mrf.mxu0 }
0x2bd2   :  { %v4088_v3 = vpop.f32.mrf.mxu0 }
0x2bd4   :  { %v4090_v33 = vpop.f32.mrf.mxu0 }
0x2c35   :  { %v2228_v5 = vpop.f32.mrf.mxu0 }
0x2c36   :  { %v2234_v6 = vadd.f32 %v2228_v5, %v1987_v4 }
0x2c37   :  { %v3118_v16 = vpop.f32.mrf.mxu0 }
0x2c38   :  { %3368 = vtanh.f32 %v2234_v6  ;;  %v2815_v49 = vmul.f32 -1.442695, %v2234_v6 }
0x2c39   :  { %v2231_v62 = vpop.f32.mrf.mxu0 }
0x2c3a   :  { %3370 = vpow2.f32 %v2815_v49 }
0x2c3b   :  { %v3119_v7 = vpop.f32.mrf.mxu0 }
0x2c45   :  { %v3369_v59 = vpop.eup %3368 }
0x2c46   :  { %2244 = vrot.lane.b32.xlu0 %v3369_v59, %s3512_s2 }
0x2c47   :  { %v3371_v25 = vpop.eup %3370 }
0x2c48   :  { %v2238_v11 = vadd.f32 1.0, %v3371_v25 }
0x2c4a   :  { %3372 = vrcp.f32 %v2238_v11  ;;  %v1998_v11 = vadd.f32 %v4029_v53, %v4090_v33 }
0x2c57   :  { %v3373_v12 = vpop.eup %3372 }
0x2c58   :  { %v2242_v45 = vmul.f32 %v3373_v12, %v2172_v15  ;;  %v1995_v15 = vadd.f32 %v4029_v53, %v4086_v60 }
0x2cb8   :  { %v2245_v13 = vpop.permute.xlu0 %2244 }
0x2cb9   :  { %v2247_v17 = vmul.f32 %v3373_v12, %v2245_v13 }
0x2cbb   :  { %2249 = vrot.lane.b32.xlu1 %v2247_v17, %s3512_s2 }
0x2d2d   :  { %v2250_v9 = vpop.permute.xlu1 %2249 }
0x2d2e   :  { %v2252_v18 = vadd.f32 %v2250_v9, %v2242_v45 }
0x2d30   :  { %3374 = vtanh.f32 %v2252_v18 }
0x2d3d   :  { %v3375_v20 = vpop.eup %3374 }
0x2d3e   :  { %2255 = vrot.lane.b32.xlu0 %v3375_v20, %s3512_s2 }
0x2db0   :  { %v2256_v22 = vpop.permute.xlu0 %2255 }
0x2db1   :  { %v4097_v23 = vmul.f32 %v3373_v12, %v2256_v22 }
0x2db3   :  { %v2267_v24 = vpack.c.bf16 %v4097_v23, %v4097_v23 }
0x2db5   :  { %2269 = vrot.lane.b32.xlu1 %v2267_v24, %s3505_s20 }
0x2e27   :  { %v2270_v26 = vpop.permute.xlu1 %2269 }
0x2e28   :  { %3125 = vmatmul.mubr.msk.bf16.vlgmr.msra.gmra.mxu1 %vm131_vm1, %v2270_v26 }
0x2e29   :  { %3137 = vmatpush3.bf16.msra.mxu1 %v3999_v34  ;;  %3140 = vmatprep.mubr.msk.bf16.mxu1 %vm3510_vm0, %v3509_v0 }
0x2e2a   :  { %3138 = vmatprep.subr.bf16.mxu1 %v3509_v0 }
0x2e2d   :  { %3139 = vmatpush3.bf16.msra.mxu1 %v4004_v42 }
0x2e2e   :  { %3152 = vmatprep.subr.bf16.mxu1 %v3509_v0 }
0x2ee8   :  { %v2308_v27 = vpop.f32.mrf.mxu1 }
0x2ee9   :  { %v2314_v10 = vadd.f32 %v2308_v27, %v1990_v30 }
0x2eea   :  { %v3126_v63 = vpop.f32.mrf.mxu1 }
0x2eeb   :  { %3376 = vtanh.f32 %v2314_v10  ;;  %v2817_v57 = vmul.f32 -1.442695, %v2314_v10 }
0x2eec   :  { %v2311_v29 = vpop.f32.mrf.mxu1 }
0x2eed   :  { %3378 = vpow2.f32 %v2817_v57 }
0x2eee   :  { %v3127_v35 = vpop.f32.mrf.mxu1 }
0x2ef8   :  { %v3377_v48 = vpop.eup %3376 }
0x2ef9   :  { %2324 = vrot.lane.b32.xlu0 %v3377_v48, %s3512_s2  ;;  %v2003_v48 = vadd.f32 %v4084_v56, %v4029_v53 }
0x2efa   :  { %v3379_v36 = vpop.eup %3378 }
0x2efb   :  { %v2318_v46 = vadd.f32 1.0, %v3379_v36 }
0x2efd   :  { %3380 = vrcp.f32 %v2318_v46 }
0x2f0a   :  { %v3381_v37 = vpop.eup %3380 }
0x2f0b   :  { %v2322_v28 = vmul.f32 %v3381_v37, %v2252_v18 }
0x2f6b   :  { %v2325_v38 = vpop.permute.xlu0 %2324 }
0x2f6c   :  { %v2327_v40 = vmul.f32 %v3381_v37, %v2325_v38 }
0x2f6e   :  { %2329 = vrot.lane.b32.xlu1 %v2327_v40, %s3512_s2 }
0x2fe0   :  { %v2330_v2 = vpop.permute.xlu1 %2329 }
0x2fe1   :  { %v2332_v39 = vadd.f32 %v2330_v2, %v2322_v28 }
0x2fe3   :  { %3382 = vtanh.f32 %v2332_v39 }
0x2ff0   :  { %v3383_v41 = vpop.eup %3382 }
0x2ff1   :  { %2335 = vrot.lane.b32.xlu0 %v3383_v41, %s3512_s2 }
0x3063   :  { %v2336_v19 = vpop.permute.xlu0 %2335 }
0x3064   :  { %v4114_v43 = vmul.f32 %v3381_v37, %v2336_v19 }
0x3066   :  { %v2347_v44 = vpack.c.bf16 %v4114_v43, %v4114_v43 }
0x3068   :  { %2349 = vrot.lane.b32.xlu1 %v2347_v44, %s3505_s20 }
0x30da   :  { %v2350_v47 = vpop.permute.xlu1 %2349 }
0x30db   :  { %3133 = vmatmul.mubr.msk.bf16.vlgmr.msra.gmra.mxu0 %vm131_vm1, %v2350_v47 }
0x30dc   :  { %3145 = vmatpush3.bf16.msra.mxu0 %v3999_v34  ;;  %3148 = vmatprep.mubr.msk.bf16.mxu0 %vm3510_vm0, %v3509_v0 }
0x30dd   :  { %3146 = vmatprep.subr.bf16.mxu0 %v3509_v0 }
0x30e0   :  { %3147 = vmatpush3.bf16.msra.mxu0 %v4004_v42 }
0x319b   :  { %v2388_v50 = vpop.f32.mrf.mxu0 }
0x319c   :  { %v2394_v51 = vadd.f32 %v2388_v50, %v1995_v15 }
0x319d   :  { %v3134_v52 = vpop.f32.mrf.mxu0 }
0x319e   :  { %3384 = vtanh.f32 %v2394_v51  ;;  %v2819_v32 = vmul.f32 -1.442695, %v2394_v51 }
0x319f   :  { %v2391_v54 = vpop.f32.mrf.mxu0 }
0x31a0   :  { %3386 = vpow2.f32 %v2819_v32 }
0x31a1   :  { %v3135_v55 = vpop.f32.mrf.mxu0 }
0x31ab   :  { %v3385_v58 = vpop.eup %3384 }
0x31ac   :  { %2404 = vrot.lane.b32.xlu0 %v3385_v58, %s3512_s2  ;;  %v2006_v58 = vadd.f32 %v4088_v3, %v4029_v53 }
0x31ad   :  { %v3387_v21 = vpop.eup %3386 }
0x31ae   :  { %v2398_v8 = vadd.f32 1.0, %v3387_v21 }
0x31b0   :  { %3388 = vrcp.f32 %v2398_v8 }
0x31bd   :  { %v3389_v31 = vpop.eup %3388 }
0x31be   :  { %v2402_v60 = vmul.f32 %v3389_v31, %v2332_v39 }
0x321e   :  { %v2405_v4 = vpop.permute.xlu0 %2404 }
0x321f   :  { %v2407_v5 = vmul.f32 %v3389_v31, %v2405_v4 }
0x3221   :  { %2409 = vrot.lane.b32.xlu1 %v2407_v5, %s3512_s2  ;;  %v79_v5 = vld [vmem:[%s4193_s0] sm:$0xff]  ;;  %s3513_s0 = smov [#allocation10]  }
0x3222   :  { %vm2099_vm3 = vcmp.eq.s32.totalorder %v79_v5, 1  ;;  %vm2339_vm4 = vcmp.eq.s32.totalorder %v79_v5, 4  ;;  %vm2499_vm5 = vcmp.eq.s32.totalorder %v79_v5, 6  ;;  %vm2659_vm6 = vcmp.eq.s32.totalorder %v79_v5, 8 }
0x3223   :  { %v2340_v53 = vsel %vm2339_vm4, 1, %v3511_v1  ;;  %v2500_v3 = vsel %vm2499_vm5, 1, %v3511_v1  ;;  %vm2179_vm7 = vcmp.eq.s32.totalorder %v79_v5, 2  ;;  %vm2259_vm8 = vcmp.eq.s32.totalorder %v79_v5, 3 }
0x3224   :  { %vm2419_vm9 = vcmp.eq.s32.totalorder %v79_v5, 5  ;;  %vm2579_vm10 = vcmp.eq.s32.totalorder %v79_v5, 7 }
0x3293   :  { %v2410_v6 = vpop.permute.xlu1 %2409 }
0x3294   :  { %v2412_v16 = vadd.f32 %v2410_v6, %v2402_v60  ;;  %v2100_v6 = vsel %vm2099_vm3, 1, %v3511_v1 }
0x3296   :  { %3390 = vtanh.f32 %v2412_v16 }
0x32a3   :  { %v3391_v62 = vpop.eup %3390 }
0x32a4   :  { %2415 = vrot.lane.b32.xlu0 %v3391_v62, %s3512_s2 }
0x3316   :  { %v2416_v7 = vpop.permute.xlu0 %2415 }
0x3317   :  { %v4130_v59 = vmul.f32 %v3389_v31, %v2416_v7 }
0x3319   :  { %v2427_v49 = vpack.c.bf16 %v4130_v59, %v4130_v59 }
0x331b   :  { %2429 = vrot.lane.b32.xlu1 %v2427_v49, %s3505_s20 }
0x338d   :  { %v2430_v25 = vpop.permute.xlu1 %2429 }
0x338e   :  { %3141 = vmatmul.mubr.msk.bf16.vlgmr.msra.gmra.mxu1 %vm131_vm1, %v2430_v25 }
0x338f   :  { %3153 = vmatpush3.bf16.msra.mxu1 %v3999_v34  ;;  %3156 = vmatprep.mubr.msk.bf16.mxu1 %vm3510_vm0, %v3509_v0 }
0x3390   :  { %3154 = vmatprep.subr.bf16.mxu1 %v3509_v0 }
0x3393   :  { %3155 = vmatpush3.bf16.msra.mxu1 %v4004_v42 }
0x344e   :  { %v2468_v12 = vpop.f32.mrf.mxu1 }
0x344f   :  { %v2474_v13 = vadd.f32 %v2468_v12, %v1998_v11 }
0x3450   :  { %v3142_v17 = vpop.f32.mrf.mxu1 }
0x3451   :  { %3392 = vtanh.f32 %v2474_v13  ;;  %v2821_v34 = vmul.f32 -1.442695, %v2474_v13  ;;  %v2180_v13 = vsel %vm2179_vm7, 1, %v3511_v1  ;;  %v2260_v17 = vsel %vm2259_vm8, 1, %v3511_v1 }
0x3452   :  { %v2471_v45 = vpop.f32.mrf.mxu1 }
0x3453   :  { %3394 = vpow2.f32 %v2821_v34  ;;  %v2420_v45 = vsel %vm2419_vm9, 1, %v3511_v1 }
0x3454   :  { %v3143_v9 = vpop.f32.mrf.mxu1 }
0x3455   :  { %v2580_v9 = vsel %vm2579_vm10, 1, %v3511_v1 }
0x345e   :  { %v3393_v18 = vpop.eup %3392 }
0x345f   :  { %2484 = vrot.lane.b32.xlu0 %v3393_v18, %s3512_s2 }
0x3460   :  { %v3395_v20 = vpop.eup %3394 }
0x3461   :  { %v2478_v22 = vadd.f32 1.0, %v3395_v20 }
0x3463   :  { %3396 = vrcp.f32 %v2478_v22 }
0x3470   :  { %v3397_v0 = vpop.eup %3396 }
0x3471   :  { %v2482_v33 = vmul.f32 %v3397_v0, %v2412_v16  ;;  %v2660_v16 = vsel %vm2659_vm6, 1, %v3511_v1 }
0x34d1   :  { %v2485_v24 = vpop.permute.xlu0 %2484 }
0x34d2   :  { %v2487_v42 = vmul.f32 %v3397_v0, %v2485_v24 }
0x34d4   :  { %2489 = vrot.lane.b32.xlu1 %v2487_v42, %s3512_s2 }
0x3546   :  { %v2490_v26 = vpop.permute.xlu1 %2489 }
0x3547   :  { %v2492_v30 = vadd.f32 %v2490_v26, %v2482_v33 }
0x3549   :  { %3398 = vtanh.f32 %v2492_v30 }
0x3556   :  { %v3399_v27 = vpop.eup %3398 }
0x3557   :  { %2495 = vrot.lane.b32.xlu0 %v3399_v27, %s3512_s2 }
0x35c9   :  { %v2496_v10 = vpop.permute.xlu0 %2495 }
0x35ca   :  { %v4146_v63 = vmul.f32 %v3397_v0, %v2496_v10 }
0x35cc   :  { %v2507_v29 = vpack.c.bf16 %v4146_v63, %v4146_v63 }
0x35ce   :  { %2509 = vrot.lane.b32.xlu1 %v2507_v29, %s3505_s20 }
0x3640   :  { %v2510_v35 = vpop.permute.xlu1 %2509 }
0x3641   :  { %3149 = vmatmul.mubr.msk.bf16.vlgmr.msra.gmra.mxu0 %vm131_vm1, %v2510_v35 }
0x3701   :  { %v2548_v57 = vpop.f32.mrf.mxu0 }
0x3702   :  { %v2554_v36 = vadd.f32 %v2548_v57, %v2003_v48 }
0x3703   :  { %v3150_v46 = vpop.f32.mrf.mxu0 }
0x3704   :  { %3400 = vtanh.f32 %v2554_v36  ;;  %v2823_v28 = vmul.f32 -1.442695, %v2554_v36 }
0x3705   :  { %v2551_v37 = vpop.f32.mrf.mxu0 }
0x3706   :  { %3402 = vpow2.f32 %v2823_v28 }
0x3707   :  { %v3151_v38 = vpop.f32.mrf.mxu0 }
0x3711   :  { %v3401_v40 = vpop.eup %3400 }
0x3712   :  { %2564 = vrot.lane.b32.xlu0 %v3401_v40, %s3512_s2 }
0x3713   :  { %v3403_v2 = vpop.eup %3402 }
0x3714   :  { %v2558_v39 = vadd.f32 1.0, %v3403_v2 }
0x3716   :  { %3404 = vrcp.f32 %v2558_v39 }
0x3723   :  { %v3405_v41 = vpop.eup %3404 }
0x3724   :  { %v2562_v56 = vmul.f32 %v3405_v41, %v2492_v30 }
0x3784   :  { %v2565_v19 = vpop.permute.xlu0 %2564 }
0x3785   :  { %v2567_v44 = vmul.f32 %v3405_v41, %v2565_v19 }
0x3787   :  { %2569 = vrot.lane.b32.xlu1 %v2567_v44, %s3512_s2 }
0x37f9   :  { %v2570_v47 = vpop.permute.xlu1 %2569 }
0x37fa   :  { %v2572_v15 = vadd.f32 %v2570_v47, %v2562_v56 }
0x37fc   :  { %3406 = vtanh.f32 %v2572_v15 }
0x3809   :  { %v3407_v50 = vpop.eup %3406 }
0x380a   :  { %2575 = vrot.lane.b32.xlu0 %v3407_v50, %s3512_s2 }
0x387c   :  { %v2576_v51 = vpop.permute.xlu0 %2575 }
0x387d   :  { %v4157_v52 = vmul.f32 %v3405_v41, %v2576_v51 }
0x387f   :  { %v2587_v54 = vpack.c.bf16 %v4157_v52, %v4157_v52 }
0x3881   :  { %2589 = vrot.lane.b32.xlu1 %v2587_v54, %s3505_s20 }
0x38f3   :  { %v2590_v55 = vpop.permute.xlu1 %2589 }
0x38f4   :  { %3157 = vmatmul.mubr.msk.bf16.vlgmr.msra.gmra.mxu1 %vm131_vm1, %v2590_v55 }
0x39b4   :  { %v2628_v32 = vpop.f32.mrf.mxu1 }
0x39b5   :  { %v2634_v21 = vadd.f32 %v2628_v32, %v2006_v58 }
0x39b6   :  { %v3158_v8 = vpop.f32.mrf.mxu1 }
0x39b7   :  { %3408 = vtanh.f32 %v2634_v21  ;;  %v2825_v62 = vmul.f32 -1.442695, %v2634_v21 }
0x39b8   :  { %v2631_v31 = vpop.f32.mrf.mxu1 }
0x39b9   :  { %3410 = vpow2.f32 %v2825_v62 }
0x39ba   :  { %v3159_v4 = vpop.f32.mrf.mxu1 }
0x39c4   :  { %v3409_v60 = vpop.eup %3408 }
0x39c5   :  { %2644 = vrot.lane.b32.xlu0 %v3409_v60, %s3512_s2 }
0x39c6   :  { %v3411_v7 = vpop.eup %3410 }
0x39c7   :  { %v2638_v49 = vadd.f32 1.0, %v3411_v7 }
0x39c9   :  { %2102 = vperm.xlu0 %3170, %v2100_v6   ;;  %3412 = vrcp.f32 %v2638_v49 }
0x39cd   :  { %2342 = vperm.xlu0 %3170, %v2340_v53  }
0x39d1   :  { %2502 = vperm.xlu0 %3170, %v2500_v3  }
0x39d5   :  { %2662 = vperm.xlu0 %3170, %v2660_v16  }
0x39d6   :  { %v3413_v25 = vpop.eup %3412 }
0x39d7   :  { %v2642_v18 = vmul.f32 %v3413_v25, %v2572_v15 }
0x3a37   :  { %v2645_v11 = vpop.permute.xlu0 %2644 }
0x3a38   :  { %v2647_v12 = vmul.f32 %v3413_v25, %v2645_v11 }
0x3a3a   :  { %2649 = vrot.lane.b32.xlu1 %v2647_v12, %s3512_s2 }
0x3a3e   :  { %2182 = vperm.xlu1 %3171, %v2180_v13  }
0x3a42   :  { %2262 = vperm.xlu1 %3171, %v2260_v17  }
0x3a44   :  { %v2103_v42 = vpop.permute.xlu0 %2102 }
0x3a45   :  { %vm2104_vm11 = vcmp.eq.s32.totalorder %v2103_v42, 1 }
0x3a46   :  { %2422 = vperm.xlu1 %3171, %v2420_v45   ;;  %v2105_v30 = vsel %vm2104_vm11, %v4036_v14, 0.0 }
0x3a48   :  { %v2343_v33 = vpop.permute.xlu0 %2342 }
0x3a49   :  { %vm2344_vm14 = vcmp.eq.s32.totalorder %v2343_v33, 1 }
0x3a4a   :  { %2582 = vperm.xlu1 %3171, %v2580_v9  }
0x3a4c   :  { %v2503_v10 = vpop.permute.xlu0 %2502 }
0x3a4d   :  { %vm2504_vm0 = vcmp.eq.s32.totalorder %v2503_v10, 1 }
0x3a50   :  { %v2663_v57 = vpop.permute.xlu0 %2662 }
0x3a51   :  { %vm2664_vm3 = vcmp.eq.s32.totalorder %v2663_v57, 1 }
0x3aac   :  { %v2650_v34 = vpop.permute.xlu1 %2649 }
0x3aad   :  { %v2652_v20 = vadd.f32 %v2650_v34, %v2642_v18 }
0x3aaf   :  { %3414 = vtanh.f32 %v2652_v20 }
0x3ab9   :  { %v2183_v0 = vpop.permute.xlu1 %2182 }
0x3aba   :  { %vm2184_vm12 = vcmp.eq.s32.totalorder %v2183_v0, 1 }
0x3abb   :  { %v2185_v1 = vsel %vm2184_vm12, %v4066_v61, %v2105_v30 }
0x3abc   :  { %v3415_v22 = vpop.eup %3414 }
0x3abd   :  { %2655 = vrot.lane.b32.xlu1 %v3415_v22, %s3512_s2  ;;  %v2263_v24 = vpop.permute.xlu1 %2262  ;;  %s2688_s2 = sshll.u32 %s3513_s0, 4  ;;  %s2689_s2 = int_to_ptr.vmem [resolvable:$true] %s2688_s2 }
0x3abe   :  { %vm2264_vm13 = vcmp.eq.s32.totalorder %v2263_v24, 1  ;;  %s3478_s26 = scalar_lea.vmem %s2689_s2, 128  ;;  %p3483_p2 = scmp.lt.s32.totalorder %s2689_s2, %s2689_s2 }
0x3abf   :  { %v2265_v27 = vsel %vm2264_vm13, %v4097_v23, %v2185_v1  ;;  %p3479_p1 = scmp.ne.s32.totalorder %s2689_s2, %s3478_s26  ;;  %p3484_p3 = scmp.lt.s32.totalorder %s3478_s26, %s3478_s26 }
0x3ac0   :  { %v2345_v35 = vsel %vm2344_vm14, %v4114_v43, %v2265_v27 }
0x3ac1   :  { %v2423_v26 = vpop.permute.xlu1 %2422  ;;  %p3485_p4 = por %p3484_p3, %p3483_p2 }
0x3ac2   :  { %vm2424_vm15 = vcmp.eq.s32.totalorder %v2423_v26, 1 }
0x3ac3   :  { %v2425_v48 = vsel %vm2424_vm15, %v4130_v59, %v2345_v35  ;;  %p3486_p5 = pnand %p3485_p4, %p3479_p1 }
0x3ac4   :  { %v2505_v46 = vsel %vm2504_vm0, %v4146_v63, %v2425_v48 }
0x3ac5   :  { %v2583_v29 = vpop.permute.xlu1 %2582 }
0x3ac6   :  { %vm2584_vm2 = vcmp.eq.s32.totalorder %v2583_v29, 1 }
0x3ac7   :  { %v2585_v14 = vsel %vm2584_vm2, %v4157_v52, %v2505_v46 }
0x3b2f   :  { %v2656_v36 = vpop.permute.xlu1 %2655 }
0x3b30   :  { %v2658_v37 = vmul.f32 %v3413_v25, %v2656_v36 }
0x3b32   :  { %v2665_v61 = vsel %vm2664_vm3, %v2658_v37, %v2585_v14 }
0x3b33   :  { %v2666_v23 = vmul.f32 %v2665_v61, %v2665_v61 }
0x3b35   :  { %2668 = vrot.lane.b32.xlu0 %v2666_v23, %s3505_s20 }
0x3ba7   :  { %v2669_v38 = vpop.permute.xlu0 %2668 }
0x3ba8   :  { %v2671_v40 = vsel %vm131_vm1, %v2669_v38, 0.0 }
0x3ba9   :  { %2672 = vadd.xlane.f32.xlu1 %v2671_v40 }
0x3c32   :  { %v2673_v43 = vpop.xlane.xlu1 %2672 }
0x3c33   :  { %v2674_v59 = vmax.f32 %v2673_v43, 1e-12 }
0x3c35   :  { %3416 = vrsqrt.f32 %v2674_v59 }
0x3c42   :  { %v3417_v28 = vpop.eup %3416 }
0x3c43   :  { %v2676_v2 = vmul.f32 %v3417_v28, %v2665_v61 }
0x3c45   :  { %2678 = vrot.lane.b32.xlu0 %v2676_v2, %s3505_s20 }
0x3cb7   :  { %v2679_v63 = vpop.permute.xlu0 %2678 }
0x3cb8   :  { %2681 = vst.msk [vmem:[#allocation10] sm:$0xff] %vm131_vm1, %v2679_v63 }
0x3cb9   :  { %3489 = shalt.err (!%p3486_p5)
}
0x3cba   :  { %2691 = dma.vmem_to_hbm [thread:$0]  %s2689_s2, 128, %s4204_s11, [#allocation6]  }
0x3cbb   :  { %3502 = dma.done.wait [#allocation6], 128  }
0x3cbc   :  { %3503 = vsyncadd [#allocation6], 4294967168 }
0x3cbd   :  { %2695 = vsyncpa [#allocation5], 1 }
0x3cbe   :  { %2696 = vsyncpa [#allocation8], 1 }
0x3cbf   :  { %2697 = vsyncpa [#allocation6], 1 }

</bundles_post_ra>
